<compile_context>
chip_gen: v7x
topology: tpu7x:2x2x1
jax: 0.10.0
libtpu: 0.0.40
codegen_flags: <defaults>
</compile_context>

<pallas_src>
import functools

import jax
import jax.numpy as jnp
from jax import lax
from jax.experimental import pallas as pl
from jax.experimental.pallas import tpu as pltpu

LANE = 128
SUBLANE = 8
MAX_TILE_T = 32      # time steps per grid iteration


def _round_up(x, m):
    return (x + m - 1) // m * m


def _pad_axis(a, axis, new_size):
    pad = new_size - a.shape[axis]
    if pad == 0:
        return a
    widths = [(0, 0)] * a.ndim
    widths[axis] = (0, pad)
    return jnp.pad(a, widths)


def _pad_gate_dim(w, h, hp):
    """Pad the trailing 4*H gate dim gate-wise: (..., 4H) -> (..., 4Hp)."""
    lead = w.shape[:-1]
    w4 = w.reshape(lead + (4, h))
    w4 = _pad_axis(w4, w4.ndim - 1, hp)
    return w4.reshape(lead + (4 * hp,))


# ---------------------------------------------------------------------------
# Fused kernel: (input projection for the block) + masked LSTM recurrence
# ---------------------------------------------------------------------------
def _fused_lstm_layer_kernel(x_ref, m_ref, wih_ref, whh_ref, b_ref,
                             h0_ref, c0_ref,
                             out_ref, hn_ref, cn_ref,
                             gx_sc, h_sc, c_sc,
                             *, hidden_size, tile_t):
    tb = pl.program_id(1)          # time-block index (sequential axis)

    @pl.when(tb == 0)
    def _():
        h_sc[...] = h0_ref[...].astype(jnp.float32)
        c_sc[...] = c0_ref[...].astype(jnp.float32)

    tt, bb, d = x_ref.shape
    # Hoisted input projection for the whole time block: one wide-M MXU
    # matmul (M = tile_t * b_tile).  Result lives only in VMEM scratch.
    x2 = x_ref[...].reshape(tt * bb, d)                        # bf16
    gx = jnp.dot(x2, wih_ref[...],
                 preferred_element_type=jnp.float32) + b_ref[...]
    gx_sc[...] = gx.reshape(tt, bb, -1)

    w = whh_ref[...]               # (Hp, 4Hp) bf16
    H = hidden_size

    def step(i, carry):
        h, c = carry               # (bb, Hp) f32
        gates = gx_sc[i] + jnp.dot(h.astype(w.dtype), w,
                                   preferred_element_type=jnp.float32)
        i_g = jax.nn.sigmoid(gates[:, 0 * H:1 * H])
        f_g = jax.nn.sigmoid(gates[:, 1 * H:2 * H])
        g_g = jnp.tanh(gates[:, 2 * H:3 * H])
        o_g = jax.nn.sigmoid(gates[:, 3 * H:4 * H])

        c_next = f_g * c + i_g * g_g
        h_next = o_g * jnp.tanh(c_next)

        # Variable-length masking; FMA form of h_next*m + h*(1-m).
        m = m_ref[i]               # (bb, 1), broadcasts over Hp
        h = h + m * (h_next - h)
        c = c + m * (c_next - c)

        out_ref[i] = h.astype(out_ref.dtype)
        return h, c

    h, c = lax.fori_loop(0, tile_t, step, (h_sc[...], c_sc[...]), unroll=True)
    h_sc[...] = h
    c_sc[...] = c

    # Final-state outputs: only write on the last time block.
    @pl.when(tb == pl.num_programs(1) - 1)
    def _():
        hn_ref[...] = h
        cn_ref[...] = c


def _run_lstm_layer(x, mask3, w_ih, w_hh, bias, h0, c0, *, tile_t, b_tile):
    tp, bp, dp = x.shape
    hp, g4 = w_hh.shape
    nb = bp // b_tile
    nt = tp // tile_t

    kernel = functools.partial(_fused_lstm_layer_kernel,
                               hidden_size=hp, tile_t=tile_t)

    flops = 2 * tp * bp * g4 * (dp + hp)
    transcendentals = 5 * tp * bp * hp       # 3 sigmoid + 2 tanh per element
    bytes_accessed = (tp * bp * dp * 2       # x (bf16)
                      + tp * bp * 4          # mask (f32)
                      + (dp + hp) * g4 * 2   # weights (bf16)
                      + g4 * 4               # bias
                      + tp * bp * hp * 2     # layer output (bf16)
                      + 4 * bp * hp * 4)     # h0/c0/hn/cn (f32)

    out_shapes = (
        jax.ShapeDtypeStruct((tp, bp, hp), jnp.bfloat16),   # per-step h
        jax.ShapeDtypeStruct((bp, hp), jnp.float32),        # final h
        jax.ShapeDtypeStruct((bp, hp), jnp.float32),        # final c
    )
    grid_spec = pltpu.PrefetchScalarGridSpec(
        num_scalar_prefetch=0,
        grid=(nb, nt),
        in_specs=[
            pl.BlockSpec((tile_t, b_tile, dp), lambda b, t: (t, b, 0)),  # x
            pl.BlockSpec((tile_t, b_tile, 1), lambda b, t: (t, b, 0)),   # mask
            pl.BlockSpec((dp, g4), lambda b, t: (0, 0)),                 # W_ih
            pl.BlockSpec((hp, g4), lambda b, t: (0, 0)),                 # W_hh
            pl.BlockSpec((1, g4), lambda b, t: (0, 0)),                  # bias
            pl.BlockSpec((b_tile, hp), lambda b, t: (b, 0)),             # h0
            pl.BlockSpec((b_tile, hp), lambda b, t: (b, 0)),             # c0
        ],
        out_specs=[
            pl.BlockSpec((tile_t, b_tile, hp), lambda b, t: (t, b, 0)),
            pl.BlockSpec((b_tile, hp), lambda b, t: (b, 0)),
            pl.BlockSpec((b_tile, hp), lambda b, t: (b, 0)),
        ],
        scratch_shapes=[
            pltpu.VMEM((tile_t, b_tile, g4), jnp.float32),   # gates_x block
            pltpu.VMEM((b_tile, hp), jnp.float32),           # h state
            pltpu.VMEM((b_tile, hp), jnp.float32),           # c state
        ],
    )
    return pl.pallas_call(
        kernel,
        out_shape=out_shapes,
        grid_spec=grid_spec,
        compiler_params=pltpu.CompilerParams(
            dimension_semantics=("parallel", "arbitrary"),
            vmem_limit_bytes=48 * 1024 * 1024),
        cost_estimate=pl.CostEstimate(flops=flops,
                                      transcendentals=transcendentals,
                                      bytes_accessed=bytes_accessed),
    )(x, mask3, w_ih, w_hh, bias, h0, c0)


# ---------------------------------------------------------------------------
# Module-level forward
# ---------------------------------------------------------------------------
def custom_rnn_forward(x, mask, params, hx=None, batch_first=False):
    """Equivalent of CustomRNN.forward with LSTM cells.

    x: (T, B, input_size)  (or (B, T, input_size) if batch_first)
    mask: (T, B)           (or (B, T) if batch_first), float
    params: per-layer dicts {'w_ih': (D_in,4H), 'w_hh': (H,4H), 'b': (1,4H)}
    Returns (output (T,B,H) f32, (h_n (L,B,H) f32, c_n (L,B,H) f32)).
    """
    if batch_first:
        x = jnp.swapaxes(x, 0, 1)
        mask = jnp.swapaxes(mask, 0, 1)
    T, B, D = x.shape
    H = params[0]['w_hh'].shape[0]

    tile_t = min(MAX_TILE_T, _round_up(T, SUBLANE))
    Tp = _round_up(T, tile_t)
    Bp = _round_up(B, SUBLANE)
    Dp = _round_up(D, LANE)
    Hp = _round_up(H, LANE)

    # v7x megacore: split the batch into two "parallel" blocks when each half
    # stays a sublane multiple; otherwise a single batch block.
    b_tile = Bp // 2 if Bp % (2 * SUBLANE) == 0 else Bp

    if hx is None:
        h0 = jnp.zeros((B, H), jnp.float32)
        c0 = jnp.zeros((B, H), jnp.float32)
    else:
        h0, c0 = hx

    # Zero-padding to TPU-friendly shapes.  Padded hidden columns stay exactly
    # zero through the recurrence (zero weight rows/cols, zero bias, zero h0);
    # padded batch rows / time steps carry mask = 0 and are sliced off.
    xp = _pad_axis(_pad_axis(_pad_axis(x.astype(jnp.float32), 0, Tp), 1, Bp),
                   2, Dp).astype(jnp.bfloat16)
    maskp = _pad_axis(_pad_axis(mask.astype(jnp.float32), 0, Tp), 1, Bp)
    mask3 = maskp.reshape(Tp, Bp, 1)
    h0p = _pad_axis(_pad_axis(h0.astype(jnp.float32), 0, Bp), 1, Hp)
    c0p = _pad_axis(_pad_axis(c0.astype(jnp.float32), 0, Bp), 1, Hp)

    h_n, c_n = [], []
    layer_in = xp
    layer_out = None
    for layer, p in enumerate(params):
        d_in_p = Dp if layer == 0 else Hp
        w_ih = _pad_axis(_pad_gate_dim(p['w_ih'], H, Hp), 0,
                         d_in_p).astype(jnp.bfloat16)
        w_hh = _pad_axis(_pad_gate_dim(p['w_hh'], H, Hp), 0,
                         Hp).astype(jnp.bfloat16)
        bias = _pad_gate_dim(p['b'], H, Hp).astype(jnp.float32)

        layer_out, hn, cn = _run_lstm_layer(layer_in, mask3, w_ih, w_hh, bias,
                                            h0p, c0p, tile_t=tile_t,
                                            b_tile=b_tile)
        # TODO(synk): nn.Dropout with p > 0 in training mode not implemented.
        layer_in = layer_out
        h_n.append(hn[:B, :H])
        c_n.append(cn[:B, :H])

    output = layer_out[:T, :B, :H].astype(jnp.float32)
    return output, (jnp.stack(h_n, 0), jnp.stack(c_n, 0))


def init_params(key, input_size, hidden_size, num_layers):
    """Deterministic init mimicking LSTMCell.reset_parameters (U(-1/sqrt(H), 1/sqrt(H)))."""
    params = []
    std = 1.0 / jnp.sqrt(jnp.float32(hidden_size))
    for layer in range(num_layers):
        d_in = input_size if layer == 0 else hidden_size
        key, k1, k2, k3, k4 = jax.random.split(key, 5)
        w_ih = jax.random.uniform(k1, (d_in, 4 * hidden_size), jnp.float32, -std, std)
        w_hh = jax.random.uniform(k2, (hidden_size, 4 * hidden_size), jnp.float32, -std, std)
        b_ih = jax.random.uniform(k3, (4 * hidden_size,), jnp.float32, -std, std)
        b_hh = jax.random.uniform(k4, (4 * hidden_size,), jnp.float32, -std, std)
        params.append({
            'w_ih': w_ih,
            'w_hh': w_hh,
            'b': (b_ih + b_hh).reshape(1, 4 * hidden_size),
        })
    return params


if __name__ == "__main__":
    key = jax.random.PRNGKey(0)

    seq_len = 16
    batch = 4
    input_size = 16
    hidden_size = 32
    num_layers = 2

    key, kx = jax.random.split(key)
    x = jax.random.normal(kx, (seq_len, batch, input_size), jnp.float32)

    # variable-length mask: 1.0 while t < length[b], else 0.0
    lengths = jnp.array([16, 11, 5, 9], dtype=jnp.int32)
    t_idx = jnp.arange(seq_len)[:, None]
    mask = (t_idx < lengths[None, :]).astype(jnp.float32)   # (T, B)

    params = init_params(key, input_size, hidden_size, num_layers)

    output, (h_n, c_n) = custom_rnn_forward(x, mask, params)
    jax.block_until_ready((output, h_n, c_n))

    assert output.shape == (seq_len, batch, hidden_size)
    assert h_n.shape == (num_layers, batch, hidden_size)
    assert c_n.shape == (num_layers, batch, hidden_size)

    # Masked-state sanity: once mask goes to 0 the hidden state is held, and
    # the returned final state equals the last unmasked output (output is
    # bf16-rounded; h_n is the exact f32 state -> small tolerance).
    b = 1
    L = int(lengths[b])
    assert jnp.allclose(output[L - 1, b], output[-1, b], atol=1e-6)
    assert jnp.allclose(h_n[-1, b], output[L - 1, b], atol=1e-2)

    print("KERNEL_OK")
</pallas_src>

<mosaic_0001>
module attributes {stable_mosaic.version = 11 : i64} {
  func.func @_fused_lstm_layer_kernel(%arg0: i32, %arg1: i32, %arg2: memref<16x8x128xbf16, #tpu.memory_space<vmem>>, %arg3: memref<16x8x1xf32, #tpu.memory_space<vmem>>, %arg4: memref<128x512xbf16, #tpu.memory_space<vmem>>, %arg5: memref<128x512xbf16, #tpu.memory_space<vmem>>, %arg6: memref<1x512xf32, #tpu.memory_space<vmem>>, %arg7: memref<8x128xf32, #tpu.memory_space<vmem>>, %arg8: memref<8x128xf32, #tpu.memory_space<vmem>>, %arg9: memref<16x8x128xbf16, #tpu.memory_space<vmem>>, %arg10: memref<8x128xf32, #tpu.memory_space<vmem>>, %arg11: memref<8x128xf32, #tpu.memory_space<vmem>>, %arg12: memref<16x8x512xf32, #tpu.memory_space<vmem>>, %arg13: memref<8x128xf32, #tpu.memory_space<vmem>>, %arg14: memref<8x128xf32, #tpu.memory_space<vmem>>) attributes {dimension_semantics = [#tpu.dimension_semantics<parallel>, #tpu.dimension_semantics<arbitrary>], iteration_bounds = array<i64: 1, 1>, scalar_prefetch = 0 : i64, scratch_operands = 3 : i64, tpu.core_type = #tpu.core_type<tc>, window_params = [{transform_indices = @transform_0, window_bounds = array<i64: 16, 8, 128>}, {transform_indices = @transform_1, window_bounds = array<i64: 16, 8, 1>}, {pipeline_mode = #tpu.pipeline_mode<synchronous>, transform_indices = @transform_2, window_bounds = array<i64: 128, 512>}, {pipeline_mode = #tpu.pipeline_mode<synchronous>, transform_indices = @transform_3, window_bounds = array<i64: 128, 512>}, {pipeline_mode = #tpu.pipeline_mode<synchronous>, transform_indices = @transform_4, window_bounds = array<i64: 1, 512>}, {transform_indices = @transform_5, window_bounds = array<i64: 8, 128>}, {transform_indices = @transform_6, window_bounds = array<i64: 8, 128>}, {transform_indices = @transform_7, window_bounds = array<i64: 16, 8, 128>}, {transform_indices = @transform_8, window_bounds = array<i64: 8, 128>}, {transform_indices = @transform_9, window_bounds = array<i64: 8, 128>}]} {
    %c0_i32 = arith.constant 0 : i32
    %0 = arith.cmpi eq, %arg1, %c0_i32 : i32
    %1 = arith.extui %0 : i1 to i32
    %c0_i32_0 = arith.constant 0 : i32
    %2 = arith.cmpi ne, %1, %c0_i32_0 : i32
    scf.if %2 {
      %c0_183 = arith.constant 0 : index
      %c0_184 = arith.constant 0 : index
      %772 = vector.load %arg7[%c0_183, %c0_184] : memref<8x128xf32, #tpu.memory_space<vmem>>, vector<8x128xf32>
      %c0_185 = arith.constant 0 : index
      %c0_186 = arith.constant 0 : index
      %773 = vector.load %arg13[%c0_185, %c0_186] : memref<8x128xf32, #tpu.memory_space<vmem>>, vector<8x128xf32>
      tpu.vector_store %arg13[%c0_185, %c0_186], %772 {strides = array<i32>} : memref<8x128xf32, #tpu.memory_space<vmem>>, vector<8x128xf32>,
      %c0_187 = arith.constant 0 : index
      %c0_188 = arith.constant 0 : index
      %774 = vector.load %arg8[%c0_187, %c0_188] : memref<8x128xf32, #tpu.memory_space<vmem>>, vector<8x128xf32>
      %c0_189 = arith.constant 0 : index
      %c0_190 = arith.constant 0 : index
      %775 = vector.load %arg14[%c0_189, %c0_190] : memref<8x128xf32, #tpu.memory_space<vmem>>, vector<8x128xf32>
      tpu.vector_store %arg14[%c0_189, %c0_190], %774 {strides = array<i32>} : memref<8x128xf32, #tpu.memory_space<vmem>>, vector<8x128xf32>,
    } else {
    }
    %c0 = arith.constant 0 : index
    %c0_1 = arith.constant 0 : index
    %c0_2 = arith.constant 0 : index
    %3 = vector.load %arg2[%c0, %c0_1, %c0_2] : memref<16x8x128xbf16, #tpu.memory_space<vmem>>, vector<16x8x128xbf16>
    %4 = vector.shape_cast %3 : vector<16x8x128xbf16> to vector<128x128xbf16>
    %c0_3 = arith.constant 0 : index
    %c0_4 = arith.constant 0 : index
    %5 = vector.load %arg4[%c0_3, %c0_4] : memref<128x512xbf16, #tpu.memory_space<vmem>>, vector<128x512xbf16>
    %cst = arith.constant dense<0.000000e+00> : vector<128x512xf32>
    %6 = tpu.matmul %4, %5, %cst {dimension_numbers = #tpu.dot_dimension_numbers<[1], [0], [0], [1], [0, 0, 1, 1], [], []>} : vector<128x128xbf16>, vector<128x512xbf16>, vector<128x512xf32> -> vector<128x512xf32>
    %c0_5 = arith.constant 0 : index
    %c0_6 = arith.constant 0 : index
    %7 = vector.load %arg6[%c0_5, %c0_6] : memref<1x512xf32, #tpu.memory_space<vmem>>, vector<1x512xf32>
    %8 = vector.broadcast %7 : vector<1x512xf32> to vector<128x512xf32>
    %9 = arith.addf %6, %8 : vector<128x512xf32>
    %10 = vector.shape_cast %9 : vector<128x512xf32> to vector<16x8x512xf32>
    %c0_7 = arith.constant 0 : index
    %c0_8 = arith.constant 0 : index
    %c0_9 = arith.constant 0 : index
    %11 = vector.load %arg12[%c0_7, %c0_8, %c0_9] : memref<16x8x512xf32, #tpu.memory_space<vmem>>, vector<16x8x512xf32>
    tpu.vector_store %arg12[%c0_7, %c0_8, %c0_9], %10 {strides = array<i32>} : memref<16x8x512xf32, #tpu.memory_space<vmem>>, vector<16x8x512xf32>,
    %c0_10 = arith.constant 0 : index
    %c0_11 = arith.constant 0 : index
    %12 = vector.load %arg5[%c0_10, %c0_11] : memref<128x512xbf16, #tpu.memory_space<vmem>>, vector<128x512xbf16>
    %c0_12 = arith.constant 0 : index
    %c0_13 = arith.constant 0 : index
    %13 = vector.load %arg13[%c0_12, %c0_13] : memref<8x128xf32, #tpu.memory_space<vmem>>, vector<8x128xf32>
    %c0_14 = arith.constant 0 : index
    %c0_15 = arith.constant 0 : index
    %14 = vector.load %arg14[%c0_14, %c0_15] : memref<8x128xf32, #tpu.memory_space<vmem>>, vector<8x128xf32>
    %c0_i32_16 = arith.constant 0 : i32
    %15 = arith.index_cast %c0_i32_16 : i32 to index
    %c0_17 = arith.constant 0 : index
    %c0_18 = arith.constant 0 : index
    %16 = vector.load %arg12[%15, %c0_17, %c0_18] : memref<16x8x512xf32, #tpu.memory_space<vmem>>, vector<1x8x512xf32>
    %17 = vector.shape_cast %16 : vector<1x8x512xf32> to vector<8x512xf32>
    %18 = arith.truncf %13 : vector<8x128xf32> to vector<8x128xbf16>
    %cst_19 = arith.constant dense<0.000000e+00> : vector<8x512xf32>
    %19 = tpu.matmul %18, %12, %cst_19 {dimension_numbers = #tpu.dot_dimension_numbers<[1], [0], [0], [1], [0, 0, 1, 1], [], []>} : vector<8x128xbf16>, vector<128x512xbf16>, vector<8x512xf32> -> vector<8x512xf32>
    %20 = arith.addf %17, %19 : vector<8x512xf32>
    %21 = vector.extract_strided_slice %20 {offsets = [0, 0], sizes = [8, 128], strides = [1, 1]} : vector<8x512xf32> to vector<8x128xf32>
    %22 = arith.negf %21 : vector<8x128xf32>
    %23 = math.exp %22 : vector<8x128xf32>
    %cst_20 = arith.constant 1.000000e+00 : f32
    %24 = vector.broadcast %cst_20 : f32 to vector<8x128xf32>
    %25 = arith.addf %24, %23 : vector<8x128xf32>
    %26 = arith.divf %24, %25 : vector<8x128xf32>
    %27 = vector.extract_strided_slice %20 {offsets = [0, 128], sizes = [8, 128], strides = [1, 1]} : vector<8x512xf32> to vector<8x128xf32>
    %28 = arith.negf %27 : vector<8x128xf32>
    %29 = math.exp %28 : vector<8x128xf32>
    %cst_21 = arith.constant 1.000000e+00 : f32
    %30 = vector.broadcast %cst_21 : f32 to vector<8x128xf32>
    %31 = arith.addf %30, %29 : vector<8x128xf32>
    %32 = arith.divf %30, %31 : vector<8x128xf32>
    %33 = vector.extract_strided_slice %20 {offsets = [0, 256], sizes = [8, 128], strides = [1, 1]} : vector<8x512xf32> to vector<8x128xf32>
    %34 = math.tanh %33 : vector<8x128xf32>
    %35 = vector.extract_strided_slice %20 {offsets = [0, 384], sizes = [8, 128], strides = [1, 1]} : vector<8x512xf32> to vector<8x128xf32>
    %36 = arith.negf %35 : vector<8x128xf32>
    %37 = math.exp %36 : vector<8x128xf32>
    %cst_22 = arith.constant 1.000000e+00 : f32
    %38 = vector.broadcast %cst_22 : f32 to vector<8x128xf32>
    %39 = arith.addf %38, %37 : vector<8x128xf32>
    %40 = arith.divf %38, %39 : vector<8x128xf32>
    %41 = arith.mulf %32, %14 : vector<8x128xf32>
    %42 = arith.mulf %26, %34 : vector<8x128xf32>
    %43 = arith.addf %41, %42 : vector<8x128xf32>
    %44 = math.tanh %43 : vector<8x128xf32>
    %45 = arith.mulf %40, %44 : vector<8x128xf32>
    %46 = arith.index_cast %c0_i32_16 : i32 to index
    %c0_23 = arith.constant 0 : index
    %c0_24 = arith.constant 0 : index
    %47 = vector.load %arg3[%46, %c0_23, %c0_24] : memref<16x8x1xf32, #tpu.memory_space<vmem>>, vector<1x8x1xf32>
    %48 = vector.shape_cast %47 : vector<1x8x1xf32> to vector<8x1xf32>
    %49 = arith.subf %45, %13 : vector<8x128xf32>
    %50 = vector.broadcast %48 : vector<8x1xf32> to vector<8x128xf32>
    %51 = arith.mulf %50, %49 : vector<8x128xf32>
    %52 = arith.addf %13, %51 : vector<8x128xf32>
    %53 = arith.subf %43, %14 : vector<8x128xf32>
    %54 = vector.broadcast %48 : vector<8x1xf32> to vector<8x128xf32>
    %55 = arith.mulf %54, %53 : vector<8x128xf32>
    %56 = arith.addf %14, %55 : vector<8x128xf32>
    %57 = arith.truncf %52 : vector<8x128xf32> to vector<8x128xbf16>
    %58 = arith.index_cast %c0_i32_16 : i32 to index
    %c0_25 = arith.constant 0 : index
    %c0_26 = arith.constant 0 : index
    %59 = vector.load %arg9[%58, %c0_25, %c0_26] : memref<16x8x128xbf16, #tpu.memory_space<vmem>>, vector<1x8x128xbf16>
    %60 = vector.shape_cast %59 : vector<1x8x128xbf16> to vector<8x128xbf16>
    %61 = vector.shape_cast %57 : vector<8x128xbf16> to vector<1x8x128xbf16>
    tpu.vector_store %arg9[%58, %c0_25, %c0_26], %61 {strides = array<i32>} : memref<16x8x128xbf16, #tpu.memory_space<vmem>>, vector<1x8x128xbf16>,
    %c1_i32 = arith.constant 1 : i32
    %62 = arith.index_cast %c1_i32 : i32 to index
    %c0_27 = arith.constant 0 : index
    %c0_28 = arith.constant 0 : index
    %63 = vector.load %arg12[%62, %c0_27, %c0_28] : memref<16x8x512xf32, #tpu.memory_space<vmem>>, vector<1x8x512xf32>
    %64 = vector.shape_cast %63 : vector<1x8x512xf32> to vector<8x512xf32>
    %65 = arith.truncf %52 : vector<8x128xf32> to vector<8x128xbf16>
    %cst_29 = arith.constant dense<0.000000e+00> : vector<8x512xf32>
    %66 = tpu.matmul %65, %12, %cst_29 {dimension_numbers = #tpu.dot_dimension_numbers<[1], [0], [0], [1], [0, 0, 1, 1], [], []>} : vector<8x128xbf16>, vector<128x512xbf16>, vector<8x512xf32> -> vector<8x512xf32>
    %67 = arith.addf %64, %66 : vector<8x512xf32>
    %68 = vector.extract_strided_slice %67 {offsets = [0, 0], sizes = [8, 128], strides = [1, 1]} : vector<8x512xf32> to vector<8x128xf32>
    %69 = arith.negf %68 : vector<8x128xf32>
    %70 = math.exp %69 : vector<8x128xf32>
    %cst_30 = arith.constant 1.000000e+00 : f32
    %71 = vector.broadcast %cst_30 : f32 to vector<8x128xf32>
    %72 = arith.addf %71, %70 : vector<8x128xf32>
    %73 = arith.divf %71, %72 : vector<8x128xf32>
    %74 = vector.extract_strided_slice %67 {offsets = [0, 128], sizes = [8, 128], strides = [1, 1]} : vector<8x512xf32> to vector<8x128xf32>
    %75 = arith.negf %74 : vector<8x128xf32>
    %76 = math.exp %75 : vector<8x128xf32>
    %cst_31 = arith.constant 1.000000e+00 : f32
    %77 = vector.broadcast %cst_31 : f32 to vector<8x128xf32>
    %78 = arith.addf %77, %76 : vector<8x128xf32>
    %79 = arith.divf %77, %78 : vector<8x128xf32>
    %80 = vector.extract_strided_slice %67 {offsets = [0, 256], sizes = [8, 128], strides = [1, 1]} : vector<8x512xf32> to vector<8x128xf32>
    %81 = math.tanh %80 : vector<8x128xf32>
    %82 = vector.extract_strided_slice %67 {offsets = [0, 384], sizes = [8, 128], strides = [1, 1]} : vector<8x512xf32> to vector<8x128xf32>
    %83 = arith.negf %82 : vector<8x128xf32>
    %84 = math.exp %83 : vector<8x128xf32>
    %cst_32 = arith.constant 1.000000e+00 : f32
    %85 = vector.broadcast %cst_32 : f32 to vector<8x128xf32>
    %86 = arith.addf %85, %84 : vector<8x128xf32>
    %87 = arith.divf %85, %86 : vector<8x128xf32>
    %88 = arith.mulf %79, %56 : vector<8x128xf32>
    %89 = arith.mulf %73, %81 : vector<8x128xf32>
    %90 = arith.addf %88, %89 : vector<8x128xf32>
    %91 = math.tanh %90 : vector<8x128xf32>
    %92 = arith.mulf %87, %91 : vector<8x128xf32>
    %93 = arith.index_cast %c1_i32 : i32 to index
    %c0_33 = arith.constant 0 : index
    %c0_34 = arith.constant 0 : index
    %94 = vector.load %arg3[%93, %c0_33, %c0_34] : memref<16x8x1xf32, #tpu.memory_space<vmem>>, vector<1x8x1xf32>
    %95 = vector.shape_cast %94 : vector<1x8x1xf32> to vector<8x1xf32>
    %96 = arith.subf %92, %52 : vector<8x128xf32>
    %97 = vector.broadcast %95 : vector<8x1xf32> to vector<8x128xf32>
    %98 = arith.mulf %97, %96 : vector<8x128xf32>
    %99 = arith.addf %52, %98 : vector<8x128xf32>
    %100 = arith.subf %90, %56 : vector<8x128xf32>
    %101 = vector.broadcast %95 : vector<8x1xf32> to vector<8x128xf32>
    %102 = arith.mulf %101, %100 : vector<8x128xf32>
    %103 = arith.addf %56, %102 : vector<8x128xf32>
    %104 = arith.truncf %99 : vector<8x128xf32> to vector<8x128xbf16>
    %105 = arith.index_cast %c1_i32 : i32 to index
    %c0_35 = arith.constant 0 : index
    %c0_36 = arith.constant 0 : index
    %106 = vector.load %arg9[%105, %c0_35, %c0_36] : memref<16x8x128xbf16, #tpu.memory_space<vmem>>, vector<1x8x128xbf16>
    %107 = vector.shape_cast %106 : vector<1x8x128xbf16> to vector<8x128xbf16>
    %108 = vector.shape_cast %104 : vector<8x128xbf16> to vector<1x8x128xbf16>
    tpu.vector_store %arg9[%105, %c0_35, %c0_36], %108 {strides = array<i32>} : memref<16x8x128xbf16, #tpu.memory_space<vmem>>, vector<1x8x128xbf16>,
    %c2_i32 = arith.constant 2 : i32
    %109 = arith.index_cast %c2_i32 : i32 to index
    %c0_37 = arith.constant 0 : index
    %c0_38 = arith.constant 0 : index
    %110 = vector.load %arg12[%109, %c0_37, %c0_38] : memref<16x8x512xf32, #tpu.memory_space<vmem>>, vector<1x8x512xf32>
    %111 = vector.shape_cast %110 : vector<1x8x512xf32> to vector<8x512xf32>
    %112 = arith.truncf %99 : vector<8x128xf32> to vector<8x128xbf16>
    %cst_39 = arith.constant dense<0.000000e+00> : vector<8x512xf32>
    %113 = tpu.matmul %112, %12, %cst_39 {dimension_numbers = #tpu.dot_dimension_numbers<[1], [0], [0], [1], [0, 0, 1, 1], [], []>} : vector<8x128xbf16>, vector<128x512xbf16>, vector<8x512xf32> -> vector<8x512xf32>
    %114 = arith.addf %111, %113 : vector<8x512xf32>
    %115 = vector.extract_strided_slice %114 {offsets = [0, 0], sizes = [8, 128], strides = [1, 1]} : vector<8x512xf32> to vector<8x128xf32>
    %116 = arith.negf %115 : vector<8x128xf32>
    %117 = math.exp %116 : vector<8x128xf32>
    %cst_40 = arith.constant 1.000000e+00 : f32
    %118 = vector.broadcast %cst_40 : f32 to vector<8x128xf32>
    %119 = arith.addf %118, %117 : vector<8x128xf32>
    %120 = arith.divf %118, %119 : vector<8x128xf32>
    %121 = vector.extract_strided_slice %114 {offsets = [0, 128], sizes = [8, 128], strides = [1, 1]} : vector<8x512xf32> to vector<8x128xf32>
    %122 = arith.negf %121 : vector<8x128xf32>
    %123 = math.exp %122 : vector<8x128xf32>
    %cst_41 = arith.constant 1.000000e+00 : f32
    %124 = vector.broadcast %cst_41 : f32 to vector<8x128xf32>
    %125 = arith.addf %124, %123 : vector<8x128xf32>
    %126 = arith.divf %124, %125 : vector<8x128xf32>
    %127 = vector.extract_strided_slice %114 {offsets = [0, 256], sizes = [8, 128], strides = [1, 1]} : vector<8x512xf32> to vector<8x128xf32>
    %128 = math.tanh %127 : vector<8x128xf32>
    %129 = vector.extract_strided_slice %114 {offsets = [0, 384], sizes = [8, 128], strides = [1, 1]} : vector<8x512xf32> to vector<8x128xf32>
    %130 = arith.negf %129 : vector<8x128xf32>
    %131 = math.exp %130 : vector<8x128xf32>
    %cst_42 = arith.constant 1.000000e+00 : f32
    %132 = vector.broadcast %cst_42 : f32 to vector<8x128xf32>
    %133 = arith.addf %132, %131 : vector<8x128xf32>
    %134 = arith.divf %132, %133 : vector<8x128xf32>
    %135 = arith.mulf %126, %103 : vector<8x128xf32>
    %136 = arith.mulf %120, %128 : vector<8x128xf32>
    %137 = arith.addf %135, %136 : vector<8x128xf32>
    %138 = math.tanh %137 : vector<8x128xf32>
    %139 = arith.mulf %134, %138 : vector<8x128xf32>
    %140 = arith.index_cast %c2_i32 : i32 to index
    %c0_43 = arith.constant 0 : index
    %c0_44 = arith.constant 0 : index
    %141 = vector.load %arg3[%140, %c0_43, %c0_44] : memref<16x8x1xf32, #tpu.memory_space<vmem>>, vector<1x8x1xf32>
    %142 = vector.shape_cast %141 : vector<1x8x1xf32> to vector<8x1xf32>
    %143 = arith.subf %139, %99 : vector<8x128xf32>
    %144 = vector.broadcast %142 : vector<8x1xf32> to vector<8x128xf32>
    %145 = arith.mulf %144, %143 : vector<8x128xf32>
    %146 = arith.addf %99, %145 : vector<8x128xf32>
    %147 = arith.subf %137, %103 : vector<8x128xf32>
    %148 = vector.broadcast %142 : vector<8x1xf32> to vector<8x128xf32>
    %149 = arith.mulf %148, %147 : vector<8x128xf32>
    %150 = arith.addf %103, %149 : vector<8x128xf32>
    %151 = arith.truncf %146 : vector<8x128xf32> to vector<8x128xbf16>
    %152 = arith.index_cast %c2_i32 : i32 to index
    %c0_45 = arith.constant 0 : index
    %c0_46 = arith.constant 0 : index
    %153 = vector.load %arg9[%152, %c0_45, %c0_46] : memref<16x8x128xbf16, #tpu.memory_space<vmem>>, vector<1x8x128xbf16>
    %154 = vector.shape_cast %153 : vector<1x8x128xbf16> to vector<8x128xbf16>
    %155 = vector.shape_cast %151 : vector<8x128xbf16> to vector<1x8x128xbf16>
    tpu.vector_store %arg9[%152, %c0_45, %c0_46], %155 {strides = array<i32>} : memref<16x8x128xbf16, #tpu.memory_space<vmem>>, vector<1x8x128xbf16>,
    %c3_i32 = arith.constant 3 : i32
    %156 = arith.index_cast %c3_i32 : i32 to index
    %c0_47 = arith.constant 0 : index
    %c0_48 = arith.constant 0 : index
    %157 = vector.load %arg12[%156, %c0_47, %c0_48] : memref<16x8x512xf32, #tpu.memory_space<vmem>>, vector<1x8x512xf32>
    %158 = vector.shape_cast %157 : vector<1x8x512xf32> to vector<8x512xf32>
    %159 = arith.truncf %146 : vector<8x128xf32> to vector<8x128xbf16>
    %cst_49 = arith.constant dense<0.000000e+00> : vector<8x512xf32>
    %160 = tpu.matmul %159, %12, %cst_49 {dimension_numbers = #tpu.dot_dimension_numbers<[1], [0], [0], [1], [0, 0, 1, 1], [], []>} : vector<8x128xbf16>, vector<128x512xbf16>, vector<8x512xf32> -> vector<8x512xf32>
    %161 = arith.addf %158, %160 : vector<8x512xf32>
    %162 = vector.extract_strided_slice %161 {offsets = [0, 0], sizes = [8, 128], strides = [1, 1]} : vector<8x512xf32> to vector<8x128xf32>
    %163 = arith.negf %162 : vector<8x128xf32>
    %164 = math.exp %163 : vector<8x128xf32>
    %cst_50 = arith.constant 1.000000e+00 : f32
    %165 = vector.broadcast %cst_50 : f32 to vector<8x128xf32>
    %166 = arith.addf %165, %164 : vector<8x128xf32>
    %167 = arith.divf %165, %166 : vector<8x128xf32>
    %168 = vector.extract_strided_slice %161 {offsets = [0, 128], sizes = [8, 128], strides = [1, 1]} : vector<8x512xf32> to vector<8x128xf32>
    %169 = arith.negf %168 : vector<8x128xf32>
    %170 = math.exp %169 : vector<8x128xf32>
    %cst_51 = arith.constant 1.000000e+00 : f32
    %171 = vector.broadcast %cst_51 : f32 to vector<8x128xf32>
    %172 = arith.addf %171, %170 : vector<8x128xf32>
    %173 = arith.divf %171, %172 : vector<8x128xf32>
    %174 = vector.extract_strided_slice %161 {offsets = [0, 256], sizes = [8, 128], strides = [1, 1]} : vector<8x512xf32> to vector<8x128xf32>
    %175 = math.tanh %174 : vector<8x128xf32>
    %176 = vector.extract_strided_slice %161 {offsets = [0, 384], sizes = [8, 128], strides = [1, 1]} : vector<8x512xf32> to vector<8x128xf32>
    %177 = arith.negf %176 : vector<8x128xf32>
    %178 = math.exp %177 : vector<8x128xf32>
    %cst_52 = arith.constant 1.000000e+00 : f32
    %179 = vector.broadcast %cst_52 : f32 to vector<8x128xf32>
    %180 = arith.addf %179, %178 : vector<8x128xf32>
    %181 = arith.divf %179, %180 : vector<8x128xf32>
    %182 = arith.mulf %173, %150 : vector<8x128xf32>
    %183 = arith.mulf %167, %175 : vector<8x128xf32>
    %184 = arith.addf %182, %183 : vector<8x128xf32>
    %185 = math.tanh %184 : vector<8x128xf32>
    %186 = arith.mulf %181, %185 : vector<8x128xf32>
    %187 = arith.index_cast %c3_i32 : i32 to index
    %c0_53 = arith.constant 0 : index
    %c0_54 = arith.constant 0 : index
    %188 = vector.load %arg3[%187, %c0_53, %c0_54] : memref<16x8x1xf32, #tpu.memory_space<vmem>>, vector<1x8x1xf32>
    %189 = vector.shape_cast %188 : vector<1x8x1xf32> to vector<8x1xf32>
    %190 = arith.subf %186, %146 : vector<8x128xf32>
    %191 = vector.broadcast %189 : vector<8x1xf32> to vector<8x128xf32>
    %192 = arith.mulf %191, %190 : vector<8x128xf32>
    %193 = arith.addf %146, %192 : vector<8x128xf32>
    %194 = arith.subf %184, %150 : vector<8x128xf32>
    %195 = vector.broadcast %189 : vector<8x1xf32> to vector<8x128xf32>
    %196 = arith.mulf %195, %194 : vector<8x128xf32>
    %197 = arith.addf %150, %196 : vector<8x128xf32>
    %198 = arith.truncf %193 : vector<8x128xf32> to vector<8x128xbf16>
    %199 = arith.index_cast %c3_i32 : i32 to index
    %c0_55 = arith.constant 0 : index
    %c0_56 = arith.constant 0 : index
    %200 = vector.load %arg9[%199, %c0_55, %c0_56] : memref<16x8x128xbf16, #tpu.memory_space<vmem>>, vector<1x8x128xbf16>
    %201 = vector.shape_cast %200 : vector<1x8x128xbf16> to vector<8x128xbf16>
    %202 = vector.shape_cast %198 : vector<8x128xbf16> to vector<1x8x128xbf16>
    tpu.vector_store %arg9[%199, %c0_55, %c0_56], %202 {strides = array<i32>} : memref<16x8x128xbf16, #tpu.memory_space<vmem>>, vector<1x8x128xbf16>,
    %c4_i32 = arith.constant 4 : i32
    %203 = arith.index_cast %c4_i32 : i32 to index
    %c0_57 = arith.constant 0 : index
    %c0_58 = arith.constant 0 : index
    %204 = vector.load %arg12[%203, %c0_57, %c0_58] : memref<16x8x512xf32, #tpu.memory_space<vmem>>, vector<1x8x512xf32>
    %205 = vector.shape_cast %204 : vector<1x8x512xf32> to vector<8x512xf32>
    %206 = arith.truncf %193 : vector<8x128xf32> to vector<8x128xbf16>
    %cst_59 = arith.constant dense<0.000000e+00> : vector<8x512xf32>
    %207 = tpu.matmul %206, %12, %cst_59 {dimension_numbers = #tpu.dot_dimension_numbers<[1], [0], [0], [1], [0, 0, 1, 1], [], []>} : vector<8x128xbf16>, vector<128x512xbf16>, vector<8x512xf32> -> vector<8x512xf32>
    %208 = arith.addf %205, %207 : vector<8x512xf32>
    %209 = vector.extract_strided_slice %208 {offsets = [0, 0], sizes = [8, 128], strides = [1, 1]} : vector<8x512xf32> to vector<8x128xf32>
    %210 = arith.negf %209 : vector<8x128xf32>
    %211 = math.exp %210 : vector<8x128xf32>
    %cst_60 = arith.constant 1.000000e+00 : f32
    %212 = vector.broadcast %cst_60 : f32 to vector<8x128xf32>
    %213 = arith.addf %212, %211 : vector<8x128xf32>
    %214 = arith.divf %212, %213 : vector<8x128xf32>
    %215 = vector.extract_strided_slice %208 {offsets = [0, 128], sizes = [8, 128], strides = [1, 1]} : vector<8x512xf32> to vector<8x128xf32>
    %216 = arith.negf %215 : vector<8x128xf32>
    %217 = math.exp %216 : vector<8x128xf32>
    %cst_61 = arith.constant 1.000000e+00 : f32
    %218 = vector.broadcast %cst_61 : f32 to vector<8x128xf32>
    %219 = arith.addf %218, %217 : vector<8x128xf32>
    %220 = arith.divf %218, %219 : vector<8x128xf32>
    %221 = vector.extract_strided_slice %208 {offsets = [0, 256], sizes = [8, 128], strides = [1, 1]} : vector<8x512xf32> to vector<8x128xf32>
    %222 = math.tanh %221 : vector<8x128xf32>
    %223 = vector.extract_strided_slice %208 {offsets = [0, 384], sizes = [8, 128], strides = [1, 1]} : vector<8x512xf32> to vector<8x128xf32>
    %224 = arith.negf %223 : vector<8x128xf32>
    %225 = math.exp %224 : vector<8x128xf32>
    %cst_62 = arith.constant 1.000000e+00 : f32
    %226 = vector.broadcast %cst_62 : f32 to vector<8x128xf32>
    %227 = arith.addf %226, %225 : vector<8x128xf32>
    %228 = arith.divf %226, %227 : vector<8x128xf32>
    %229 = arith.mulf %220, %197 : vector<8x128xf32>
    %230 = arith.mulf %214, %222 : vector<8x128xf32>
    %231 = arith.addf %229, %230 : vector<8x128xf32>
    %232 = math.tanh %231 : vector<8x128xf32>
    %233 = arith.mulf %228, %232 : vector<8x128xf32>
    %234 = arith.index_cast %c4_i32 : i32 to index
    %c0_63 = arith.constant 0 : index
    %c0_64 = arith.constant 0 : index
    %235 = vector.load %arg3[%234, %c0_63, %c0_64] : memref<16x8x1xf32, #tpu.memory_space<vmem>>, vector<1x8x1xf32>
    %236 = vector.shape_cast %235 : vector<1x8x1xf32> to vector<8x1xf32>
    %237 = arith.subf %233, %193 : vector<8x128xf32>
    %238 = vector.broadcast %236 : vector<8x1xf32> to vector<8x128xf32>
    %239 = arith.mulf %238, %237 : vector<8x128xf32>
    %240 = arith.addf %193, %239 : vector<8x128xf32>
    %241 = arith.subf %231, %197 : vector<8x128xf32>
    %242 = vector.broadcast %236 : vector<8x1xf32> to vector<8x128xf32>
    %243 = arith.mulf %242, %241 : vector<8x128xf32>
    %244 = arith.addf %197, %243 : vector<8x128xf32>
    %245 = arith.truncf %240 : vector<8x128xf32> to vector<8x128xbf16>
    %246 = arith.index_cast %c4_i32 : i32 to index
    %c0_65 = arith.constant 0 : index
    %c0_66 = arith.constant 0 : index
    %247 = vector.load %arg9[%246, %c0_65, %c0_66] : memref<16x8x128xbf16, #tpu.memory_space<vmem>>, vector<1x8x128xbf16>
    %248 = vector.shape_cast %247 : vector<1x8x128xbf16> to vector<8x128xbf16>
    %249 = vector.shape_cast %245 : vector<8x128xbf16> to vector<1x8x128xbf16>
    tpu.vector_store %arg9[%246, %c0_65, %c0_66], %249 {strides = array<i32>} : memref<16x8x128xbf16, #tpu.memory_space<vmem>>, vector<1x8x128xbf16>,
    %c5_i32 = arith.constant 5 : i32
    %250 = arith.index_cast %c5_i32 : i32 to index
    %c0_67 = arith.constant 0 : index
    %c0_68 = arith.constant 0 : index
    %251 = vector.load %arg12[%250, %c0_67, %c0_68] : memref<16x8x512xf32, #tpu.memory_space<vmem>>, vector<1x8x512xf32>
    %252 = vector.shape_cast %251 : vector<1x8x512xf32> to vector<8x512xf32>
    %253 = arith.truncf %240 : vector<8x128xf32> to vector<8x128xbf16>
    %cst_69 = arith.constant dense<0.000000e+00> : vector<8x512xf32>
    %254 = tpu.matmul %253, %12, %cst_69 {dimension_numbers = #tpu.dot_dimension_numbers<[1], [0], [0], [1], [0, 0, 1, 1], [], []>} : vector<8x128xbf16>, vector<128x512xbf16>, vector<8x512xf32> -> vector<8x512xf32>
    %255 = arith.addf %252, %254 : vector<8x512xf32>
    %256 = vector.extract_strided_slice %255 {offsets = [0, 0], sizes = [8, 128], strides = [1, 1]} : vector<8x512xf32> to vector<8x128xf32>
    %257 = arith.negf %256 : vector<8x128xf32>
    %258 = math.exp %257 : vector<8x128xf32>
    %cst_70 = arith.constant 1.000000e+00 : f32
    %259 = vector.broadcast %cst_70 : f32 to vector<8x128xf32>
    %260 = arith.addf %259, %258 : vector<8x128xf32>
    %261 = arith.divf %259, %260 : vector<8x128xf32>
    %262 = vector.extract_strided_slice %255 {offsets = [0, 128], sizes = [8, 128], strides = [1, 1]} : vector<8x512xf32> to vector<8x128xf32>
    %263 = arith.negf %262 : vector<8x128xf32>
    %264 = math.exp %263 : vector<8x128xf32>
    %cst_71 = arith.constant 1.000000e+00 : f32
    %265 = vector.broadcast %cst_71 : f32 to vector<8x128xf32>
    %266 = arith.addf %265, %264 : vector<8x128xf32>
    %267 = arith.divf %265, %266 : vector<8x128xf32>
    %268 = vector.extract_strided_slice %255 {offsets = [0, 256], sizes = [8, 128], strides = [1, 1]} : vector<8x512xf32> to vector<8x128xf32>
    %269 = math.tanh %268 : vector<8x128xf32>
    %270 = vector.extract_strided_slice %255 {offsets = [0, 384], sizes = [8, 128], strides = [1, 1]} : vector<8x512xf32> to vector<8x128xf32>
    %271 = arith.negf %270 : vector<8x128xf32>
    %272 = math.exp %271 : vector<8x128xf32>
    %cst_72 = arith.constant 1.000000e+00 : f32
    %273 = vector.broadcast %cst_72 : f32 to vector<8x128xf32>
    %274 = arith.addf %273, %272 : vector<8x128xf32>
    %275 = arith.divf %273, %274 : vector<8x128xf32>
    %276 = arith.mulf %267, %244 : vector<8x128xf32>
    %277 = arith.mulf %261, %269 : vector<8x128xf32>
    %278 = arith.addf %276, %277 : vector<8x128xf32>
    %279 = math.tanh %278 : vector<8x128xf32>
    %280 = arith.mulf %275, %279 : vector<8x128xf32>
    %281 = arith.index_cast %c5_i32 : i32 to index
    %c0_73 = arith.constant 0 : index
    %c0_74 = arith.constant 0 : index
    %282 = vector.load %arg3[%281, %c0_73, %c0_74] : memref<16x8x1xf32, #tpu.memory_space<vmem>>, vector<1x8x1xf32>
    %283 = vector.shape_cast %282 : vector<1x8x1xf32> to vector<8x1xf32>
    %284 = arith.subf %280, %240 : vector<8x128xf32>
    %285 = vector.broadcast %283 : vector<8x1xf32> to vector<8x128xf32>
    %286 = arith.mulf %285, %284 : vector<8x128xf32>
    %287 = arith.addf %240, %286 : vector<8x128xf32>
    %288 = arith.subf %278, %244 : vector<8x128xf32>
    %289 = vector.broadcast %283 : vector<8x1xf32> to vector<8x128xf32>
    %290 = arith.mulf %289, %288 : vector<8x128xf32>
    %291 = arith.addf %244, %290 : vector<8x128xf32>
    %292 = arith.truncf %287 : vector<8x128xf32> to vector<8x128xbf16>
    %293 = arith.index_cast %c5_i32 : i32 to index
    %c0_75 = arith.constant 0 : index
    %c0_76 = arith.constant 0 : index
    %294 = vector.load %arg9[%293, %c0_75, %c0_76] : memref<16x8x128xbf16, #tpu.memory_space<vmem>>, vector<1x8x128xbf16>
    %295 = vector.shape_cast %294 : vector<1x8x128xbf16> to vector<8x128xbf16>
    %296 = vector.shape_cast %292 : vector<8x128xbf16> to vector<1x8x128xbf16>
    tpu.vector_store %arg9[%293, %c0_75, %c0_76], %296 {strides = array<i32>} : memref<16x8x128xbf16, #tpu.memory_space<vmem>>, vector<1x8x128xbf16>,
    %c6_i32 = arith.constant 6 : i32
    %297 = arith.index_cast %c6_i32 : i32 to index
    %c0_77 = arith.constant 0 : index
    %c0_78 = arith.constant 0 : index
    %298 = vector.load %arg12[%297, %c0_77, %c0_78] : memref<16x8x512xf32, #tpu.memory_space<vmem>>, vector<1x8x512xf32>
    %299 = vector.shape_cast %298 : vector<1x8x512xf32> to vector<8x512xf32>
    %300 = arith.truncf %287 : vector<8x128xf32> to vector<8x128xbf16>
    %cst_79 = arith.constant dense<0.000000e+00> : vector<8x512xf32>
    %301 = tpu.matmul %300, %12, %cst_79 {dimension_numbers = #tpu.dot_dimension_numbers<[1], [0], [0], [1], [0, 0, 1, 1], [], []>} : vector<8x128xbf16>, vector<128x512xbf16>, vector<8x512xf32> -> vector<8x512xf32>
    %302 = arith.addf %299, %301 : vector<8x512xf32>
    %303 = vector.extract_strided_slice %302 {offsets = [0, 0], sizes = [8, 128], strides = [1, 1]} : vector<8x512xf32> to vector<8x128xf32>
    %304 = arith.negf %303 : vector<8x128xf32>
    %305 = math.exp %304 : vector<8x128xf32>
    %cst_80 = arith.constant 1.000000e+00 : f32
    %306 = vector.broadcast %cst_80 : f32 to vector<8x128xf32>
    %307 = arith.addf %306, %305 : vector<8x128xf32>
    %308 = arith.divf %306, %307 : vector<8x128xf32>
    %309 = vector.extract_strided_slice %302 {offsets = [0, 128], sizes = [8, 128], strides = [1, 1]} : vector<8x512xf32> to vector<8x128xf32>
    %310 = arith.negf %309 : vector<8x128xf32>
    %311 = math.exp %310 : vector<8x128xf32>
    %cst_81 = arith.constant 1.000000e+00 : f32
    %312 = vector.broadcast %cst_81 : f32 to vector<8x128xf32>
    %313 = arith.addf %312, %311 : vector<8x128xf32>
    %314 = arith.divf %312, %313 : vector<8x128xf32>
    %315 = vector.extract_strided_slice %302 {offsets = [0, 256], sizes = [8, 128], strides = [1, 1]} : vector<8x512xf32> to vector<8x128xf32>
    %316 = math.tanh %315 : vector<8x128xf32>
    %317 = vector.extract_strided_slice %302 {offsets = [0, 384], sizes = [8, 128], strides = [1, 1]} : vector<8x512xf32> to vector<8x128xf32>
    %318 = arith.negf %317 : vector<8x128xf32>
    %319 = math.exp %318 : vector<8x128xf32>
    %cst_82 = arith.constant 1.000000e+00 : f32
    %320 = vector.broadcast %cst_82 : f32 to vector<8x128xf32>
    %321 = arith.addf %320, %319 : vector<8x128xf32>
    %322 = arith.divf %320, %321 : vector<8x128xf32>
    %323 = arith.mulf %314, %291 : vector<8x128xf32>
    %324 = arith.mulf %308, %316 : vector<8x128xf32>
    %325 = arith.addf %323, %324 : vector<8x128xf32>
    %326 = math.tanh %325 : vector<8x128xf32>
    %327 = arith.mulf %322, %326 : vector<8x128xf32>
    %328 = arith.index_cast %c6_i32 : i32 to index
    %c0_83 = arith.constant 0 : index
    %c0_84 = arith.constant 0 : index
    %329 = vector.load %arg3[%328, %c0_83, %c0_84] : memref<16x8x1xf32, #tpu.memory_space<vmem>>, vector<1x8x1xf32>
    %330 = vector.shape_cast %329 : vector<1x8x1xf32> to vector<8x1xf32>
    %331 = arith.subf %327, %287 : vector<8x128xf32>
    %332 = vector.broadcast %330 : vector<8x1xf32> to vector<8x128xf32>
    %333 = arith.mulf %332, %331 : vector<8x128xf32>
    %334 = arith.addf %287, %333 : vector<8x128xf32>
    %335 = arith.subf %325, %291 : vector<8x128xf32>
    %336 = vector.broadcast %330 : vector<8x1xf32> to vector<8x128xf32>
    %337 = arith.mulf %336, %335 : vector<8x128xf32>
    %338 = arith.addf %291, %337 : vector<8x128xf32>
    %339 = arith.truncf %334 : vector<8x128xf32> to vector<8x128xbf16>
    %340 = arith.index_cast %c6_i32 : i32 to index
    %c0_85 = arith.constant 0 : index
    %c0_86 = arith.constant 0 : index
    %341 = vector.load %arg9[%340, %c0_85, %c0_86] : memref<16x8x128xbf16, #tpu.memory_space<vmem>>, vector<1x8x128xbf16>
    %342 = vector.shape_cast %341 : vector<1x8x128xbf16> to vector<8x128xbf16>
    %343 = vector.shape_cast %339 : vector<8x128xbf16> to vector<1x8x128xbf16>
    tpu.vector_store %arg9[%340, %c0_85, %c0_86], %343 {strides = array<i32>} : memref<16x8x128xbf16, #tpu.memory_space<vmem>>, vector<1x8x128xbf16>,
    %c7_i32 = arith.constant 7 : i32
    %344 = arith.index_cast %c7_i32 : i32 to index
    %c0_87 = arith.constant 0 : index
    %c0_88 = arith.constant 0 : index
    %345 = vector.load %arg12[%344, %c0_87, %c0_88] : memref<16x8x512xf32, #tpu.memory_space<vmem>>, vector<1x8x512xf32>
    %346 = vector.shape_cast %345 : vector<1x8x512xf32> to vector<8x512xf32>
    %347 = arith.truncf %334 : vector<8x128xf32> to vector<8x128xbf16>
    %cst_89 = arith.constant dense<0.000000e+00> : vector<8x512xf32>
    %348 = tpu.matmul %347, %12, %cst_89 {dimension_numbers = #tpu.dot_dimension_numbers<[1], [0], [0], [1], [0, 0, 1, 1], [], []>} : vector<8x128xbf16>, vector<128x512xbf16>, vector<8x512xf32> -> vector<8x512xf32>
    %349 = arith.addf %346, %348 : vector<8x512xf32>
    %350 = vector.extract_strided_slice %349 {offsets = [0, 0], sizes = [8, 128], strides = [1, 1]} : vector<8x512xf32> to vector<8x128xf32>
    %351 = arith.negf %350 : vector<8x128xf32>
    %352 = math.exp %351 : vector<8x128xf32>
    %cst_90 = arith.constant 1.000000e+00 : f32
    %353 = vector.broadcast %cst_90 : f32 to vector<8x128xf32>
    %354 = arith.addf %353, %352 : vector<8x128xf32>
    %355 = arith.divf %353, %354 : vector<8x128xf32>
    %356 = vector.extract_strided_slice %349 {offsets = [0, 128], sizes = [8, 128], strides = [1, 1]} : vector<8x512xf32> to vector<8x128xf32>
    %357 = arith.negf %356 : vector<8x128xf32>
    %358 = math.exp %357 : vector<8x128xf32>
    %cst_91 = arith.constant 1.000000e+00 : f32
    %359 = vector.broadcast %cst_91 : f32 to vector<8x128xf32>
    %360 = arith.addf %359, %358 : vector<8x128xf32>
    %361 = arith.divf %359, %360 : vector<8x128xf32>
    %362 = vector.extract_strided_slice %349 {offsets = [0, 256], sizes = [8, 128], strides = [1, 1]} : vector<8x512xf32> to vector<8x128xf32>
    %363 = math.tanh %362 : vector<8x128xf32>
    %364 = vector.extract_strided_slice %349 {offsets = [0, 384], sizes = [8, 128], strides = [1, 1]} : vector<8x512xf32> to vector<8x128xf32>
    %365 = arith.negf %364 : vector<8x128xf32>
    %366 = math.exp %365 : vector<8x128xf32>
    %cst_92 = arith.constant 1.000000e+00 : f32
    %367 = vector.broadcast %cst_92 : f32 to vector<8x128xf32>
    %368 = arith.addf %367, %366 : vector<8x128xf32>
    %369 = arith.divf %367, %368 : vector<8x128xf32>
    %370 = arith.mulf %361, %338 : vector<8x128xf32>
    %371 = arith.mulf %355, %363 : vector<8x128xf32>
    %372 = arith.addf %370, %371 : vector<8x128xf32>
    %373 = math.tanh %372 : vector<8x128xf32>
    %374 = arith.mulf %369, %373 : vector<8x128xf32>
    %375 = arith.index_cast %c7_i32 : i32 to index
    %c0_93 = arith.constant 0 : index
    %c0_94 = arith.constant 0 : index
    %376 = vector.load %arg3[%375, %c0_93, %c0_94] : memref<16x8x1xf32, #tpu.memory_space<vmem>>, vector<1x8x1xf32>
    %377 = vector.shape_cast %376 : vector<1x8x1xf32> to vector<8x1xf32>
    %378 = arith.subf %374, %334 : vector<8x128xf32>
    %379 = vector.broadcast %377 : vector<8x1xf32> to vector<8x128xf32>
    %380 = arith.mulf %379, %378 : vector<8x128xf32>
    %381 = arith.addf %334, %380 : vector<8x128xf32>
    %382 = arith.subf %372, %338 : vector<8x128xf32>
    %383 = vector.broadcast %377 : vector<8x1xf32> to vector<8x128xf32>
    %384 = arith.mulf %383, %382 : vector<8x128xf32>
    %385 = arith.addf %338, %384 : vector<8x128xf32>
    %386 = arith.truncf %381 : vector<8x128xf32> to vector<8x128xbf16>
    %387 = arith.index_cast %c7_i32 : i32 to index
    %c0_95 = arith.constant 0 : index
    %c0_96 = arith.constant 0 : index
    %388 = vector.load %arg9[%387, %c0_95, %c0_96] : memref<16x8x128xbf16, #tpu.memory_space<vmem>>, vector<1x8x128xbf16>
    %389 = vector.shape_cast %388 : vector<1x8x128xbf16> to vector<8x128xbf16>
    %390 = vector.shape_cast %386 : vector<8x128xbf16> to vector<1x8x128xbf16>
    tpu.vector_store %arg9[%387, %c0_95, %c0_96], %390 {strides = array<i32>} : memref<16x8x128xbf16, #tpu.memory_space<vmem>>, vector<1x8x128xbf16>,
    %c8_i32 = arith.constant 8 : i32
    %391 = arith.index_cast %c8_i32 : i32 to index
    %c0_97 = arith.constant 0 : index
    %c0_98 = arith.constant 0 : index
    %392 = vector.load %arg12[%391, %c0_97, %c0_98] : memref<16x8x512xf32, #tpu.memory_space<vmem>>, vector<1x8x512xf32>
    %393 = vector.shape_cast %392 : vector<1x8x512xf32> to vector<8x512xf32>
    %394 = arith.truncf %381 : vector<8x128xf32> to vector<8x128xbf16>
    %cst_99 = arith.constant dense<0.000000e+00> : vector<8x512xf32>
    %395 = tpu.matmul %394, %12, %cst_99 {dimension_numbers = #tpu.dot_dimension_numbers<[1], [0], [0], [1], [0, 0, 1, 1], [], []>} : vector<8x128xbf16>, vector<128x512xbf16>, vector<8x512xf32> -> vector<8x512xf32>
    %396 = arith.addf %393, %395 : vector<8x512xf32>
    %397 = vector.extract_strided_slice %396 {offsets = [0, 0], sizes = [8, 128], strides = [1, 1]} : vector<8x512xf32> to vector<8x128xf32>
    %398 = arith.negf %397 : vector<8x128xf32>
    %399 = math.exp %398 : vector<8x128xf32>
    %cst_100 = arith.constant 1.000000e+00 : f32
    %400 = vector.broadcast %cst_100 : f32 to vector<8x128xf32>
    %401 = arith.addf %400, %399 : vector<8x128xf32>
    %402 = arith.divf %400, %401 : vector<8x128xf32>
    %403 = vector.extract_strided_slice %396 {offsets = [0, 128], sizes = [8, 128], strides = [1, 1]} : vector<8x512xf32> to vector<8x128xf32>
    %404 = arith.negf %403 : vector<8x128xf32>
    %405 = math.exp %404 : vector<8x128xf32>
    %cst_101 = arith.constant 1.000000e+00 : f32
    %406 = vector.broadcast %cst_101 : f32 to vector<8x128xf32>
    %407 = arith.addf %406, %405 : vector<8x128xf32>
    %408 = arith.divf %406, %407 : vector<8x128xf32>
    %409 = vector.extract_strided_slice %396 {offsets = [0, 256], sizes = [8, 128], strides = [1, 1]} : vector<8x512xf32> to vector<8x128xf32>
    %410 = math.tanh %409 : vector<8x128xf32>
    %411 = vector.extract_strided_slice %396 {offsets = [0, 384], sizes = [8, 128], strides = [1, 1]} : vector<8x512xf32> to vector<8x128xf32>
    %412 = arith.negf %411 : vector<8x128xf32>
    %413 = math.exp %412 : vector<8x128xf32>
    %cst_102 = arith.constant 1.000000e+00 : f32
    %414 = vector.broadcast %cst_102 : f32 to vector<8x128xf32>
    %415 = arith.addf %414, %413 : vector<8x128xf32>
    %416 = arith.divf %414, %415 : vector<8x128xf32>
    %417 = arith.mulf %408, %385 : vector<8x128xf32>
    %418 = arith.mulf %402, %410 : vector<8x128xf32>
    %419 = arith.addf %417, %418 : vector<8x128xf32>
    %420 = math.tanh %419 : vector<8x128xf32>
    %421 = arith.mulf %416, %420 : vector<8x128xf32>
    %422 = arith.index_cast %c8_i32 : i32 to index
    %c0_103 = arith.constant 0 : index
    %c0_104 = arith.constant 0 : index
    %423 = vector.load %arg3[%422, %c0_103, %c0_104] : memref<16x8x1xf32, #tpu.memory_space<vmem>>, vector<1x8x1xf32>
    %424 = vector.shape_cast %423 : vector<1x8x1xf32> to vector<8x1xf32>
    %425 = arith.subf %421, %381 : vector<8x128xf32>
    %426 = vector.broadcast %424 : vector<8x1xf32> to vector<8x128xf32>
    %427 = arith.mulf %426, %425 : vector<8x128xf32>
    %428 = arith.addf %381, %427 : vector<8x128xf32>
    %429 = arith.subf %419, %385 : vector<8x128xf32>
    %430 = vector.broadcast %424 : vector<8x1xf32> to vector<8x128xf32>
    %431 = arith.mulf %430, %429 : vector<8x128xf32>
    %432 = arith.addf %385, %431 : vector<8x128xf32>
    %433 = arith.truncf %428 : vector<8x128xf32> to vector<8x128xbf16>
    %434 = arith.index_cast %c8_i32 : i32 to index
    %c0_105 = arith.constant 0 : index
    %c0_106 = arith.constant 0 : index
    %435 = vector.load %arg9[%434, %c0_105, %c0_106] : memref<16x8x128xbf16, #tpu.memory_space<vmem>>, vector<1x8x128xbf16>
    %436 = vector.shape_cast %435 : vector<1x8x128xbf16> to vector<8x128xbf16>
    %437 = vector.shape_cast %433 : vector<8x128xbf16> to vector<1x8x128xbf16>
    tpu.vector_store %arg9[%434, %c0_105, %c0_106], %437 {strides = array<i32>} : memref<16x8x128xbf16, #tpu.memory_space<vmem>>, vector<1x8x128xbf16>,
    %c9_i32 = arith.constant 9 : i32
    %438 = arith.index_cast %c9_i32 : i32 to index
    %c0_107 = arith.constant 0 : index
    %c0_108 = arith.constant 0 : index
    %439 = vector.load %arg12[%438, %c0_107, %c0_108] : memref<16x8x512xf32, #tpu.memory_space<vmem>>, vector<1x8x512xf32>
    %440 = vector.shape_cast %439 : vector<1x8x512xf32> to vector<8x512xf32>
    %441 = arith.truncf %428 : vector<8x128xf32> to vector<8x128xbf16>
    %cst_109 = arith.constant dense<0.000000e+00> : vector<8x512xf32>
    %442 = tpu.matmul %441, %12, %cst_109 {dimension_numbers = #tpu.dot_dimension_numbers<[1], [0], [0], [1], [0, 0, 1, 1], [], []>} : vector<8x128xbf16>, vector<128x512xbf16>, vector<8x512xf32> -> vector<8x512xf32>
    %443 = arith.addf %440, %442 : vector<8x512xf32>
    %444 = vector.extract_strided_slice %443 {offsets = [0, 0], sizes = [8, 128], strides = [1, 1]} : vector<8x512xf32> to vector<8x128xf32>
    %445 = arith.negf %444 : vector<8x128xf32>
    %446 = math.exp %445 : vector<8x128xf32>
    %cst_110 = arith.constant 1.000000e+00 : f32
    %447 = vector.broadcast %cst_110 : f32 to vector<8x128xf32>
    %448 = arith.addf %447, %446 : vector<8x128xf32>
    %449 = arith.divf %447, %448 : vector<8x128xf32>
    %450 = vector.extract_strided_slice %443 {offsets = [0, 128], sizes = [8, 128], strides = [1, 1]} : vector<8x512xf32> to vector<8x128xf32>
    %451 = arith.negf %450 : vector<8x128xf32>
    %452 = math.exp %451 : vector<8x128xf32>
    %cst_111 = arith.constant 1.000000e+00 : f32
    %453 = vector.broadcast %cst_111 : f32 to vector<8x128xf32>
    %454 = arith.addf %453, %452 : vector<8x128xf32>
    %455 = arith.divf %453, %454 : vector<8x128xf32>
    %456 = vector.extract_strided_slice %443 {offsets = [0, 256], sizes = [8, 128], strides = [1, 1]} : vector<8x512xf32> to vector<8x128xf32>
    %457 = math.tanh %456 : vector<8x128xf32>
    %458 = vector.extract_strided_slice %443 {offsets = [0, 384], sizes = [8, 128], strides = [1, 1]} : vector<8x512xf32> to vector<8x128xf32>
    %459 = arith.negf %458 : vector<8x128xf32>
    %460 = math.exp %459 : vector<8x128xf32>
    %cst_112 = arith.constant 1.000000e+00 : f32
    %461 = vector.broadcast %cst_112 : f32 to vector<8x128xf32>
    %462 = arith.addf %461, %460 : vector<8x128xf32>
    %463 = arith.divf %461, %462 : vector<8x128xf32>
    %464 = arith.mulf %455, %432 : vector<8x128xf32>
    %465 = arith.mulf %449, %457 : vector<8x128xf32>
    %466 = arith.addf %464, %465 : vector<8x128xf32>
    %467 = math.tanh %466 : vector<8x128xf32>
    %468 = arith.mulf %463, %467 : vector<8x128xf32>
    %469 = arith.index_cast %c9_i32 : i32 to index
    %c0_113 = arith.constant 0 : index
    %c0_114 = arith.constant 0 : index
    %470 = vector.load %arg3[%469, %c0_113, %c0_114] : memref<16x8x1xf32, #tpu.memory_space<vmem>>, vector<1x8x1xf32>
    %471 = vector.shape_cast %470 : vector<1x8x1xf32> to vector<8x1xf32>
    %472 = arith.subf %468, %428 : vector<8x128xf32>
    %473 = vector.broadcast %471 : vector<8x1xf32> to vector<8x128xf32>
    %474 = arith.mulf %473, %472 : vector<8x128xf32>
    %475 = arith.addf %428, %474 : vector<8x128xf32>
    %476 = arith.subf %466, %432 : vector<8x128xf32>
    %477 = vector.broadcast %471 : vector<8x1xf32> to vector<8x128xf32>
    %478 = arith.mulf %477, %476 : vector<8x128xf32>
    %479 = arith.addf %432, %478 : vector<8x128xf32>
    %480 = arith.truncf %475 : vector<8x128xf32> to vector<8x128xbf16>
    %481 = arith.index_cast %c9_i32 : i32 to index
    %c0_115 = arith.constant 0 : index
    %c0_116 = arith.constant 0 : index
    %482 = vector.load %arg9[%481, %c0_115, %c0_116] : memref<16x8x128xbf16, #tpu.memory_space<vmem>>, vector<1x8x128xbf16>
    %483 = vector.shape_cast %482 : vector<1x8x128xbf16> to vector<8x128xbf16>
    %484 = vector.shape_cast %480 : vector<8x128xbf16> to vector<1x8x128xbf16>
    tpu.vector_store %arg9[%481, %c0_115, %c0_116], %484 {strides = array<i32>} : memref<16x8x128xbf16, #tpu.memory_space<vmem>>, vector<1x8x128xbf16>,
    %c10_i32 = arith.constant 10 : i32
    %485 = arith.index_cast %c10_i32 : i32 to index
    %c0_117 = arith.constant 0 : index
    %c0_118 = arith.constant 0 : index
    %486 = vector.load %arg12[%485, %c0_117, %c0_118] : memref<16x8x512xf32, #tpu.memory_space<vmem>>, vector<1x8x512xf32>
    %487 = vector.shape_cast %486 : vector<1x8x512xf32> to vector<8x512xf32>
    %488 = arith.truncf %475 : vector<8x128xf32> to vector<8x128xbf16>
    %cst_119 = arith.constant dense<0.000000e+00> : vector<8x512xf32>
    %489 = tpu.matmul %488, %12, %cst_119 {dimension_numbers = #tpu.dot_dimension_numbers<[1], [0], [0], [1], [0, 0, 1, 1], [], []>} : vector<8x128xbf16>, vector<128x512xbf16>, vector<8x512xf32> -> vector<8x512xf32>
    %490 = arith.addf %487, %489 : vector<8x512xf32>
    %491 = vector.extract_strided_slice %490 {offsets = [0, 0], sizes = [8, 128], strides = [1, 1]} : vector<8x512xf32> to vector<8x128xf32>
    %492 = arith.negf %491 : vector<8x128xf32>
    %493 = math.exp %492 : vector<8x128xf32>
    %cst_120 = arith.constant 1.000000e+00 : f32
    %494 = vector.broadcast %cst_120 : f32 to vector<8x128xf32>
    %495 = arith.addf %494, %493 : vector<8x128xf32>
    %496 = arith.divf %494, %495 : vector<8x128xf32>
    %497 = vector.extract_strided_slice %490 {offsets = [0, 128], sizes = [8, 128], strides = [1, 1]} : vector<8x512xf32> to vector<8x128xf32>
    %498 = arith.negf %497 : vector<8x128xf32>
    %499 = math.exp %498 : vector<8x128xf32>
    %cst_121 = arith.constant 1.000000e+00 : f32
    %500 = vector.broadcast %cst_121 : f32 to vector<8x128xf32>
    %501 = arith.addf %500, %499 : vector<8x128xf32>
    %502 = arith.divf %500, %501 : vector<8x128xf32>
    %503 = vector.extract_strided_slice %490 {offsets = [0, 256], sizes = [8, 128], strides = [1, 1]} : vector<8x512xf32> to vector<8x128xf32>
    %504 = math.tanh %503 : vector<8x128xf32>
    %505 = vector.extract_strided_slice %490 {offsets = [0, 384], sizes = [8, 128], strides = [1, 1]} : vector<8x512xf32> to vector<8x128xf32>
    %506 = arith.negf %505 : vector<8x128xf32>
    %507 = math.exp %506 : vector<8x128xf32>
    %cst_122 = arith.constant 1.000000e+00 : f32
    %508 = vector.broadcast %cst_122 : f32 to vector<8x128xf32>
    %509 = arith.addf %508, %507 : vector<8x128xf32>
    %510 = arith.divf %508, %509 : vector<8x128xf32>
    %511 = arith.mulf %502, %479 : vector<8x128xf32>
    %512 = arith.mulf %496, %504 : vector<8x128xf32>
    %513 = arith.addf %511, %512 : vector<8x128xf32>
    %514 = math.tanh %513 : vector<8x128xf32>
    %515 = arith.mulf %510, %514 : vector<8x128xf32>
    %516 = arith.index_cast %c10_i32 : i32 to index
    %c0_123 = arith.constant 0 : index
    %c0_124 = arith.constant 0 : index
    %517 = vector.load %arg3[%516, %c0_123, %c0_124] : memref<16x8x1xf32, #tpu.memory_space<vmem>>, vector<1x8x1xf32>
    %518 = vector.shape_cast %517 : vector<1x8x1xf32> to vector<8x1xf32>
    %519 = arith.subf %515, %475 : vector<8x128xf32>
    %520 = vector.broadcast %518 : vector<8x1xf32> to vector<8x128xf32>
    %521 = arith.mulf %520, %519 : vector<8x128xf32>
    %522 = arith.addf %475, %521 : vector<8x128xf32>
    %523 = arith.subf %513, %479 : vector<8x128xf32>
    %524 = vector.broadcast %518 : vector<8x1xf32> to vector<8x128xf32>
    %525 = arith.mulf %524, %523 : vector<8x128xf32>
    %526 = arith.addf %479, %525 : vector<8x128xf32>
    %527 = arith.truncf %522 : vector<8x128xf32> to vector<8x128xbf16>
    %528 = arith.index_cast %c10_i32 : i32 to index
    %c0_125 = arith.constant 0 : index
    %c0_126 = arith.constant 0 : index
    %529 = vector.load %arg9[%528, %c0_125, %c0_126] : memref<16x8x128xbf16, #tpu.memory_space<vmem>>, vector<1x8x128xbf16>
    %530 = vector.shape_cast %529 : vector<1x8x128xbf16> to vector<8x128xbf16>
    %531 = vector.shape_cast %527 : vector<8x128xbf16> to vector<1x8x128xbf16>
    tpu.vector_store %arg9[%528, %c0_125, %c0_126], %531 {strides = array<i32>} : memref<16x8x128xbf16, #tpu.memory_space<vmem>>, vector<1x8x128xbf16>,
    %c11_i32 = arith.constant 11 : i32
    %532 = arith.index_cast %c11_i32 : i32 to index
    %c0_127 = arith.constant 0 : index
    %c0_128 = arith.constant 0 : index
    %533 = vector.load %arg12[%532, %c0_127, %c0_128] : memref<16x8x512xf32, #tpu.memory_space<vmem>>, vector<1x8x512xf32>
    %534 = vector.shape_cast %533 : vector<1x8x512xf32> to vector<8x512xf32>
    %535 = arith.truncf %522 : vector<8x128xf32> to vector<8x128xbf16>
    %cst_129 = arith.constant dense<0.000000e+00> : vector<8x512xf32>
    %536 = tpu.matmul %535, %12, %cst_129 {dimension_numbers = #tpu.dot_dimension_numbers<[1], [0], [0], [1], [0, 0, 1, 1], [], []>} : vector<8x128xbf16>, vector<128x512xbf16>, vector<8x512xf32> -> vector<8x512xf32>
    %537 = arith.addf %534, %536 : vector<8x512xf32>
    %538 = vector.extract_strided_slice %537 {offsets = [0, 0], sizes = [8, 128], strides = [1, 1]} : vector<8x512xf32> to vector<8x128xf32>
    %539 = arith.negf %538 : vector<8x128xf32>
    %540 = math.exp %539 : vector<8x128xf32>
    %cst_130 = arith.constant 1.000000e+00 : f32
    %541 = vector.broadcast %cst_130 : f32 to vector<8x128xf32>
    %542 = arith.addf %541, %540 : vector<8x128xf32>
    %543 = arith.divf %541, %542 : vector<8x128xf32>
    %544 = vector.extract_strided_slice %537 {offsets = [0, 128], sizes = [8, 128], strides = [1, 1]} : vector<8x512xf32> to vector<8x128xf32>
    %545 = arith.negf %544 : vector<8x128xf32>
    %546 = math.exp %545 : vector<8x128xf32>
    %cst_131 = arith.constant 1.000000e+00 : f32
    %547 = vector.broadcast %cst_131 : f32 to vector<8x128xf32>
    %548 = arith.addf %547, %546 : vector<8x128xf32>
    %549 = arith.divf %547, %548 : vector<8x128xf32>
    %550 = vector.extract_strided_slice %537 {offsets = [0, 256], sizes = [8, 128], strides = [1, 1]} : vector<8x512xf32> to vector<8x128xf32>
    %551 = math.tanh %550 : vector<8x128xf32>
    %552 = vector.extract_strided_slice %537 {offsets = [0, 384], sizes = [8, 128], strides = [1, 1]} : vector<8x512xf32> to vector<8x128xf32>
    %553 = arith.negf %552 : vector<8x128xf32>
    %554 = math.exp %553 : vector<8x128xf32>
    %cst_132 = arith.constant 1.000000e+00 : f32
    %555 = vector.broadcast %cst_132 : f32 to vector<8x128xf32>
    %556 = arith.addf %555, %554 : vector<8x128xf32>
    %557 = arith.divf %555, %556 : vector<8x128xf32>
    %558 = arith.mulf %549, %526 : vector<8x128xf32>
    %559 = arith.mulf %543, %551 : vector<8x128xf32>
    %560 = arith.addf %558, %559 : vector<8x128xf32>
    %561 = math.tanh %560 : vector<8x128xf32>
    %562 = arith.mulf %557, %561 : vector<8x128xf32>
    %563 = arith.index_cast %c11_i32 : i32 to index
    %c0_133 = arith.constant 0 : index
    %c0_134 = arith.constant 0 : index
    %564 = vector.load %arg3[%563, %c0_133, %c0_134] : memref<16x8x1xf32, #tpu.memory_space<vmem>>, vector<1x8x1xf32>
    %565 = vector.shape_cast %564 : vector<1x8x1xf32> to vector<8x1xf32>
    %566 = arith.subf %562, %522 : vector<8x128xf32>
    %567 = vector.broadcast %565 : vector<8x1xf32> to vector<8x128xf32>
    %568 = arith.mulf %567, %566 : vector<8x128xf32>
    %569 = arith.addf %522, %568 : vector<8x128xf32>
    %570 = arith.subf %560, %526 : vector<8x128xf32>
    %571 = vector.broadcast %565 : vector<8x1xf32> to vector<8x128xf32>
    %572 = arith.mulf %571, %570 : vector<8x128xf32>
    %573 = arith.addf %526, %572 : vector<8x128xf32>
    %574 = arith.truncf %569 : vector<8x128xf32> to vector<8x128xbf16>
    %575 = arith.index_cast %c11_i32 : i32 to index
    %c0_135 = arith.constant 0 : index
    %c0_136 = arith.constant 0 : index
    %576 = vector.load %arg9[%575, %c0_135, %c0_136] : memref<16x8x128xbf16, #tpu.memory_space<vmem>>, vector<1x8x128xbf16>
    %577 = vector.shape_cast %576 : vector<1x8x128xbf16> to vector<8x128xbf16>
    %578 = vector.shape_cast %574 : vector<8x128xbf16> to vector<1x8x128xbf16>
    tpu.vector_store %arg9[%575, %c0_135, %c0_136], %578 {strides = array<i32>} : memref<16x8x128xbf16, #tpu.memory_space<vmem>>, vector<1x8x128xbf16>,
    %c12_i32 = arith.constant 12 : i32
    %579 = arith.index_cast %c12_i32 : i32 to index
    %c0_137 = arith.constant 0 : index
    %c0_138 = arith.constant 0 : index
    %580 = vector.load %arg12[%579, %c0_137, %c0_138] : memref<16x8x512xf32, #tpu.memory_space<vmem>>, vector<1x8x512xf32>
    %581 = vector.shape_cast %580 : vector<1x8x512xf32> to vector<8x512xf32>
    %582 = arith.truncf %569 : vector<8x128xf32> to vector<8x128xbf16>
    %cst_139 = arith.constant dense<0.000000e+00> : vector<8x512xf32>
    %583 = tpu.matmul %582, %12, %cst_139 {dimension_numbers = #tpu.dot_dimension_numbers<[1], [0], [0], [1], [0, 0, 1, 1], [], []>} : vector<8x128xbf16>, vector<128x512xbf16>, vector<8x512xf32> -> vector<8x512xf32>
    %584 = arith.addf %581, %583 : vector<8x512xf32>
    %585 = vector.extract_strided_slice %584 {offsets = [0, 0], sizes = [8, 128], strides = [1, 1]} : vector<8x512xf32> to vector<8x128xf32>
    %586 = arith.negf %585 : vector<8x128xf32>
    %587 = math.exp %586 : vector<8x128xf32>
    %cst_140 = arith.constant 1.000000e+00 : f32
    %588 = vector.broadcast %cst_140 : f32 to vector<8x128xf32>
    %589 = arith.addf %588, %587 : vector<8x128xf32>
    %590 = arith.divf %588, %589 : vector<8x128xf32>
    %591 = vector.extract_strided_slice %584 {offsets = [0, 128], sizes = [8, 128], strides = [1, 1]} : vector<8x512xf32> to vector<8x128xf32>
    %592 = arith.negf %591 : vector<8x128xf32>
    %593 = math.exp %592 : vector<8x128xf32>
    %cst_141 = arith.constant 1.000000e+00 : f32
    %594 = vector.broadcast %cst_141 : f32 to vector<8x128xf32>
    %595 = arith.addf %594, %593 : vector<8x128xf32>
    %596 = arith.divf %594, %595 : vector<8x128xf32>
    %597 = vector.extract_strided_slice %584 {offsets = [0, 256], sizes = [8, 128], strides = [1, 1]} : vector<8x512xf32> to vector<8x128xf32>
    %598 = math.tanh %597 : vector<8x128xf32>
    %599 = vector.extract_strided_slice %584 {offsets = [0, 384], sizes = [8, 128], strides = [1, 1]} : vector<8x512xf32> to vector<8x128xf32>
    %600 = arith.negf %599 : vector<8x128xf32>
    %601 = math.exp %600 : vector<8x128xf32>
    %cst_142 = arith.constant 1.000000e+00 : f32
    %602 = vector.broadcast %cst_142 : f32 to vector<8x128xf32>
    %603 = arith.addf %602, %601 : vector<8x128xf32>
    %604 = arith.divf %602, %603 : vector<8x128xf32>
    %605 = arith.mulf %596, %573 : vector<8x128xf32>
    %606 = arith.mulf %590, %598 : vector<8x128xf32>
    %607 = arith.addf %605, %606 : vector<8x128xf32>
    %608 = math.tanh %607 : vector<8x128xf32>
    %609 = arith.mulf %604, %608 : vector<8x128xf32>
    %610 = arith.index_cast %c12_i32 : i32 to index
    %c0_143 = arith.constant 0 : index
    %c0_144 = arith.constant 0 : index
    %611 = vector.load %arg3[%610, %c0_143, %c0_144] : memref<16x8x1xf32, #tpu.memory_space<vmem>>, vector<1x8x1xf32>
    %612 = vector.shape_cast %611 : vector<1x8x1xf32> to vector<8x1xf32>
    %613 = arith.subf %609, %569 : vector<8x128xf32>
    %614 = vector.broadcast %612 : vector<8x1xf32> to vector<8x128xf32>
    %615 = arith.mulf %614, %613 : vector<8x128xf32>
    %616 = arith.addf %569, %615 : vector<8x128xf32>
    %617 = arith.subf %607, %573 : vector<8x128xf32>
    %618 = vector.broadcast %612 : vector<8x1xf32> to vector<8x128xf32>
    %619 = arith.mulf %618, %617 : vector<8x128xf32>
    %620 = arith.addf %573, %619 : vector<8x128xf32>
    %621 = arith.truncf %616 : vector<8x128xf32> to vector<8x128xbf16>
    %622 = arith.index_cast %c12_i32 : i32 to index
    %c0_145 = arith.constant 0 : index
    %c0_146 = arith.constant 0 : index
    %623 = vector.load %arg9[%622, %c0_145, %c0_146] : memref<16x8x128xbf16, #tpu.memory_space<vmem>>, vector<1x8x128xbf16>
    %624 = vector.shape_cast %623 : vector<1x8x128xbf16> to vector<8x128xbf16>
    %625 = vector.shape_cast %621 : vector<8x128xbf16> to vector<1x8x128xbf16>
    tpu.vector_store %arg9[%622, %c0_145, %c0_146], %625 {strides = array<i32>} : memref<16x8x128xbf16, #tpu.memory_space<vmem>>, vector<1x8x128xbf16>,
    %c13_i32 = arith.constant 13 : i32
    %626 = arith.index_cast %c13_i32 : i32 to index
    %c0_147 = arith.constant 0 : index
    %c0_148 = arith.constant 0 : index
    %627 = vector.load %arg12[%626, %c0_147, %c0_148] : memref<16x8x512xf32, #tpu.memory_space<vmem>>, vector<1x8x512xf32>
    %628 = vector.shape_cast %627 : vector<1x8x512xf32> to vector<8x512xf32>
    %629 = arith.truncf %616 : vector<8x128xf32> to vector<8x128xbf16>
    %cst_149 = arith.constant dense<0.000000e+00> : vector<8x512xf32>
    %630 = tpu.matmul %629, %12, %cst_149 {dimension_numbers = #tpu.dot_dimension_numbers<[1], [0], [0], [1], [0, 0, 1, 1], [], []>} : vector<8x128xbf16>, vector<128x512xbf16>, vector<8x512xf32> -> vector<8x512xf32>
    %631 = arith.addf %628, %630 : vector<8x512xf32>
    %632 = vector.extract_strided_slice %631 {offsets = [0, 0], sizes = [8, 128], strides = [1, 1]} : vector<8x512xf32> to vector<8x128xf32>
    %633 = arith.negf %632 : vector<8x128xf32>
    %634 = math.exp %633 : vector<8x128xf32>
    %cst_150 = arith.constant 1.000000e+00 : f32
    %635 = vector.broadcast %cst_150 : f32 to vector<8x128xf32>
    %636 = arith.addf %635, %634 : vector<8x128xf32>
    %637 = arith.divf %635, %636 : vector<8x128xf32>
    %638 = vector.extract_strided_slice %631 {offsets = [0, 128], sizes = [8, 128], strides = [1, 1]} : vector<8x512xf32> to vector<8x128xf32>
    %639 = arith.negf %638 : vector<8x128xf32>
    %640 = math.exp %639 : vector<8x128xf32>
    %cst_151 = arith.constant 1.000000e+00 : f32
    %641 = vector.broadcast %cst_151 : f32 to vector<8x128xf32>
    %642 = arith.addf %641, %640 : vector<8x128xf32>
    %643 = arith.divf %641, %642 : vector<8x128xf32>
    %644 = vector.extract_strided_slice %631 {offsets = [0, 256], sizes = [8, 128], strides = [1, 1]} : vector<8x512xf32> to vector<8x128xf32>
    %645 = math.tanh %644 : vector<8x128xf32>
    %646 = vector.extract_strided_slice %631 {offsets = [0, 384], sizes = [8, 128], strides = [1, 1]} : vector<8x512xf32> to vector<8x128xf32>
    %647 = arith.negf %646 : vector<8x128xf32>
    %648 = math.exp %647 : vector<8x128xf32>
    %cst_152 = arith.constant 1.000000e+00 : f32
    %649 = vector.broadcast %cst_152 : f32 to vector<8x128xf32>
    %650 = arith.addf %649, %648 : vector<8x128xf32>
    %651 = arith.divf %649, %650 : vector<8x128xf32>
    %652 = arith.mulf %643, %620 : vector<8x128xf32>
    %653 = arith.mulf %637, %645 : vector<8x128xf32>
    %654 = arith.addf %652, %653 : vector<8x128xf32>
    %655 = math.tanh %654 : vector<8x128xf32>
    %656 = arith.mulf %651, %655 : vector<8x128xf32>
    %657 = arith.index_cast %c13_i32 : i32 to index
    %c0_153 = arith.constant 0 : index
    %c0_154 = arith.constant 0 : index
    %658 = vector.load %arg3[%657, %c0_153, %c0_154] : memref<16x8x1xf32, #tpu.memory_space<vmem>>, vector<1x8x1xf32>
    %659 = vector.shape_cast %658 : vector<1x8x1xf32> to vector<8x1xf32>
    %660 = arith.subf %656, %616 : vector<8x128xf32>
    %661 = vector.broadcast %659 : vector<8x1xf32> to vector<8x128xf32>
    %662 = arith.mulf %661, %660 : vector<8x128xf32>
    %663 = arith.addf %616, %662 : vector<8x128xf32>
    %664 = arith.subf %654, %620 : vector<8x128xf32>
    %665 = vector.broadcast %659 : vector<8x1xf32> to vector<8x128xf32>
    %666 = arith.mulf %665, %664 : vector<8x128xf32>
    %667 = arith.addf %620, %666 : vector<8x128xf32>
    %668 = arith.truncf %663 : vector<8x128xf32> to vector<8x128xbf16>
    %669 = arith.index_cast %c13_i32 : i32 to index
    %c0_155 = arith.constant 0 : index
    %c0_156 = arith.constant 0 : index
    %670 = vector.load %arg9[%669, %c0_155, %c0_156] : memref<16x8x128xbf16, #tpu.memory_space<vmem>>, vector<1x8x128xbf16>
    %671 = vector.shape_cast %670 : vector<1x8x128xbf16> to vector<8x128xbf16>
    %672 = vector.shape_cast %668 : vector<8x128xbf16> to vector<1x8x128xbf16>
    tpu.vector_store %arg9[%669, %c0_155, %c0_156], %672 {strides = array<i32>} : memref<16x8x128xbf16, #tpu.memory_space<vmem>>, vector<1x8x128xbf16>,
    %c14_i32 = arith.constant 14 : i32
    %673 = arith.index_cast %c14_i32 : i32 to index
    %c0_157 = arith.constant 0 : index
    %c0_158 = arith.constant 0 : index
    %674 = vector.load %arg12[%673, %c0_157, %c0_158] : memref<16x8x512xf32, #tpu.memory_space<vmem>>, vector<1x8x512xf32>
    %675 = vector.shape_cast %674 : vector<1x8x512xf32> to vector<8x512xf32>
    %676 = arith.truncf %663 : vector<8x128xf32> to vector<8x128xbf16>
    %cst_159 = arith.constant dense<0.000000e+00> : vector<8x512xf32>
    %677 = tpu.matmul %676, %12, %cst_159 {dimension_numbers = #tpu.dot_dimension_numbers<[1], [0], [0], [1], [0, 0, 1, 1], [], []>} : vector<8x128xbf16>, vector<128x512xbf16>, vector<8x512xf32> -> vector<8x512xf32>
    %678 = arith.addf %675, %677 : vector<8x512xf32>
    %679 = vector.extract_strided_slice %678 {offsets = [0, 0], sizes = [8, 128], strides = [1, 1]} : vector<8x512xf32> to vector<8x128xf32>
    %680 = arith.negf %679 : vector<8x128xf32>
    %681 = math.exp %680 : vector<8x128xf32>
    %cst_160 = arith.constant 1.000000e+00 : f32
    %682 = vector.broadcast %cst_160 : f32 to vector<8x128xf32>
    %683 = arith.addf %682, %681 : vector<8x128xf32>
    %684 = arith.divf %682, %683 : vector<8x128xf32>
    %685 = vector.extract_strided_slice %678 {offsets = [0, 128], sizes = [8, 128], strides = [1, 1]} : vector<8x512xf32> to vector<8x128xf32>
    %686 = arith.negf %685 : vector<8x128xf32>
    %687 = math.exp %686 : vector<8x128xf32>
    %cst_161 = arith.constant 1.000000e+00 : f32
    %688 = vector.broadcast %cst_161 : f32 to vector<8x128xf32>
    %689 = arith.addf %688, %687 : vector<8x128xf32>
    %690 = arith.divf %688, %689 : vector<8x128xf32>
    %691 = vector.extract_strided_slice %678 {offsets = [0, 256], sizes = [8, 128], strides = [1, 1]} : vector<8x512xf32> to vector<8x128xf32>
    %692 = math.tanh %691 : vector<8x128xf32>
    %693 = vector.extract_strided_slice %678 {offsets = [0, 384], sizes = [8, 128], strides = [1, 1]} : vector<8x512xf32> to vector<8x128xf32>
    %694 = arith.negf %693 : vector<8x128xf32>
    %695 = math.exp %694 : vector<8x128xf32>
    %cst_162 = arith.constant 1.000000e+00 : f32
    %696 = vector.broadcast %cst_162 : f32 to vector<8x128xf32>
    %697 = arith.addf %696, %695 : vector<8x128xf32>
    %698 = arith.divf %696, %697 : vector<8x128xf32>
    %699 = arith.mulf %690, %667 : vector<8x128xf32>
    %700 = arith.mulf %684, %692 : vector<8x128xf32>
    %701 = arith.addf %699, %700 : vector<8x128xf32>
    %702 = math.tanh %701 : vector<8x128xf32>
    %703 = arith.mulf %698, %702 : vector<8x128xf32>
    %704 = arith.index_cast %c14_i32 : i32 to index
    %c0_163 = arith.constant 0 : index
    %c0_164 = arith.constant 0 : index
    %705 = vector.load %arg3[%704, %c0_163, %c0_164] : memref<16x8x1xf32, #tpu.memory_space<vmem>>, vector<1x8x1xf32>
    %706 = vector.shape_cast %705 : vector<1x8x1xf32> to vector<8x1xf32>
    %707 = arith.subf %703, %663 : vector<8x128xf32>
    %708 = vector.broadcast %706 : vector<8x1xf32> to vector<8x128xf32>
    %709 = arith.mulf %708, %707 : vector<8x128xf32>
    %710 = arith.addf %663, %709 : vector<8x128xf32>
    %711 = arith.subf %701, %667 : vector<8x128xf32>
    %712 = vector.broadcast %706 : vector<8x1xf32> to vector<8x128xf32>
    %713 = arith.mulf %712, %711 : vector<8x128xf32>
    %714 = arith.addf %667, %713 : vector<8x128xf32>
    %715 = arith.truncf %710 : vector<8x128xf32> to vector<8x128xbf16>
    %716 = arith.index_cast %c14_i32 : i32 to index
    %c0_165 = arith.constant 0 : index
    %c0_166 = arith.constant 0 : index
    %717 = vector.load %arg9[%716, %c0_165, %c0_166] : memref<16x8x128xbf16, #tpu.memory_space<vmem>>, vector<1x8x128xbf16>
    %718 = vector.shape_cast %717 : vector<1x8x128xbf16> to vector<8x128xbf16>
    %719 = vector.shape_cast %715 : vector<8x128xbf16> to vector<1x8x128xbf16>
    tpu.vector_store %arg9[%716, %c0_165, %c0_166], %719 {strides = array<i32>} : memref<16x8x128xbf16, #tpu.memory_space<vmem>>, vector<1x8x128xbf16>,
    %c15_i32 = arith.constant 15 : i32
    %720 = arith.index_cast %c15_i32 : i32 to index
    %c0_167 = arith.constant 0 : index
    %c0_168 = arith.constant 0 : index
    %721 = vector.load %arg12[%720, %c0_167, %c0_168] : memref<16x8x512xf32, #tpu.memory_space<vmem>>, vector<1x8x512xf32>
    %722 = vector.shape_cast %721 : vector<1x8x512xf32> to vector<8x512xf32>
    %723 = arith.truncf %710 : vector<8x128xf32> to vector<8x128xbf16>
    %cst_169 = arith.constant dense<0.000000e+00> : vector<8x512xf32>
    %724 = tpu.matmul %723, %12, %cst_169 {dimension_numbers = #tpu.dot_dimension_numbers<[1], [0], [0], [1], [0, 0, 1, 1], [], []>} : vector<8x128xbf16>, vector<128x512xbf16>, vector<8x512xf32> -> vector<8x512xf32>
    %725 = arith.addf %722, %724 : vector<8x512xf32>
    %726 = vector.extract_strided_slice %725 {offsets = [0, 0], sizes = [8, 128], strides = [1, 1]} : vector<8x512xf32> to vector<8x128xf32>
    %727 = arith.negf %726 : vector<8x128xf32>
    %728 = math.exp %727 : vector<8x128xf32>
    %cst_170 = arith.constant 1.000000e+00 : f32
    %729 = vector.broadcast %cst_170 : f32 to vector<8x128xf32>
    %730 = arith.addf %729, %728 : vector<8x128xf32>
    %731 = arith.divf %729, %730 : vector<8x128xf32>
    %732 = vector.extract_strided_slice %725 {offsets = [0, 128], sizes = [8, 128], strides = [1, 1]} : vector<8x512xf32> to vector<8x128xf32>
    %733 = arith.negf %732 : vector<8x128xf32>
    %734 = math.exp %733 : vector<8x128xf32>
    %cst_171 = arith.constant 1.000000e+00 : f32
    %735 = vector.broadcast %cst_171 : f32 to vector<8x128xf32>
    %736 = arith.addf %735, %734 : vector<8x128xf32>
    %737 = arith.divf %735, %736 : vector<8x128xf32>
    %738 = vector.extract_strided_slice %725 {offsets = [0, 256], sizes = [8, 128], strides = [1, 1]} : vector<8x512xf32> to vector<8x128xf32>
    %739 = math.tanh %738 : vector<8x128xf32>
    %740 = vector.extract_strided_slice %725 {offsets = [0, 384], sizes = [8, 128], strides = [1, 1]} : vector<8x512xf32> to vector<8x128xf32>
    %741 = arith.negf %740 : vector<8x128xf32>
    %742 = math.exp %741 : vector<8x128xf32>
    %cst_172 = arith.constant 1.000000e+00 : f32
    %743 = vector.broadcast %cst_172 : f32 to vector<8x128xf32>
    %744 = arith.addf %743, %742 : vector<8x128xf32>
    %745 = arith.divf %743, %744 : vector<8x128xf32>
    %746 = arith.mulf %737, %714 : vector<8x128xf32>
    %747 = arith.mulf %731, %739 : vector<8x128xf32>
    %748 = arith.addf %746, %747 : vector<8x128xf32>
    %749 = math.tanh %748 : vector<8x128xf32>
    %750 = arith.mulf %745, %749 : vector<8x128xf32>
    %751 = arith.index_cast %c15_i32 : i32 to index
    %c0_173 = arith.constant 0 : index
    %c0_174 = arith.constant 0 : index
    %752 = vector.load %arg3[%751, %c0_173, %c0_174] : memref<16x8x1xf32, #tpu.memory_space<vmem>>, vector<1x8x1xf32>
    %753 = vector.shape_cast %752 : vector<1x8x1xf32> to vector<8x1xf32>
    %754 = arith.subf %750, %710 : vector<8x128xf32>
    %755 = vector.broadcast %753 : vector<8x1xf32> to vector<8x128xf32>
    %756 = arith.mulf %755, %754 : vector<8x128xf32>
    %757 = arith.addf %710, %756 : vector<8x128xf32>
    %758 = arith.subf %748, %714 : vector<8x128xf32>
    %759 = vector.broadcast %753 : vector<8x1xf32> to vector<8x128xf32>
    %760 = arith.mulf %759, %758 : vector<8x128xf32>
    %761 = arith.addf %714, %760 : vector<8x128xf32>
    %762 = arith.truncf %757 : vector<8x128xf32> to vector<8x128xbf16>
    %763 = arith.index_cast %c15_i32 : i32 to index
    %c0_175 = arith.constant 0 : index
    %c0_176 = arith.constant 0 : index
    %764 = vector.load %arg9[%763, %c0_175, %c0_176] : memref<16x8x128xbf16, #tpu.memory_space<vmem>>, vector<1x8x128xbf16>
    %765 = vector.shape_cast %764 : vector<1x8x128xbf16> to vector<8x128xbf16>
    %766 = vector.shape_cast %762 : vector<8x128xbf16> to vector<1x8x128xbf16>
    tpu.vector_store %arg9[%763, %c0_175, %c0_176], %766 {strides = array<i32>} : memref<16x8x128xbf16, #tpu.memory_space<vmem>>, vector<1x8x128xbf16>,
    %c16_i32 = arith.constant 16 : i32
    %c0_177 = arith.constant 0 : index
    %c0_178 = arith.constant 0 : index
    %767 = vector.load %arg13[%c0_177, %c0_178] : memref<8x128xf32, #tpu.memory_space<vmem>>, vector<8x128xf32>
    tpu.vector_store %arg13[%c0_177, %c0_178], %757 {strides = array<i32>} : memref<8x128xf32, #tpu.memory_space<vmem>>, vector<8x128xf32>,
    %c0_179 = arith.constant 0 : index
    %c0_180 = arith.constant 0 : index
    %768 = vector.load %arg14[%c0_179, %c0_180] : memref<8x128xf32, #tpu.memory_space<vmem>>, vector<8x128xf32>
    tpu.vector_store %arg14[%c0_179, %c0_180], %761 {strides = array<i32>} : memref<8x128xf32, #tpu.memory_space<vmem>>, vector<8x128xf32>,
    %c0_i32_181 = arith.constant 0 : i32
    %769 = arith.cmpi eq, %arg1, %c0_i32_181 : i32
    %770 = arith.extui %769 : i1 to i32
    %c0_i32_182 = arith.constant 0 : i32
    %771 = arith.cmpi ne, %770, %c0_i32_182 : i32
    scf.if %771 {
      %c0_183 = arith.constant 0 : index
      %c0_184 = arith.constant 0 : index
      %772 = vector.load %arg10[%c0_183, %c0_184] : memref<8x128xf32, #tpu.memory_space<vmem>>, vector<8x128xf32>
      tpu.vector_store %arg10[%c0_183, %c0_184], %757 {strides = array<i32>} : memref<8x128xf32, #tpu.memory_space<vmem>>, vector<8x128xf32>,
      %c0_185 = arith.constant 0 : index
      %c0_186 = arith.constant 0 : index
      %773 = vector.load %arg11[%c0_185, %c0_186] : memref<8x128xf32, #tpu.memory_space<vmem>>, vector<8x128xf32>
      tpu.vector_store %arg11[%c0_185, %c0_186], %761 {strides = array<i32>} : memref<8x128xf32, #tpu.memory_space<vmem>>, vector<8x128xf32>,
    } else {
    }
    return
  }
  func.func @transform_0(%arg0: i32, %arg1: i32) -> (i32, i32, i32) {
    %c0_i32 = arith.constant 0 : i32
    %c0_i32_0 = arith.constant 0 : i32
    return %arg1, %arg0, %c0_i32 : i32, i32, i32
  }
  func.func @transform_1(%arg0: i32, %arg1: i32) -> (i32, i32, i32) {
    %c0_i32 = arith.constant 0 : i32
    %c0_i32_0 = arith.constant 0 : i32
    return %arg1, %arg0, %c0_i32 : i32, i32, i32
  }
  func.func @transform_2(%arg0: i32, %arg1: i32) -> (i32, i32) {
    %c0_i32 = arith.constant 0 : i32
    %c0_i32_0 = arith.constant 0 : i32
    %c0_i32_1 = arith.constant 0 : i32
    return %c0_i32, %c0_i32_0 : i32, i32
  }
  func.func @transform_3(%arg0: i32, %arg1: i32) -> (i32, i32) {
    %c0_i32 = arith.constant 0 : i32
    %c0_i32_0 = arith.constant 0 : i32
    %c0_i32_1 = arith.constant 0 : i32
    return %c0_i32, %c0_i32_0 : i32, i32
  }
  func.func @transform_4(%arg0: i32, %arg1: i32) -> (i32, i32) {
    %c0_i32 = arith.constant 0 : i32
    %c0_i32_0 = arith.constant 0 : i32
    %c0_i32_1 = arith.constant 0 : i32
    return %c0_i32, %c0_i32_0 : i32, i32
  }
  func.func @transform_5(%arg0: i32, %arg1: i32) -> (i32, i32) {
    %c0_i32 = arith.constant 0 : i32
    %c0_i32_0 = arith.constant 0 : i32
    return %arg0, %c0_i32 : i32, i32
  }
  func.func @transform_6(%arg0: i32, %arg1: i32) -> (i32, i32) {
    %c0_i32 = arith.constant 0 : i32
    %c0_i32_0 = arith.constant 0 : i32
    return %arg0, %c0_i32 : i32, i32
  }
  func.func @transform_7(%arg0: i32, %arg1: i32) -> (i32, i32, i32) {
    %c0_i32 = arith.constant 0 : i32
    %c0_i32_0 = arith.constant 0 : i32
    return %arg1, %arg0, %c0_i32 : i32, i32, i32
  }
  func.func @transform_8(%arg0: i32, %arg1: i32) -> (i32, i32) {
    %c0_i32 = arith.constant 0 : i32
    %c0_i32_0 = arith.constant 0 : i32
    return %arg0, %c0_i32 : i32, i32
  }
  func.func @transform_9(%arg0: i32, %arg1: i32) -> (i32, i32) {
    %c0_i32 = arith.constant 0 : i32
    %c0_i32_0 = arith.constant 0 : i32
    return %arg0, %c0_i32 : i32, i32
  }
}

</mosaic_0001>

<bundles_post_ra>
// kernel: tpu_custom_call.1
= control target key start
LH: loop header
LB: loop body
LE: loop exit
PB: predicated region body
PF: predicated region fallthrough
CT: control target
= control target key end

     0   :  { %15 = vsyncpa [#allocation6], 0  ;;  %s5058_s0 = inlined_call_operand.vmem [shape: bf16[16,8,128], index: 0, kind: input, shape index: {}]   ;;  %s5059_s1 = inlined_call_operand.vmem [shape: f32[16,8,1], index: 1, kind: input, shape index: {}]   ;;  %s5060_s2 = inlined_call_operand.hbm [shape: bf16[128,512], index: 2, kind: input, shape index: {}]   ;;  %s5061_s3 = inlined_call_operand.hbm [shape: bf16[128,512], index: 3, kind: input, shape index: {}]   ;;  %s5062_s4 = inlined_call_operand.vmem [shape: f32[1,512], index: 4, kind: input, shape index: {}]   ;;  %s5063_s5 = inlined_call_operand.vmem [shape: f32[8,128], index: 5, kind: input, shape index: {}]   ;;  %s5064_s6 = inlined_call_operand.vmem [shape: f32[8,128], index: 6, kind: input, shape index: {}]   ;;  %s5065_s7 = inlined_call_operand.hbm [shape: bf16[16,8,128], index: 7, kind: output, shape index: {0}]   ;;  %s5066_s8 = inlined_call_operand.hbm [shape: f32[8,128], index: 8, kind: output, shape index: {1}]   ;;  %s5067_s9 = inlined_call_operand.hbm [shape: f32[8,128], index: 9, kind: output, shape index: {2}]  }
   0x1   :  { %16 = vsyncpa [#allocation9], 0 }
   0x2   :  { %17 = vsyncpa [#allocation7], 0 }
   0x3   :  { %18 = vsyncpa [#allocation12], 0  ;;  %s3665_s30 = smov [#allocation5]   ;;  %s3547_s13 = scalar_lea.hbm %s5060_s2, 4096 }
   0x4   :  { %s28_s10 = sshll.u32 %s3665_s30, 4  ;;  %p3548_p0 = scmp.ne.s32.totalorder %s5060_s2, %s3547_s13  ;;  %s29_s10 = int_to_ptr.vmem [resolvable:$true] %s28_s10 }
   0x5   :  { %p3551_p1 = scmp.lt.u32.totalorder %s3547_s13, %s5060_s2 }
   0x7   :  { %p3553_p2 = pnand %p3551_p1, %p3548_p0 }
   0x9   :  { %3556 = shalt.err (!%p3553_p2)
}
   0xa   :  { %s3557_s18 = scalar_lea.vmem %s29_s10, 4096  ;;  %p3562_p4 = scmp.lt.s32.totalorder %s29_s10, %s29_s10 }
   0xb   :  { %p3558_p3 = scmp.ne.s32.totalorder %s29_s10, %s3557_s18  ;;  %p3563_p5 = scmp.lt.s32.totalorder %s3557_s18, %s3557_s18 }
   0xd   :  { %p3564_p6 = por %p3563_p5, %p3562_p4 }
   0xf   :  { %p3565_p7 = pnand %p3564_p6, %p3558_p3 }
  0x11   :  { %3568 = shalt.err (!%p3565_p7)
}
  0x12   :  { %s3666_s19 = smov 256   ;;  %s3667_s20 = smov 16  }
  0x13   :  { %34 = dma.hbm_to_vmem [thread:$0]  %s5060_s2, 4096, %s29_s10, [#allocation6], %s3666_s19, %s3666_s19, %s3667_s20  }
  0x14   :  { %s3668_s23 = smov [#allocation8]   ;;  %s3569_s27 = scalar_lea.hbm %s5061_s3, 4096 }
  0x15   :  { %s40_s24 = sshll.u32 %s3668_s23, 4  ;;  %p3570_p8 = scmp.ne.s32.totalorder %s5061_s3, %s3569_s27  ;;  %s41_s24 = int_to_ptr.vmem [resolvable:$true] %s40_s24 }
  0x16   :  { %p3573_p9 = scmp.lt.u32.totalorder %s3569_s27, %s5061_s3 }
  0x18   :  { %p3575_p10 = pnand %p3573_p9, %p3570_p8 }
  0x1a   :  { %3578 = shalt.err (!%p3575_p10)
}
  0x1b   :  { %s3579_s12 = scalar_lea.vmem %s41_s24, 4096  ;;  %p3584_p12 = scmp.lt.s32.totalorder %s41_s24, %s41_s24 }
  0x1c   :  { %p3580_p11 = scmp.ne.s32.totalorder %s41_s24, %s3579_s12  ;;  %p3585_p13 = scmp.lt.s32.totalorder %s3579_s12, %s3579_s12 }
  0x1e   :  { %p3586_p0 = por %p3585_p13, %p3584_p12 }
  0x20   :  { %p3587_p1 = pnand %p3586_p0, %p3580_p11 }
  0x22   :  { %3590 = shalt.err (!%p3587_p1)
}
  0x23   :  { %46 = dma.hbm_to_vmem [thread:$0]  %s5061_s3, 4096, %s41_s24, [#allocation9], %s3666_s19, %s3666_s19, %s3667_s20  }
  0x24   :  { %3657 = dma.done.wait [#allocation6], 4096  }
  0x25   :  { %3658 = vsyncadd [#allocation6], 4294963200 }
  0x26   :  { %3659 = dma.done.wait [#allocation9], 4096  }
  0x27   :  { %3660 = vsyncadd [#allocation9], 4294963200  ;;  %v5068_v0 = vmov 0   ;;  %v3123_v1 = vld [vmem:[#allocation5 + $0x4] ss:$16 sps:$4 sm:$0xff]   ;;  %v3175_v43 = vld [vmem:[%s5058_s0 + $0x8] sm:$0xff]  }
  0x28   :  { %378 = vmatprep.mubr.bf16.mxu0 %v5068_v0  ;;  %491 = vmatprep.mubr.bf16.mxu1 %v5068_v0  ;;  %v3125_v2 = vld [vmem:[#allocation5 + $0xc] ss:$16 sps:$4 sm:$0xff]   ;;  %v3127_v3 = vld [vmem:[#allocation5] ss:$16 sps:$4 sm:$0xff]   ;;  %v3128_v4 = vld [vmem:[#allocation5 + $0x8] ss:$16 sps:$4 sm:$0xff]  }
  0x29   :  { %3121 = vset.pattern.permute.xlu0 %v5068_v0  ;;  %3122 = vset.pattern.permute.xlu1 %v5068_v0  ;;  %v3129_v5 = vld [vmem:[#allocation5 + $0x24] ss:$16 sps:$4 sm:$0xff]   ;;  %v3131_v6 = vld [vmem:[#allocation5 + $0x2c] ss:$16 sps:$4 sm:$0xff]   ;;  %v3133_v7 = vld [vmem:[#allocation5 + $0x20] ss:$16 sps:$4 sm:$0xff]  }
  0x2a   :  { %346 = vmatprep.subr.bf16.mxu0 %v3123_v1  ;;  %459 = vmatprep.subr.bf16.mxu1 %v3125_v2  ;;  %v3134_v8 = vld [vmem:[#allocation5 + $0x28] ss:$16 sps:$4 sm:$0xff]   ;;  %v3135_v9 = vld [vmem:[#allocation5 + $0x44] ss:$16 sps:$4 sm:$0xff]   ;;  %v3137_v10 = vld [vmem:[#allocation5 + $0x4c] ss:$16 sps:$4 sm:$0xff]  }
  0x2b   :  { %347 = vmatpush1.bf16.msra.mxu0 %v3127_v3  ;;  %460 = vmatpush1.bf16.msra.mxu1 %v3128_v4  ;;  %v3139_v11 = vld [vmem:[#allocation5 + $0x40] ss:$16 sps:$4 sm:$0xff]   ;;  %v3140_v12 = vld [vmem:[#allocation5 + $0x48] ss:$16 sps:$4 sm:$0xff]   ;;  %v3141_v13 = vld [vmem:[#allocation5 + $0x64] ss:$16 sps:$4 sm:$0xff]  }
  0x2c   :  { %348 = vmatprep.subr.bf16.mxu0 %v3129_v5  ;;  %461 = vmatprep.subr.bf16.mxu1 %v3131_v6  ;;  %v3143_v14 = vld [vmem:[#allocation5 + $0x6c] ss:$16 sps:$4 sm:$0xff]   ;;  %v3145_v15 = vld [vmem:[#allocation5 + $0x60] ss:$16 sps:$4 sm:$0xff]   ;;  %v3146_v16 = vld [vmem:[#allocation5 + $0x68] ss:$16 sps:$4 sm:$0xff]  }
  0x2d   :  { %v3147_v17 = vld [vmem:[#allocation5 + $0x84] ss:$16 sps:$4 sm:$0xff]   ;;  %v3149_v18 = vld [vmem:[#allocation5 + $0x8c] ss:$16 sps:$4 sm:$0xff]   ;;  %v3151_v19 = vld [vmem:[#allocation5 + $0x80] ss:$16 sps:$4 sm:$0xff]  }
  0x2e   :  { %v3152_v20 = vld [vmem:[#allocation5 + $0x88] ss:$16 sps:$4 sm:$0xff]   ;;  %v3153_v21 = vld [vmem:[#allocation5 + $0xa4] ss:$16 sps:$4 sm:$0xff]   ;;  %v3155_v22 = vld [vmem:[#allocation5 + $0xac] ss:$16 sps:$4 sm:$0xff]  }
  0x2f   :  { %349 = vmatpush1.bf16.msra.mxu0 %v3133_v7  ;;  %462 = vmatpush1.bf16.msra.mxu1 %v3134_v8  ;;  %v3157_v23 = vld [vmem:[#allocation5 + $0xa0] ss:$16 sps:$4 sm:$0xff]   ;;  %v3158_v24 = vld [vmem:[#allocation5 + $0xa8] ss:$16 sps:$4 sm:$0xff]   ;;  %v3159_v25 = vld [vmem:[#allocation5 + $0xc4] ss:$16 sps:$4 sm:$0xff]  }
  0x30   :  { %350 = vmatprep.subr.bf16.mxu0 %v3135_v9  ;;  %463 = vmatprep.subr.bf16.mxu1 %v3137_v10  ;;  %v3161_v26 = vld [vmem:[#allocation5 + $0xcc] ss:$16 sps:$4 sm:$0xff]   ;;  %v3163_v27 = vld [vmem:[#allocation5 + $0xc0] ss:$16 sps:$4 sm:$0xff]   ;;  %v3164_v28 = vld [vmem:[#allocation5 + $0xc8] ss:$16 sps:$4 sm:$0xff]  }
  0x31   :  { %v3165_v29 = vld [vmem:[#allocation5 + $0xe4] ss:$16 sps:$4 sm:$0xff]   ;;  %v3167_v30 = vld [vmem:[#allocation5 + $0xec] ss:$16 sps:$4 sm:$0xff]   ;;  %v3169_v31 = vld [vmem:[#allocation5 + $0xe0] ss:$16 sps:$4 sm:$0xff]  }
  0x32   :  { %v3170_v32 = vld [vmem:[#allocation5 + $0xe8] ss:$16 sps:$4 sm:$0xff]   ;;  %v3753_v33 = vld [vmem:[#allocation8 + $0x4] ss:$16 sps:$4 sm:$0xff]   ;;  %v3755_v34 = vld [vmem:[#allocation8 + $0xc] ss:$16 sps:$4 sm:$0xff]  }
  0x33   :  { %351 = vmatpush1.bf16.msra.mxu0 %v3139_v11  ;;  %464 = vmatpush1.bf16.msra.mxu1 %v3140_v12  ;;  %v3171_v35 = vld [vmem:[%s5058_s0] sm:$0xff]   ;;  %v3766_v38 = vld [vmem:[#allocation8 + $0x8] ss:$16 sps:$4 sm:$0xff]   ;;  %v3768_v39 = vld [vmem:[#allocation8 + $0x2c] ss:$16 sps:$4 sm:$0xff]   ;;  %s3671_s17 = smov [#allocation10]  }
  0x34   :  { %352 = vmatprep.subr.bf16.mxu0 %v3141_v13  ;;  %465 = vmatprep.subr.bf16.mxu1 %v3143_v14  ;;  %v3760_v36 = vld [vmem:[#allocation8] ss:$16 sps:$4 sm:$0xff]   ;;  %v3763_v37 = vld [vmem:[#allocation8 + $0x24] ss:$16 sps:$4 sm:$0xff]   ;;  %v3779_v42 = vld [vmem:[#allocation8 + $0x28] ss:$16 sps:$4 sm:$0xff]  }
  0x35   :  { %v3772_v40 = vld [vmem:[#allocation8 + $0x20] ss:$16 sps:$4 sm:$0xff]   ;;  %v3776_v41 = vld [vmem:[#allocation8 + $0x44] ss:$16 sps:$4 sm:$0xff]   ;;  %v3791_v46 = vld [vmem:[#allocation8 + $0x4c] ss:$16 sps:$4 sm:$0xff]  }
  0x36   :  { %v3786_v44 = vld [vmem:[#allocation8 + $0x40] ss:$16 sps:$4 sm:$0xff]   ;;  %v3788_v45 = vld [vmem:[#allocation8 + $0x64] ss:$16 sps:$4 sm:$0xff]   ;;  %v3794_v47 = vld [vmem:[#allocation8 + $0x48] ss:$16 sps:$4 sm:$0xff]  }
  0x37   :  { %353 = vmatpush1.bf16.msra.mxu0 %v3145_v15  ;;  %466 = vmatpush1.bf16.msra.mxu1 %v3146_v16  ;;  %v3796_v48 = vld [vmem:[#allocation8 + $0x6c] ss:$16 sps:$4 sm:$0xff]   ;;  %v3801_v49 = vld [vmem:[#allocation8 + $0x60] ss:$16 sps:$4 sm:$0xff]   ;;  %v3804_v50 = vld [vmem:[#allocation8 + $0x84] ss:$16 sps:$4 sm:$0xff]  }
  0x38   :  { %354 = vmatprep.subr.bf16.mxu0 %v3147_v17  ;;  %467 = vmatprep.subr.bf16.mxu1 %v3149_v18  ;;  %v3808_v51 = vld [vmem:[#allocation8 + $0x68] ss:$16 sps:$4 sm:$0xff]   ;;  %v3181_v52 = vld [vmem:[%s5058_s0 + $0x10] sm:$0xff]   ;;  %v3817_v54 = vld [vmem:[#allocation8 + $0x8c] ss:$16 sps:$4 sm:$0xff]   ;;  %s2936_s18 = sshll.u32 %s3671_s17, 4  ;;  %s5008_s18 = int_to_ptr.vmem [resolvable:$true] %s2936_s18 }
  0x39   :  { %v3814_v53 = vld [vmem:[#allocation8 + $0x80] ss:$16 sps:$4 sm:$0xff]   ;;  %v3820_v55 = vld [vmem:[#allocation8 + $0xa4] ss:$16 sps:$4 sm:$0xff]   ;;  %v3823_v56 = vld [vmem:[#allocation8 + $0x88] ss:$16 sps:$4 sm:$0xff]  }
  0x3a   :  { %v3825_v57 = vld [vmem:[#allocation8 + $0xac] ss:$16 sps:$4 sm:$0xff]   ;;  %v945_v58 = vld [vmem:[%s5059_s1] sm:$0xff]  ;;  %v3840_v61 = vld [vmem:[#allocation8 + $0xa8] ss:$16 sps:$4 sm:$0xff]   ;;  %s3672_s19 = smov [#allocation13]  }
  0x3b   :  { %355 = vmatpush1.bf16.msra.mxu0 %v3151_v19  ;;  %468 = vmatpush1.bf16.msra.mxu1 %v3152_v20  ;;  %v3833_v59 = vld [vmem:[#allocation8 + $0xa0] ss:$16 sps:$4 sm:$0xff]   ;;  %v3837_v60 = vld [vmem:[#allocation8 + $0xc4] ss:$16 sps:$4 sm:$0xff]   ;;  %v3188_v62 = vld [vmem:[%s5058_s0 + $0x18] sm:$0xff]   ;;  %v118_v20 = vlaneseq  ;;  %s2959_s20 = sshll.u32 %s3672_s19, 4  ;;  %s5010_s20 = int_to_ptr.vmem [resolvable:$true] %s2959_s20 }
  0x3c   :  { %356 = vmatprep.subr.bf16.mxu0 %v3153_v21  ;;  %469 = vmatprep.subr.bf16.mxu1 %v3155_v22  ;;  %v3847_v63 = vld [vmem:[#allocation8 + $0xc0] ss:$16 sps:$4 sm:$0xff]   ;;  %v3849_v1 = vld [vmem:[#allocation8 + $0xcc] ss:$16 sps:$4 sm:$0xff]   ;;  %v3853_v2 = vld [vmem:[#allocation8 + $0xe4] ss:$16 sps:$4 sm:$0xff]  }
  0x3d   :  { %949 = vperm.xlu0 %3121, %v945_v58   ;;  %v3855_v3 = vld [vmem:[#allocation8 + $0xc8] ss:$16 sps:$4 sm:$0xff]   ;;  %v3857_v4 = vld [vmem:[#allocation8 + $0xec] ss:$16 sps:$4 sm:$0xff]   ;;  %v3866_v6 = vld [vmem:[#allocation8 + $0xe0] ss:$16 sps:$4 sm:$0xff]  }
  0x3e   :  { %v3054_v5 = vld [vmem:[%s5059_s1 + $0x8] sm:$0xff]  ;;  %v3195_v8 = vld [vmem:[%s5058_s0 + $0x20] sm:$0xff]   ;;  %v3074_v10 = vld [vmem:[%s5059_s1 + $0x30] sm:$0xff]  ;;  %v119_v21 = vshrl.u32 %v118_v20, 7 }
  0x3f   :  { %357 = vmatpush1.bf16.msra.mxu0 %v3157_v23  ;;  %470 = vmatpush1.bf16.msra.mxu1 %v3158_v24  ;;  %v3870_v7 = vld [vmem:[#allocation8 + $0xe8] ss:$16 sps:$4 sm:$0xff]   ;;  %v3066_v9 = vld [vmem:[%s5059_s1 + $0x20] sm:$0xff]  ;;  %v3090_v13 = vld [vmem:[%s5059_s1 + $0x50] sm:$0xff] }
  0x40   :  { %358 = vmatprep.subr.bf16.mxu0 %v3159_v25  ;;  %471 = vmatprep.subr.bf16.mxu1 %v3161_v26  ;;  %v3202_v11 = vld [vmem:[%s5058_s0 + $0x28] sm:$0xff]   ;;  %v3082_v12 = vld [vmem:[%s5059_s1 + $0x40] sm:$0xff]  ;;  %v3209_v14 = vld [vmem:[%s5058_s0 + $0x30] sm:$0xff]   ;;  %v128_v22 = vsub.s32 2, %v119_v21  ;;  %v132_v23 = vsub.s32 3, %v119_v21  ;;  %v120_v24 = vsub.s32 0, %v119_v21 }
  0x41   :  { %1079 = vperm.xlu0 %3121, %v3054_v5   ;;  %v3098_v15 = vld [vmem:[%s5059_s1 + $0x60] sm:$0xff]  ;;  %v3106_v16 = vld [vmem:[%s5059_s1 + $0x70] sm:$0xff]  ;;  %v3217_v17 = vld [vmem:[%s5058_s0 + $0x38] sm:$0xff]   ;;  %v124_v26 = vsub.s32 1, %v119_v21 }
  0x42   :  { %v3918_v18 = vld [vmem:[%s5063_s5] sm:$0xff] }
  0x43   :  { %359 = vmatpush1.bf16.msra.mxu0 %v3163_v27  ;;  %472 = vmatpush1.bf16.msra.mxu1 %v3164_v28  ;;  %v674_v19 = vpack.c.bf16 %v3918_v18, %v3918_v18  ;;  %v116_v25 = vld [vmem:[%s5062_s4] sm:$0xf] }
  0x44   :  { %360 = vmatprep.subr.bf16.mxu0 %v3165_v29  ;;  %473 = vmatprep.subr.bf16.mxu1 %v3167_v30  ;;  %v3959_v27 = vrot.slane %v116_v25, %v128_v22  ;;  %v3965_v30 = vrot.slane %v116_v25, %v132_v23 }
  0x45   :  { %1472 = vperm.xlu0 %3121, %v3066_v9  }
  0x47   :  { %361 = vmatpush1.bf16.msra.mxu0 %v3169_v31  ;;  %474 = vmatpush1.bf16.msra.mxu1 %v3170_v32  ;;  %v3967_v31 = vrot.slane %v116_v25, %v120_v24 }
  0x48   :  { %835 = vmatprep.subr.bf16.mxu0 %v3753_v33  ;;  %876 = vmatprep.subr.bf16.mxu1 %v3755_v34 }
  0x49   :  { %1734 = vperm.xlu0 %3121, %v3074_v10  }
  0x4a   :  { %379 = vmatmul.mubr.bf16.vlgmr.msra.gmra.mrb[0].mxu0 %v3171_v35  ;;  %492 = vmatmul.mubr.bf16.vlgmr.msra.gmra.mrb[0].mxu1 %v3171_v35 }
  0x4b   :  { %836 = vmatpush1.bf16.msra.mxu0 %v3760_v36  ;;  %388 = vmatprep.mubr.bf16.mxu0 %v5068_v0 }
  0x4c   :  { %501 = vmatprep.mubr.bf16.mxu1 %v5068_v0  ;;  %837 = vmatprep.subr.bf16.mxu0 %v3763_v37 }
  0x4d   :  { %877 = vmatpush1.bf16.msra.mxu1 %v3766_v38  ;;  %1996 = vperm.xlu0 %3121, %v3082_v12  }
  0x4e   :  { %878 = vmatprep.subr.bf16.mxu1 %v3768_v39 }
  0x4f   :  { %838 = vmatpush1.bf16.msra.mxu0 %v3772_v40 }
  0x50   :  { %839 = vmatprep.subr.bf16.mxu0 %v3776_v41 }
  0x51   :  { %879 = vmatpush1.bf16.msra.mxu1 %v3779_v42  ;;  %2258 = vperm.xlu0 %3121, %v3090_v13  }
  0x52   :  { %389 = vmatmul.mubr.bf16.gmra.mrb[4].mxu0 %v3175_v43  ;;  %502 = vmatmul.mubr.bf16.gmra.mrb[4].mxu1 %v3175_v43  ;;  %v3973_v43 = vrot.slane %v116_v25, %v124_v26 }
  0x53   :  { %398 = vmatprep.mubr.bf16.mxu0 %v5068_v0  ;;  %511 = vmatprep.mubr.bf16.mxu1 %v5068_v0 }
  0x54   :  { %840 = vmatpush1.bf16.msra.mxu0 %v3786_v44  ;;  %880 = vmatprep.subr.bf16.mxu1 %v3791_v46 }
  0x55   :  { %841 = vmatprep.subr.bf16.mxu0 %v3788_v45  ;;  %881 = vmatpush1.bf16.msra.mxu1 %v3794_v47 }
  0x56   :  { %882 = vmatprep.subr.bf16.mxu1 %v3796_v48  ;;  %2520 = vperm.xlu0 %3121, %v3098_v15  }
  0x58   :  { %842 = vmatpush1.bf16.msra.mxu0 %v3801_v49 }
  0x59   :  { %843 = vmatprep.subr.bf16.mxu0 %v3804_v50  ;;  %883 = vmatpush1.bf16.msra.mxu1 %v3808_v51 }
  0x5a   :  { %399 = vmatmul.mubr.bf16.gmra.mrb[8].mxu0 %v3181_v52  ;;  %512 = vmatmul.mubr.bf16.gmra.mrb[8].mxu1 %v3181_v52 }
  0x5b   :  { %408 = vmatprep.mubr.bf16.mxu0 %v5068_v0  ;;  %521 = vmatprep.mubr.bf16.mxu1 %v5068_v0 }
  0x5c   :  { %844 = vmatpush1.bf16.msra.mxu0 %v3814_v53  ;;  %884 = vmatprep.subr.bf16.mxu1 %v3817_v54 }
  0x5d   :  { %845 = vmatprep.subr.bf16.mxu0 %v3820_v55  ;;  %885 = vmatpush1.bf16.msra.mxu1 %v3823_v56 }
  0x5e   :  { %886 = vmatprep.subr.bf16.mxu1 %v3825_v57  ;;  %2782 = vperm.xlu0 %3121, %v3106_v16  }
  0x60   :  { %846 = vmatpush1.bf16.msra.mxu0 %v3833_v59 }
  0x61   :  { %847 = vmatprep.subr.bf16.mxu0 %v3837_v60  ;;  %887 = vmatpush1.bf16.msra.mxu1 %v3840_v61 }
  0x62   :  { %409 = vmatmul.mubr.bf16.gmra.mrb[12].mxu0 %v3188_v62  ;;  %522 = vmatmul.mubr.bf16.gmra.mrb[12].mxu1 %v3188_v62 }
  0x63   :  { %418 = vmatprep.mubr.bf16.mxu0 %v5068_v0  ;;  %531 = vmatprep.mubr.bf16.mxu1 %v5068_v0 }
  0x64   :  { %848 = vmatpush1.bf16.msra.mxu0 %v3847_v63  ;;  %888 = vmatprep.subr.bf16.mxu1 %v3849_v1 }
  0x65   :  { %849 = vmatprep.subr.bf16.mxu0 %v3853_v2  ;;  %889 = vmatpush1.bf16.msra.mxu1 %v3855_v3 }
  0x66   :  { %890 = vmatprep.subr.bf16.mxu1 %v3857_v4 }
  0x68   :  { %850 = vmatpush1.bf16.msra.mxu0 %v3866_v6 }
  0x69   :  { %891 = vmatpush1.bf16.msra.mxu1 %v3870_v7  ;;  %964 = vmatprep.subr.bf16.mxu0 %v3753_v33 }
  0x6a   :  { %419 = vmatmul.mubr.bf16.gmra.mrb[16].mxu0 %v3195_v8  ;;  %532 = vmatmul.mubr.bf16.gmra.mrb[16].mxu1 %v3195_v8 }
  0x6b   :  { %428 = vmatprep.mubr.bf16.mxu0 %v5068_v0  ;;  %541 = vmatprep.mubr.bf16.mxu1 %v5068_v0 }
  0x6c   :  { %1005 = vmatprep.subr.bf16.mxu1 %v3755_v34 }
  0x72   :  { %429 = vmatmul.mubr.bf16.gmra.mrb[20].mxu0 %v3202_v11  ;;  %542 = vmatmul.mubr.bf16.gmra.mrb[20].mxu1 %v3202_v11 }
  0x73   :  { %438 = vmatprep.mubr.bf16.mxu0 %v5068_v0  ;;  %551 = vmatprep.mubr.bf16.mxu1 %v5068_v0 }
  0x7a   :  { %439 = vmatmul.mubr.bf16.gmra.mrb[24].mxu0 %v3209_v14  ;;  %552 = vmatmul.mubr.bf16.gmra.mrb[24].mxu1 %v3209_v14 }
  0x7b   :  { %448 = vmatprep.mubr.bf16.mxu0 %v5068_v0  ;;  %561 = vmatprep.mubr.bf16.mxu1 %v5068_v0 }
  0x82   :  { %449 = vmatmul.mubr.bf16.gmra.mrb[28].mxu0 %v3217_v17  ;;  %562 = vmatmul.mubr.bf16.gmra.mrb[28].mxu1 %v3217_v17 }
  0x83   :  { %867 = vmatprep.mubr.bf16.mxu0 %v5068_v0  ;;  %908 = vmatprep.mubr.bf16.mxu1 %v5068_v0 }
  0x8a   :  { %868 = vmatmul.mubr.bf16.vlgmr.msra.gmra.mrb[32].mxu0 %v674_v19  ;;  %909 = vmatmul.mubr.bf16.vlgmr.msra.gmra.mrb[32].mxu1 %v674_v19 }
  0x8b   :  { %965 = vmatpush1.bf16.msra.mxu0 %v3760_v36  ;;  %1006 = vmatpush1.bf16.msra.mxu1 %v3766_v38 }
  0x8c   :  { %966 = vmatprep.subr.bf16.mxu0 %v3763_v37  ;;  %1007 = vmatprep.subr.bf16.mxu1 %v3768_v39 }
  0x8d   :  { %996 = vmatprep.mubr.bf16.mxu0 %v5068_v0  ;;  %1037 = vmatprep.mubr.bf16.mxu1 %v5068_v0 }
  0x8f   :  { %967 = vmatpush1.bf16.msra.mxu0 %v3772_v40  ;;  %1008 = vmatpush1.bf16.msra.mxu1 %v3779_v42 }
  0x90   :  { %968 = vmatprep.subr.bf16.mxu0 %v3776_v41  ;;  %1009 = vmatprep.subr.bf16.mxu1 %v3791_v46 }
  0x93   :  { %969 = vmatpush1.bf16.msra.mxu0 %v3786_v44  ;;  %1010 = vmatpush1.bf16.msra.mxu1 %v3794_v47 }
  0x94   :  { %970 = vmatprep.subr.bf16.mxu0 %v3788_v45  ;;  %1011 = vmatprep.subr.bf16.mxu1 %v3796_v48 }
  0x97   :  { %971 = vmatpush1.bf16.msra.mxu0 %v3801_v49  ;;  %1012 = vmatpush1.bf16.msra.mxu1 %v3808_v51 }
  0x98   :  { %972 = vmatprep.subr.bf16.mxu0 %v3804_v50  ;;  %1013 = vmatprep.subr.bf16.mxu1 %v3817_v54 }
  0x9b   :  { %973 = vmatpush1.bf16.msra.mxu0 %v3814_v53  ;;  %1014 = vmatpush1.bf16.msra.mxu1 %v3823_v56 }
  0x9c   :  { %974 = vmatprep.subr.bf16.mxu0 %v3820_v55  ;;  %1015 = vmatprep.subr.bf16.mxu1 %v3825_v57 }
  0x9f   :  { %975 = vmatpush1.bf16.msra.mxu0 %v3833_v59  ;;  %1016 = vmatpush1.bf16.msra.mxu1 %v3840_v61 }
  0xa0   :  { %976 = vmatprep.subr.bf16.mxu0 %v3837_v60  ;;  %1017 = vmatprep.subr.bf16.mxu1 %v3849_v1 }
  0xa3   :  { %977 = vmatpush1.bf16.msra.mxu0 %v3847_v63  ;;  %1018 = vmatpush1.bf16.msra.mxu1 %v3855_v3 }
  0xa4   :  { %978 = vmatprep.subr.bf16.mxu0 %v3853_v2  ;;  %1019 = vmatprep.subr.bf16.mxu1 %v3857_v4 }
  0xa7   :  { %979 = vmatpush1.bf16.msra.mxu0 %v3866_v6  ;;  %1020 = vmatpush1.bf16.msra.mxu1 %v3870_v7 }
  0xa8   :  { %1095 = vmatprep.subr.bf16.mxu0 %v3753_v33  ;;  %1136 = vmatprep.subr.bf16.mxu1 %v3755_v34 }
 0x11d   :  { %v3961_v28 = vpop.f32.mrb[0].mxu0  ;;  %v3963_v29 = vpop.f32.mrb[0].mxu1 }
 0x11e   :  { %v3969_v32 = vpop.f32.mrb[1].mxu0  ;;  %v3971_v35 = vpop.f32.mrb[1].mxu1 }
 0x11f   :  { %v384_v52 = vpop.f32.mrb[2].mxu0  ;;  %v497_v58 = vpop.f32.mrb[2].mxu1 }
 0x120   :  { %v3976_v62 = vadd.f32 %v384_v52, %v3967_v31  ;;  %v386_v5 = vpop.f32.mrb[3].mxu0  ;;  %v3979_v8 = vadd.f32 %v497_v58, %v3959_v27  ;;  %v499_v9 = vpop.f32.mrb[3].mxu1 }
 0x121   :  { %v3982_v10 = vadd.f32 %v386_v5, %v3973_v43  ;;  %v3985_v11 = vadd.f32 %v499_v9, %v3965_v30 }
 0x125   :  { %v390_v12 = vpop.f32.mrb[4].mxu0  ;;  %v503_v13 = vpop.f32.mrb[4].mxu1 }
 0x126   :  { %v3988_v14 = vadd.f32 %v390_v12, %v3967_v31  ;;  %v392_v15 = vpop.f32.mrb[5].mxu0  ;;  %v3991_v16 = vadd.f32 %v503_v13, %v3959_v27  ;;  %v505_v17 = vpop.f32.mrb[5].mxu1 }
 0x127   :  { %v3994_v19 = vadd.f32 %v392_v15, %v3973_v43  ;;  %v394_v20 = vpop.f32.mrb[6].mxu0  ;;  %v3997_v21 = vadd.f32 %v505_v17, %v3965_v30  ;;  %v507_v22 = vpop.f32.mrb[6].mxu1 }
 0x128   :  { %v4000_v23 = vadd.f32 %v394_v20, %v3967_v31  ;;  %v396_v24 = vpop.f32.mrb[7].mxu0  ;;  %v4003_v25 = vadd.f32 %v507_v22, %v3959_v27  ;;  %v509_v26 = vpop.f32.mrb[7].mxu1 }
 0x129   :  { %v4006_v52 = vadd.f32 %v396_v24, %v3973_v43  ;;  %v4009_v58 = vadd.f32 %v509_v26, %v3965_v30 }
 0x12a   :  { %5070 = vst [vmem:[#allocation18_spill] sm:$0xff] %v4000_v23  ;;  %5071 = vst [vmem:[#allocation19_spill] sm:$0xff] %v4003_v25 }
 0x12b   :  { %5072 = vst [vmem:[#allocation20_spill] sm:$0xff] %v4006_v52  ;;  %5073 = vst [vmem:[#allocation21_spill] sm:$0xff] %v4009_v58 }
 0x12d   :  { %v400_v5 = vpop.f32.mrb[8].mxu0  ;;  %v513_v9 = vpop.f32.mrb[8].mxu1 }
 0x12e   :  { %v4012_v12 = vadd.f32 %v400_v5, %v3967_v31  ;;  %v402_v13 = vpop.f32.mrb[9].mxu0  ;;  %v4015_v15 = vadd.f32 %v513_v9, %v3959_v27  ;;  %v515_v17 = vpop.f32.mrb[9].mxu1 }
 0x12f   :  { %v4018_v20 = vadd.f32 %v402_v13, %v3973_v43  ;;  %v404_v22 = vpop.f32.mrb[10].mxu0  ;;  %v4021_v24 = vadd.f32 %v515_v17, %v3965_v30  ;;  %v517_v0 = vpop.f32.mrb[10].mxu1 }
 0x130   :  { %5074 = vst [vmem:[#allocation22_spill] sm:$0xff] %v4012_v12  ;;  %5075 = vst [vmem:[#allocation23_spill] sm:$0xff] %v4015_v15  ;;  %v4024_v26 = vadd.f32 %v404_v22, %v3967_v31  ;;  %v406_v58 = vpop.f32.mrb[11].mxu0  ;;  %v4027_v5 = vadd.f32 %v517_v0, %v3959_v27  ;;  %v519_v12 = vpop.f32.mrb[11].mxu1 }
 0x131   :  { %5076 = vst [vmem:[#allocation24_spill] sm:$0xff] %v4018_v20  ;;  %5077 = vst [vmem:[#allocation25_spill] sm:$0xff] %v4021_v24  ;;  %v4030_v9 = vadd.f32 %v406_v58, %v3973_v43  ;;  %v4033_v15 = vadd.f32 %v519_v12, %v3965_v30 }
 0x132   :  { %5078 = vst [vmem:[#allocation26_spill] sm:$0xff] %v4024_v26  ;;  %5079 = vst [vmem:[#allocation27_spill] sm:$0xff] %v4027_v5 }
 0x133   :  { %5080 = vst [vmem:[#allocation28_spill] sm:$0xff] %v4030_v9  ;;  %5081 = vst [vmem:[#allocation29_spill] sm:$0xff] %v4033_v15 }
 0x135   :  { %v410_v13 = vpop.f32.mrb[12].mxu0  ;;  %v523_v20 = vpop.f32.mrb[12].mxu1 }
 0x136   :  { %v4036_v17 = vadd.f32 %v410_v13, %v3967_v31  ;;  %v412_v24 = vpop.f32.mrb[13].mxu0  ;;  %v4039_v22 = vadd.f32 %v523_v20, %v3959_v27  ;;  %v525_v26 = vpop.f32.mrb[13].mxu1 }
 0x137   :  { %v4042_v0 = vadd.f32 %v412_v24, %v3973_v43  ;;  %v414_v5 = vpop.f32.mrb[14].mxu0  ;;  %v4045_v58 = vadd.f32 %v525_v26, %v3965_v30  ;;  %v527_v9 = vpop.f32.mrb[14].mxu1 }
 0x138   :  { %5082 = vst [vmem:[#allocation30_spill] sm:$0xff] %v4036_v17  ;;  %5083 = vst [vmem:[#allocation31_spill] sm:$0xff] %v4039_v22  ;;  %v4048_v12 = vadd.f32 %v414_v5, %v3967_v31  ;;  %v416_v15 = vpop.f32.mrb[15].mxu0  ;;  %v4051_v13 = vadd.f32 %v527_v9, %v3959_v27  ;;  %v529_v17 = vpop.f32.mrb[15].mxu1 }
 0x139   :  { %5084 = vst [vmem:[#allocation32_spill] sm:$0xff] %v4042_v0  ;;  %5085 = vst [vmem:[#allocation33_spill] sm:$0xff] %v4045_v58  ;;  %v4054_v20 = vadd.f32 %v416_v15, %v3973_v43  ;;  %v4057_v22 = vadd.f32 %v529_v17, %v3965_v30 }
 0x13a   :  { %5086 = vst [vmem:[#allocation34_spill] sm:$0xff] %v4048_v12  ;;  %5087 = vst [vmem:[#allocation35_spill] sm:$0xff] %v4051_v13 }
 0x13b   :  { %5088 = vst [vmem:[#allocation36_spill] sm:$0xff] %v4054_v20  ;;  %5089 = vst [vmem:[#allocation37_spill] sm:$0xff] %v4057_v22 }
 0x13d   :  { %v420_v24 = vpop.f32.mrb[16].mxu0  ;;  %v533_v0 = vpop.f32.mrb[16].mxu1 }
 0x13e   :  { %v4060_v26 = vadd.f32 %v420_v24, %v3967_v31  ;;  %v422_v58 = vpop.f32.mrb[17].mxu0  ;;  %v4063_v5 = vadd.f32 %v533_v0, %v3959_v27  ;;  %v535_v12 = vpop.f32.mrb[17].mxu1 }
 0x13f   :  { %v4066_v9 = vadd.f32 %v422_v58, %v3973_v43  ;;  %v424_v13 = vpop.f32.mrb[18].mxu0  ;;  %v4069_v15 = vadd.f32 %v535_v12, %v3965_v30  ;;  %v537_v20 = vpop.f32.mrb[18].mxu1 }
 0x140   :  { %5090 = vst [vmem:[#allocation38_spill] sm:$0xff] %v4060_v26  ;;  %5091 = vst [vmem:[#allocation39_spill] sm:$0xff] %v4063_v5  ;;  %v4072_v17 = vadd.f32 %v424_v13, %v3967_v31  ;;  %v426_v22 = vpop.f32.mrb[19].mxu0  ;;  %v4075_v24 = vadd.f32 %v537_v20, %v3959_v27  ;;  %v539_v26 = vpop.f32.mrb[19].mxu1 }
 0x141   :  { %5092 = vst [vmem:[#allocation40_spill] sm:$0xff] %v4066_v9  ;;  %5093 = vst [vmem:[#allocation41_spill] sm:$0xff] %v4069_v15  ;;  %v4078_v0 = vadd.f32 %v426_v22, %v3973_v43  ;;  %v4081_v5 = vadd.f32 %v539_v26, %v3965_v30 }
 0x142   :  { %5094 = vst [vmem:[#allocation42_spill] sm:$0xff] %v4072_v17  ;;  %5095 = vst [vmem:[#allocation43_spill] sm:$0xff] %v4075_v24 }
 0x143   :  { %5096 = vst [vmem:[#allocation44_spill] sm:$0xff] %v4078_v0  ;;  %5097 = vst [vmem:[#allocation45_spill] sm:$0xff] %v4081_v5 }
 0x145   :  { %v430_v58 = vpop.f32.mrb[20].mxu0  ;;  %v543_v9 = vpop.f32.mrb[20].mxu1 }
 0x146   :  { %v4084_v12 = vadd.f32 %v430_v58, %v3967_v31  ;;  %v432_v15 = vpop.f32.mrb[21].mxu0  ;;  %v4087_v13 = vadd.f32 %v543_v9, %v3959_v27  ;;  %v545_v17 = vpop.f32.mrb[21].mxu1 }
 0x147   :  { %v4090_v20 = vadd.f32 %v432_v15, %v3973_v43  ;;  %v434_v24 = vpop.f32.mrb[22].mxu0  ;;  %v4093_v22 = vadd.f32 %v545_v17, %v3965_v30  ;;  %v547_v0 = vpop.f32.mrb[22].mxu1 }
 0x148   :  { %5098 = vst [vmem:[#allocation46_spill] sm:$0xff] %v4084_v12  ;;  %5099 = vst [vmem:[#allocation47_spill] sm:$0xff] %v4087_v13  ;;  %v4096_v26 = vadd.f32 %v434_v24, %v3967_v31  ;;  %v436_v5 = vpop.f32.mrb[23].mxu0  ;;  %v4099_v58 = vadd.f32 %v547_v0, %v3959_v27  ;;  %v549_v12 = vpop.f32.mrb[23].mxu1 }
 0x149   :  { %5100 = vst [vmem:[#allocation48_spill] sm:$0xff] %v4090_v20  ;;  %5101 = vst [vmem:[#allocation49_spill] sm:$0xff] %v4093_v22  ;;  %v4102_v9 = vadd.f32 %v436_v5, %v3973_v43  ;;  %v4105_v13 = vadd.f32 %v549_v12, %v3965_v30 }
 0x14a   :  { %5102 = vst [vmem:[#allocation50_spill] sm:$0xff] %v4096_v26  ;;  %5103 = vst [vmem:[#allocation51_spill] sm:$0xff] %v4099_v58 }
 0x14b   :  { %5104 = vst [vmem:[#allocation52_spill] sm:$0xff] %v4102_v9  ;;  %5105 = vst [vmem:[#allocation53_spill] sm:$0xff] %v4105_v13 }
 0x14d   :  { %v440_v15 = vpop.f32.mrb[24].mxu0  ;;  %v553_v20 = vpop.f32.mrb[24].mxu1 }
 0x14e   :  { %v4108_v17 = vadd.f32 %v440_v15, %v3967_v31  ;;  %v442_v22 = vpop.f32.mrb[25].mxu0  ;;  %v4111_v24 = vadd.f32 %v553_v20, %v3959_v27  ;;  %v555_v26 = vpop.f32.mrb[25].mxu1 }
 0x14f   :  { %v4114_v0 = vadd.f32 %v442_v22, %v3973_v43  ;;  %v444_v58 = vpop.f32.mrb[26].mxu0  ;;  %v4117_v5 = vadd.f32 %v555_v26, %v3965_v30  ;;  %v557_v9 = vpop.f32.mrb[26].mxu1 }
 0x150   :  { %5106 = vst [vmem:[#allocation54_spill] sm:$0xff] %v4108_v17  ;;  %5107 = vst [vmem:[#allocation55_spill] sm:$0xff] %v4111_v24  ;;  %v4120_v12 = vadd.f32 %v444_v58, %v3967_v31  ;;  %v446_v13 = vpop.f32.mrb[27].mxu0  ;;  %v4123_v15 = vadd.f32 %v557_v9, %v3959_v27  ;;  %v559_v17 = vpop.f32.mrb[27].mxu1 }
 0x151   :  { %5108 = vst [vmem:[#allocation56_spill] sm:$0xff] %v4114_v0  ;;  %5109 = vst [vmem:[#allocation57_spill] sm:$0xff] %v4117_v5  ;;  %v4126_v20 = vadd.f32 %v446_v13, %v3973_v43  ;;  %v4129_v24 = vadd.f32 %v559_v17, %v3965_v30 }
 0x152   :  { %5110 = vst [vmem:[#allocation58_spill] sm:$0xff] %v4120_v12  ;;  %5111 = vst [vmem:[#allocation59_spill] sm:$0xff] %v4123_v15 }
 0x153   :  { %5112 = vst [vmem:[#allocation60_spill] sm:$0xff] %v4126_v20  ;;  %5113 = vst [vmem:[#allocation61_spill] sm:$0xff] %v4129_v24 }
 0x155   :  { %v450_v22 = vpop.f32.mrb[28].mxu0  ;;  %v563_v0 = vpop.f32.mrb[28].mxu1 }
 0x156   :  { %v4132_v26 = vadd.f32 %v450_v22, %v3967_v31  ;;  %v452_v5 = vpop.f32.mrb[29].mxu0  ;;  %v4135_v58 = vadd.f32 %v563_v0, %v3959_v27  ;;  %v565_v12 = vpop.f32.mrb[29].mxu1 }
 0x157   :  { %v4138_v9 = vadd.f32 %v452_v5, %v3973_v43  ;;  %v454_v15 = vpop.f32.mrb[30].mxu0  ;;  %v4141_v13 = vadd.f32 %v565_v12, %v3965_v30  ;;  %v567_v20 = vpop.f32.mrb[30].mxu1  ;;  %v381_v5 = vadd.f32 %v3961_v28, %v3967_v31  ;;  %v494_v12 = vadd.f32 %v3963_v29, %v3959_v27 }
 0x158   :  { %5114 = vst [vmem:[#allocation62_spill] sm:$0xff] %v4132_v26  ;;  %5115 = vst [vmem:[#allocation63_spill] sm:$0xff] %v4135_v58  ;;  %v4144_v17 = vadd.f32 %v454_v15, %v3967_v31  ;;  %v456_v24 = vpop.f32.mrb[31].mxu0  ;;  %v4147_v22 = vadd.f32 %v567_v20, %v3959_v27  ;;  %v569_v26 = vpop.f32.mrb[31].mxu1  ;;  %v383_v15 = vadd.f32 %v3969_v32, %v3973_v43 }
 0x159   :  { %5116 = vst [vmem:[#allocation64_spill] sm:$0xff] %v4138_v9  ;;  %5117 = vst [vmem:[#allocation65_spill] sm:$0xff] %v4141_v13  ;;  %v4150_v0 = vadd.f32 %v456_v24, %v3973_v43  ;;  %v4153_v58 = vadd.f32 %v569_v26, %v3965_v30  ;;  %v496_v20 = vadd.f32 %v3971_v35, %v3965_v30 }
 0x15a   :  { %5118 = vst [vmem:[#allocation66_spill] sm:$0xff] %v4144_v17  ;;  %5119 = vst [vmem:[#allocation67_spill] sm:$0xff] %v4147_v22 }
 0x15b   :  { %5120 = vst [vmem:[#allocation68_spill] sm:$0xff] %v4150_v0  ;;  %5121 = vst [vmem:[#allocation69_spill] sm:$0xff] %v4153_v58 }
 0x15d   :  { %v869_v22 = vpop.f32.mrb[32].mxu0  ;;  %v910_v17 = vpop.f32.mrb[32].mxu1 }
 0x15e   :  { %v917_v13 = vadd.f32 %v869_v22, %v381_v5  ;;  %v919_v24 = vadd.f32 %v910_v17, %v494_v12  ;;  %v871_v0 = vpop.f32.mrb[33].mxu0  ;;  %v912_v9 = vpop.f32.mrb[33].mxu1 }
 0x15f   :  { %v918_v26 = vadd.f32 %v871_v0, %v383_v15  ;;  %v920_v58 = vadd.f32 %v912_v9, %v496_v20  ;;  %v873_v52 = vpop.f32.mrb[34].mxu0  ;;  %v914_v25 = vpop.f32.mrb[34].mxu1 }
 0x160   :  { %v3048_v28 = vmul.f32 -1.442695, %v917_v13  ;;  %v874_v31 = vpop.f32.mrb[35].mxu0  ;;  %v915_v23 = vpop.f32.mrb[35].mxu1  ;;  %v66_v25 = vld [vmem:[%s5064_s6] sm:$0xff] }
 0x161   :  { %v3049_v27 = vmul.f32 -1.442695, %v918_v26  ;;  %v3050_v29 = vmul.f32 -1.442695, %v920_v58  ;;  %v950_v12 = vpop.permute.xlu0 %949 }
 0x162   :  { %3227 = vpow2.f32 %v3048_v28 }
 0x163   :  { %3229 = vpow2.f32 %v3049_v27 }
 0x164   :  { %3231 = vpow2.f32 %v3050_v29 }
 0x165   :  { %3233 = vtanh.f32 %v919_v24 }
 0x16c   :  { %v3228_v32 = vpop.eup %3227 }
 0x16d   :  { %v3230_v43 = vpop.eup %3229  ;;  %v924_v30 = vadd.f32 1.0, %v3228_v32 }
 0x16e   :  { %v930_v35 = vadd.f32 1.0, %v3230_v43  ;;  %v3232_v17 = vpop.eup %3231  ;;  %v5122_v43 = vmov 0  }
 0x16f   :  { %3235 = vrcp.f32 %v924_v30  ;;  %v3234_v22 = vpop.eup %3233  ;;  %v937_v9 = vadd.f32 1.0, %v3232_v17  ;;  %v3062_v30 = vld [vmem:[%s5059_s1 + $0x18] sm:$0xff] }
 0x170   :  { %3237 = vrcp.f32 %v930_v35  ;;  %v3070_v35 = vld [vmem:[%s5059_s1 + $0x28] sm:$0xff]  ;;  %v3094_v17 = vld [vmem:[%s5059_s1 + $0x58] sm:$0xff] }
 0x171   :  { %3239 = vrcp.f32 %v937_v9 }
 0x179   :  { %v3236_v52 = vpop.eup %3235 }
 0x17a   :  { %v3238_v23 = vpop.eup %3237  ;;  %v941_v13 = vmul.f32 %v3236_v52, %v3234_v22  ;;  %v3102_v22 = vld [vmem:[%s5059_s1 + $0x68] sm:$0xff] }
 0x17b   :  { %v940_v0 = vmul.f32 %v3238_v23, %v66_v25  ;;  %v3240_v24 = vpop.eup %3239 }
 0x17d   :  { %v942_v58 = vadd.f32 %v941_v13, %v940_v0 }
 0x17f   :  { %3241 = vtanh.f32 %v942_v58  ;;  %v954_v5 = vsub.f32 %v942_v58, %v66_v25 }
 0x181   :  { %v955_v15 = vmul.f32 %v954_v5, %v950_v12 }
 0x183   :  { %v4166_v20 = vadd.f32 %v955_v15, %v66_v25  ;;  %v3110_v25 = vld [vmem:[%s5059_s1 + $0x78] sm:$0xff] }
 0x189   :  { %v3242_v26 = vpop.eup %3241 }
 0x18a   :  { %v944_v28 = vmul.f32 %v3242_v26, %v3240_v24 }
 0x18c   :  { %v946_v31 = vsub.f32 %v944_v28, %v3918_v18 }
 0x18e   :  { %v952_v27 = vmul.f32 %v950_v12, %v946_v31 }
 0x190   :  { %v4170_v29 = vadd.f32 %v952_v27, %v3918_v18  ;;  %v3058_v18 = vld [vmem:[%s5059_s1 + $0x10] sm:$0xff] }
 0x191   :  { %1210 = vperm.xlu1 %3122, %v3058_v18  }
 0x192   :  { %v957_v32 = vpack.c.bf16 %v4170_v29, %v4170_v29 }
 0x194   :  { %958 = vst [vmem:[#allocation10] sm:$0xf] %v957_v32  ;;  %997 = vmatmul.mubr.bf16.vlgmr.msra.gmra.mrb[36].mxu0 %v957_v32  ;;  %1038 = vmatmul.mubr.bf16.vlgmr.msra.gmra.mrb[36].mxu1 %v957_v32 }
 0x195   :  { %1096 = vmatpush1.bf16.msra.mxu0 %v3760_v36  ;;  %1137 = vmatpush1.bf16.msra.mxu1 %v3766_v38 }
 0x196   :  { %1097 = vmatprep.subr.bf16.mxu0 %v3763_v37  ;;  %1138 = vmatprep.subr.bf16.mxu1 %v3768_v39 }
 0x197   :  { %1127 = vmatprep.mubr.bf16.mxu0 %v5122_v43  ;;  %1168 = vmatprep.mubr.bf16.mxu1 %v5122_v43 }
 0x198   :  { %1341 = vperm.xlu1 %3122, %v3062_v30  }
 0x199   :  { %1098 = vmatpush1.bf16.msra.mxu0 %v3772_v40  ;;  %1139 = vmatpush1.bf16.msra.mxu1 %v3779_v42 }
 0x19a   :  { %1099 = vmatprep.subr.bf16.mxu0 %v3776_v41  ;;  %1140 = vmatprep.subr.bf16.mxu1 %v3791_v46 }
 0x19c   :  { %1603 = vperm.xlu1 %3122, %v3070_v35  }
 0x19d   :  { %1100 = vmatpush1.bf16.msra.mxu0 %v3786_v44  ;;  %1141 = vmatpush1.bf16.msra.mxu1 %v3794_v47 }
 0x19e   :  { %1101 = vmatprep.subr.bf16.mxu0 %v3788_v45  ;;  %1142 = vmatprep.subr.bf16.mxu1 %v3796_v48 }
 0x1a1   :  { %1102 = vmatpush1.bf16.msra.mxu0 %v3801_v49  ;;  %1143 = vmatpush1.bf16.msra.mxu1 %v3808_v51 }
 0x1a2   :  { %1103 = vmatprep.subr.bf16.mxu0 %v3804_v50  ;;  %1144 = vmatprep.subr.bf16.mxu1 %v3817_v54 }
 0x1a5   :  { %1104 = vmatpush1.bf16.msra.mxu0 %v3814_v53  ;;  %1145 = vmatpush1.bf16.msra.mxu1 %v3823_v56 }
 0x1a6   :  { %1105 = vmatprep.subr.bf16.mxu0 %v3820_v55  ;;  %1146 = vmatprep.subr.bf16.mxu1 %v3825_v57 }
 0x1a9   :  { %1106 = vmatpush1.bf16.msra.mxu0 %v3833_v59  ;;  %1147 = vmatpush1.bf16.msra.mxu1 %v3840_v61 }
 0x1aa   :  { %1107 = vmatprep.subr.bf16.mxu0 %v3837_v60  ;;  %1148 = vmatprep.subr.bf16.mxu1 %v3849_v1 }
 0x1ad   :  { %1108 = vmatpush1.bf16.msra.mxu0 %v3847_v63  ;;  %1149 = vmatpush1.bf16.msra.mxu1 %v3855_v3 }
 0x1ae   :  { %1109 = vmatprep.subr.bf16.mxu0 %v3853_v2  ;;  %1150 = vmatprep.subr.bf16.mxu1 %v3857_v4 }
 0x1b1   :  { %1110 = vmatpush1.bf16.msra.mxu0 %v3866_v6  ;;  %1151 = vmatpush1.bf16.msra.mxu1 %v3870_v7 }
 0x1b2   :  { %1226 = vmatprep.subr.bf16.mxu0 %v3753_v33  ;;  %1267 = vmatprep.subr.bf16.mxu1 %v3755_v34  ;;  %v3078_v33 = vld [vmem:[%s5059_s1 + $0x38] sm:$0xff]  ;;  %v3086_v34 = vld [vmem:[%s5059_s1 + $0x48] sm:$0xff]  ;;  %s3670_s1 = smov [#allocation11]  }
 0x1b3   :  { %1865 = vperm.xlu1 %3122, %v3078_v33   ;;  %s2949_s16 = sshll.u32 %s3670_s1, 4  ;;  %s2950_s16 = int_to_ptr.vmem [resolvable:$true] %s2949_s16 }
 0x1b4   :  { %s3591_s21 = scalar_lea.vmem %s2950_s16, 128  ;;  %p3596_p3 = scmp.lt.s32.totalorder %s2950_s16, %s2950_s16 }
 0x1b5   :  { %p3592_p2 = scmp.ne.s32.totalorder %s2950_s16, %s3591_s21  ;;  %p3597_p4 = scmp.lt.s32.totalorder %s3591_s21, %s3591_s21 }
 0x1b7   :  { %2127 = vperm.xlu1 %3122, %v3086_v34   ;;  %p3598_p5 = por %p3597_p4, %p3596_p3 }
 0x1b9   :  { %p3599_p6 = pnand %p3598_p5, %p3592_p2 }
 0x1bb   :  { %2389 = vperm.xlu1 %3122, %v3094_v17  }
 0x1bf   :  { %2651 = vperm.xlu1 %3122, %v3102_v22  }
 0x1c3   :  { %2913 = vperm.xlu1 %3122, %v3110_v25  }
 0x267   :  { %v998_v52 = vpop.f32.mrb[36].mxu0  ;;  %v1039_v23 = vpop.f32.mrb[36].mxu1 }
 0x268   :  { %v1046_v9 = vadd.f32 %v998_v52, %v3976_v62  ;;  %v1048_v13 = vadd.f32 %v1039_v23, %v3979_v8  ;;  %v1000_v0 = vpop.f32.mrb[37].mxu0  ;;  %v1041_v58 = vpop.f32.mrb[37].mxu1 }
 0x269   :  { %v1047_v5 = vadd.f32 %v1000_v0, %v3982_v10  ;;  %v1049_v12 = vadd.f32 %v1041_v58, %v3985_v11  ;;  %v1002_v15 = vpop.f32.mrb[38].mxu0  ;;  %v1043_v24 = vpop.f32.mrb[38].mxu1 }
 0x26a   :  { %v3051_v26 = vmul.f32 -1.442695, %v1046_v9  ;;  %v1003_v28 = vpop.f32.mrb[39].mxu0  ;;  %v1044_v31 = vpop.f32.mrb[39].mxu1 }
 0x26b   :  { %v3052_v27 = vmul.f32 -1.442695, %v1047_v5  ;;  %v3053_v32 = vmul.f32 -1.442695, %v1049_v12  ;;  %v1080_v23 = vpop.permute.xlu0 %1079 }
 0x26c   :  { %3243 = vpow2.f32 %v3051_v26 }
 0x26d   :  { %3245 = vpow2.f32 %v3052_v27 }
 0x26e   :  { %3247 = vpow2.f32 %v3053_v32 }
 0x26f   :  { %3249 = vtanh.f32 %v1048_v13 }
 0x276   :  { %v3244_v18 = vpop.eup %3243 }
 0x277   :  { %v3246_v30 = vpop.eup %3245  ;;  %v1053_v62 = vadd.f32 1.0, %v3244_v18 }
 0x278   :  { %v1059_v8 = vadd.f32 1.0, %v3246_v30  ;;  %v3248_v10 = vpop.eup %3247 }
 0x279   :  { %3251 = vrcp.f32 %v1053_v62  ;;  %v3250_v35 = vpop.eup %3249  ;;  %v1066_v17 = vadd.f32 1.0, %v3248_v10 }
 0x27a   :  { %3253 = vrcp.f32 %v1059_v8 }
 0x27b   :  { %3255 = vrcp.f32 %v1066_v17 }
 0x283   :  { %v3252_v11 = vpop.eup %3251 }
 0x284   :  { %v3254_v33 = vpop.eup %3253  ;;  %v1070_v34 = vmul.f32 %v3252_v11, %v3250_v35  ;;  %v1211_v35 = vpop.permute.xlu1 %1210 }
 0x285   :  { %v1069_v22 = vmul.f32 %v3254_v33, %v4166_v20  ;;  %v3256_v0 = vpop.eup %3255 }
 0x287   :  { %v1071_v25 = vadd.f32 %v1070_v34, %v1069_v22 }
 0x289   :  { %3257 = vtanh.f32 %v1071_v25  ;;  %v1084_v52 = vsub.f32 %v1071_v25, %v4166_v20 }
 0x28b   :  { %v1085_v9 = vmul.f32 %v1084_v52, %v1080_v23 }
 0x28d   :  { %v4239_v13 = vadd.f32 %v1085_v9, %v4166_v20 }
 0x293   :  { %v3258_v58 = vpop.eup %3257 }
 0x294   :  { %v1073_v5 = vmul.f32 %v3258_v58, %v3256_v0  ;;  %v4300_v0 = vld [vmem:[#allocation8] ss:$16 sps:$4 sm:$0xff]   ;;  %v4306_v58 = vld [vmem:[#allocation8 + $0x24] ss:$16 sps:$4 sm:$0xff]  }
 0x296   :  { %v1076_v12 = vsub.f32 %v1073_v5, %v4170_v29  ;;  %v4309_v5 = vld [vmem:[#allocation8 + $0x2c] ss:$16 sps:$4 sm:$0xff]  }
 0x298   :  { %v1082_v15 = vmul.f32 %v1080_v23, %v1076_v12  ;;  %v4314_v12 = vld [vmem:[#allocation8 + $0x20] ss:$16 sps:$4 sm:$0xff]  }
 0x29a   :  { %v4243_v24 = vadd.f32 %v1082_v15, %v4170_v29  ;;  %v4317_v15 = vld [vmem:[#allocation8 + $0x28] ss:$16 sps:$4 sm:$0xff]  }
 0x29c   :  { %v1087_v26 = vpack.c.bf16 %v4243_v24, %v4243_v24 }
 0x29e   :  { %1089 = vst [vmem:[#allocation10 + $0x4] sm:$0xf] %v1087_v26  ;;  %1128 = vmatmul.mubr.bf16.vlgmr.msra.gmra.mrb[40].mxu0 %v1087_v26  ;;  %1169 = vmatmul.mubr.bf16.vlgmr.msra.gmra.mrb[40].mxu1 %v1087_v26  ;;  %v4323_v26 = vld [vmem:[#allocation8 + $0x4c] ss:$16 sps:$4 sm:$0xff]  }
 0x29f   :  { %1227 = vmatpush1.bf16.msra.mxu0 %v3760_v36  ;;  %1268 = vmatpush1.bf16.msra.mxu1 %v3766_v38  ;;  %v4279_v36 = vld [vmem:[#allocation8 + $0x4] ss:$16 sps:$4 sm:$0xff]  }
 0x2a0   :  { %1228 = vmatprep.subr.bf16.mxu0 %v3763_v37  ;;  %1269 = vmatprep.subr.bf16.mxu1 %v3768_v39  ;;  %v4282_v37 = vld [vmem:[#allocation8 + $0xc] ss:$16 sps:$4 sm:$0xff]  }
 0x2a1   :  { %1258 = vmatprep.mubr.bf16.mxu0 %v5122_v43  ;;  %1299 = vmatprep.mubr.bf16.mxu1 %v5122_v43 }
 0x2a3   :  { %1229 = vmatpush1.bf16.msra.mxu0 %v3772_v40  ;;  %1270 = vmatpush1.bf16.msra.mxu1 %v3779_v42 }
 0x2a4   :  { %1230 = vmatprep.subr.bf16.mxu0 %v3776_v41  ;;  %1271 = vmatprep.subr.bf16.mxu1 %v3791_v46 }
 0x2a7   :  { %1231 = vmatpush1.bf16.msra.mxu0 %v3786_v44  ;;  %1272 = vmatpush1.bf16.msra.mxu1 %v3794_v47 }
 0x2a8   :  { %1232 = vmatprep.subr.bf16.mxu0 %v3788_v45  ;;  %1273 = vmatprep.subr.bf16.mxu1 %v3796_v48 }
 0x2ab   :  { %1233 = vmatpush1.bf16.msra.mxu0 %v3801_v49  ;;  %1274 = vmatpush1.bf16.msra.mxu1 %v3808_v51 }
 0x2ac   :  { %1234 = vmatprep.subr.bf16.mxu0 %v3804_v50  ;;  %1275 = vmatprep.subr.bf16.mxu1 %v3817_v54 }
 0x2af   :  { %1235 = vmatpush1.bf16.msra.mxu0 %v3814_v53  ;;  %1276 = vmatpush1.bf16.msra.mxu1 %v3823_v56 }
 0x2b0   :  { %1236 = vmatprep.subr.bf16.mxu0 %v3820_v55  ;;  %1277 = vmatprep.subr.bf16.mxu1 %v3825_v57 }
 0x2b3   :  { %1237 = vmatpush1.bf16.msra.mxu0 %v3833_v59  ;;  %1278 = vmatpush1.bf16.msra.mxu1 %v3840_v61 }
 0x2b4   :  { %1238 = vmatprep.subr.bf16.mxu0 %v3837_v60  ;;  %1279 = vmatprep.subr.bf16.mxu1 %v3849_v1 }
 0x2b7   :  { %1239 = vmatpush1.bf16.msra.mxu0 %v3847_v63  ;;  %1280 = vmatpush1.bf16.msra.mxu1 %v3855_v3 }
 0x2b8   :  { %1240 = vmatprep.subr.bf16.mxu0 %v3853_v2  ;;  %1281 = vmatprep.subr.bf16.mxu1 %v3857_v4 }
 0x2bb   :  { %1241 = vmatpush1.bf16.msra.mxu0 %v3866_v6  ;;  %1282 = vmatpush1.bf16.msra.mxu1 %v3870_v7 }
 0x2bc   :  { %1357 = vmatprep.subr.bf16.mxu0 %v4279_v36  ;;  %1398 = vmatprep.subr.bf16.mxu1 %v4282_v37 }
 0x371   :  { %v1129_v38 = vpop.f32.mrb[40].mxu0  ;;  %v1170_v39 = vpop.f32.mrb[40].mxu1 }
 0x372   :  { %v1177_v40 = vadd.f32 %v1129_v38, %v3988_v14  ;;  %v1179_v41 = vadd.f32 %v1170_v39, %v3991_v16  ;;  %v1131_v42 = vpop.f32.mrb[41].mxu0  ;;  %v1172_v44 = vpop.f32.mrb[41].mxu1  ;;  %v4326_v38 = vld [vmem:[#allocation8 + $0x40] ss:$16 sps:$4 sm:$0xff]   ;;  %v4329_v39 = vld [vmem:[#allocation8 + $0x48] ss:$16 sps:$4 sm:$0xff]  }
 0x373   :  { %v1178_v45 = vadd.f32 %v1131_v42, %v3994_v19  ;;  %v1180_v46 = vadd.f32 %v1172_v44, %v3997_v21  ;;  %v1133_v47 = vpop.f32.mrb[42].mxu0  ;;  %v1174_v48 = vpop.f32.mrb[42].mxu1  ;;  %v4338_v42 = vld [vmem:[#allocation8 + $0x60] ss:$16 sps:$4 sm:$0xff]   ;;  %v4341_v44 = vld [vmem:[#allocation8 + $0x68] ss:$16 sps:$4 sm:$0xff]  }
 0x374   :  { %v3055_v49 = vmul.f32 -1.442695, %v1177_v40  ;;  %v1134_v50 = vpop.f32.mrb[43].mxu0  ;;  %v1175_v51 = vpop.f32.mrb[43].mxu1  ;;  %v4332_v40 = vld [vmem:[#allocation8 + $0x64] ss:$16 sps:$4 sm:$0xff]  }
 0x375   :  { %v3056_v20 = vmul.f32 -1.442695, %v1178_v45  ;;  %v3057_v29 = vmul.f32 -1.442695, %v1180_v46  ;;  %v4344_v45 = vld [vmem:[#allocation8 + $0x84] ss:$16 sps:$4 sm:$0xff]  }
 0x376   :  { %3259 = vpow2.f32 %v3055_v49 }
 0x377   :  { %3261 = vpow2.f32 %v3056_v20 }
 0x378   :  { %3263 = vpow2.f32 %v3057_v29 }
 0x379   :  { %3265 = vtanh.f32 %v1179_v41  ;;  %v4335_v41 = vld [vmem:[#allocation8 + $0x6c] ss:$16 sps:$4 sm:$0xff]  }
 0x380   :  { %v3260_v28 = vpop.eup %3259 }
 0x381   :  { %v3262_v31 = vpop.eup %3261  ;;  %v1184_v14 = vadd.f32 1.0, %v3260_v28 }
 0x382   :  { %v1190_v16 = vadd.f32 1.0, %v3262_v31  ;;  %v3264_v19 = vpop.eup %3263 }
 0x383   :  { %3267 = vrcp.f32 %v1184_v14  ;;  %v3266_v27 = vpop.eup %3265  ;;  %v1197_v18 = vadd.f32 1.0, %v3264_v19 }
 0x384   :  { %3269 = vrcp.f32 %v1190_v16 }
 0x385   :  { %3271 = vrcp.f32 %v1197_v18 }
 0x38d   :  { %v3268_v21 = vpop.eup %3267 }
 0x38e   :  { %v3270_v32 = vpop.eup %3269  ;;  %v1201_v30 = vmul.f32 %v3268_v21, %v3266_v27 }
 0x38f   :  { %v1200_v62 = vmul.f32 %v3270_v32, %v4239_v13  ;;  %v3272_v34 = vpop.eup %3271 }
 0x391   :  { %v1202_v8 = vadd.f32 %v1201_v30, %v1200_v62  ;;  %v1342_v30 = vpop.permute.xlu1 %1341 }
 0x393   :  { %3273 = vtanh.f32 %v1202_v8  ;;  %v1215_v10 = vsub.f32 %v1202_v8, %v4239_v13 }
 0x395   :  { %v1216_v11 = vmul.f32 %v1215_v10, %v1211_v35 }
 0x397   :  { %v4292_v33 = vadd.f32 %v1216_v11, %v4239_v13  ;;  %v4303_v13 = vld [vmem:[#allocation8 + $0x8] ss:$16 sps:$4 sm:$0xff]  }
 0x39d   :  { %v3274_v17 = vpop.eup %3273 }
 0x39e   :  { %v1204_v22 = vmul.f32 %v3274_v17, %v3272_v34 }
 0x3a0   :  { %v1207_v25 = vsub.f32 %v1204_v22, %v4243_v24 }
 0x3a2   :  { %v1213_v52 = vmul.f32 %v1211_v35, %v1207_v25 }
 0x3a4   :  { %v4296_v23 = vadd.f32 %v1213_v52, %v4243_v24  ;;  %v4320_v24 = vld [vmem:[#allocation8 + $0x44] ss:$16 sps:$4 sm:$0xff]   ;;  %v4399_v52 = vld [vmem:[#allocation8 + $0x80] ss:$16 sps:$4 sm:$0xff]  }
 0x3a6   :  { %v1218_v9 = vpack.c.bf16 %v4296_v23, %v4296_v23 }
 0x3a8   :  { %1220 = vst [vmem:[#allocation10 + $0x8] sm:$0xf] %v1218_v9  ;;  %1259 = vmatmul.mubr.bf16.vlgmr.msra.gmra.mrb[44].mxu0 %v1218_v9  ;;  %1300 = vmatmul.mubr.bf16.vlgmr.msra.gmra.mrb[44].mxu1 %v1218_v9  ;;  %v4405_v9 = vld [vmem:[#allocation8 + $0xa4] ss:$16 sps:$4 sm:$0xff]  }
 0x3a9   :  { %1358 = vmatpush1.bf16.msra.mxu0 %v4300_v0  ;;  %1399 = vmatpush1.bf16.msra.mxu1 %v4303_v13 }
 0x3aa   :  { %1359 = vmatprep.subr.bf16.mxu0 %v4306_v58  ;;  %1400 = vmatprep.subr.bf16.mxu1 %v4309_v5 }
 0x3ab   :  { %1389 = vmatprep.mubr.bf16.mxu0 %v5122_v43  ;;  %1430 = vmatprep.mubr.bf16.mxu1 %v5122_v43 }
 0x3ad   :  { %1360 = vmatpush1.bf16.msra.mxu0 %v4314_v12  ;;  %1401 = vmatpush1.bf16.msra.mxu1 %v4317_v15 }
 0x3ae   :  { %1361 = vmatprep.subr.bf16.mxu0 %v4320_v24  ;;  %1402 = vmatprep.subr.bf16.mxu1 %v4323_v26 }
 0x3b1   :  { %1362 = vmatpush1.bf16.msra.mxu0 %v4326_v38  ;;  %1403 = vmatpush1.bf16.msra.mxu1 %v4329_v39 }
 0x3b2   :  { %1363 = vmatprep.subr.bf16.mxu0 %v4332_v40  ;;  %1404 = vmatprep.subr.bf16.mxu1 %v4335_v41 }
 0x3b5   :  { %1364 = vmatpush1.bf16.msra.mxu0 %v4338_v42  ;;  %1405 = vmatpush1.bf16.msra.mxu1 %v4341_v44 }
 0x3b6   :  { %1365 = vmatprep.subr.bf16.mxu0 %v4344_v45  ;;  %1406 = vmatprep.subr.bf16.mxu1 %v3817_v54 }
 0x3b9   :  { %1366 = vmatpush1.bf16.msra.mxu0 %v3814_v53  ;;  %1407 = vmatpush1.bf16.msra.mxu1 %v3823_v56 }
 0x3ba   :  { %1367 = vmatprep.subr.bf16.mxu0 %v3820_v55  ;;  %1408 = vmatprep.subr.bf16.mxu1 %v3825_v57  ;;  %v5123_v55 = vld [vmem:[#allocation18_spill] sm:$0xff]  ;;  %v5124_v57 = vld [vmem:[#allocation19_spill] sm:$0xff] }
 0x3bd   :  { %1368 = vmatpush1.bf16.msra.mxu0 %v3833_v59  ;;  %1409 = vmatpush1.bf16.msra.mxu1 %v3840_v61 }
 0x3be   :  { %1369 = vmatprep.subr.bf16.mxu0 %v3837_v60  ;;  %1410 = vmatprep.subr.bf16.mxu1 %v3849_v1 }
 0x3c1   :  { %1370 = vmatpush1.bf16.msra.mxu0 %v3847_v63  ;;  %1411 = vmatpush1.bf16.msra.mxu1 %v3855_v3  ;;  %v5125_v63 = vld [vmem:[#allocation20_spill] sm:$0xff] }
 0x3c2   :  { %1371 = vmatprep.subr.bf16.mxu0 %v3853_v2  ;;  %1412 = vmatprep.subr.bf16.mxu1 %v3857_v4  ;;  %v5126_v2 = vld [vmem:[#allocation21_spill] sm:$0xff] }
 0x3c5   :  { %1372 = vmatpush1.bf16.msra.mxu0 %v3866_v6  ;;  %1413 = vmatpush1.bf16.msra.mxu1 %v3870_v7 }
 0x3c6   :  { %1488 = vmatprep.subr.bf16.mxu0 %v4279_v36  ;;  %1529 = vmatprep.subr.bf16.mxu1 %v4282_v37 }
 0x47b   :  { %v1260_v53 = vpop.f32.mrb[44].mxu0  ;;  %v1301_v54 = vpop.f32.mrb[44].mxu1 }
 0x47c   :  { %v1308_v56 = vadd.f32 %v1260_v53, %v5123_v55  ;;  %v1310_v59 = vadd.f32 %v1301_v54, %v5124_v57  ;;  %v1262_v60 = vpop.f32.mrb[45].mxu0  ;;  %v1303_v61 = vpop.f32.mrb[45].mxu1  ;;  %v4408_v53 = vld [vmem:[#allocation8 + $0xac] ss:$16 sps:$4 sm:$0xff]   ;;  %v4411_v54 = vld [vmem:[#allocation8 + $0xa0] ss:$16 sps:$4 sm:$0xff]  }
 0x47d   :  { %v1309_v1 = vadd.f32 %v1262_v60, %v5125_v63  ;;  %v1311_v3 = vadd.f32 %v1303_v61, %v5126_v2  ;;  %v1264_v4 = vpop.f32.mrb[46].mxu0  ;;  %v1305_v6 = vpop.f32.mrb[46].mxu1  ;;  %v4414_v55 = vld [vmem:[#allocation8 + $0xa8] ss:$16 sps:$4 sm:$0xff]   ;;  %v4420_v57 = vld [vmem:[#allocation8 + $0xcc] ss:$16 sps:$4 sm:$0xff]  }
 0x47e   :  { %v3059_v46 = vmul.f32 -1.442695, %v1308_v56  ;;  %v1265_v7 = vpop.f32.mrb[47].mxu0  ;;  %v1306_v47 = vpop.f32.mrb[47].mxu1  ;;  %v4417_v56 = vld [vmem:[#allocation8 + $0xc4] ss:$16 sps:$4 sm:$0xff]  }
 0x47f   :  { %v3060_v48 = vmul.f32 -1.442695, %v1309_v1  ;;  %v3061_v49 = vmul.f32 -1.442695, %v1311_v3  ;;  %v4426_v60 = vld [vmem:[#allocation8 + $0xc8] ss:$16 sps:$4 sm:$0xff]  }
 0x480   :  { %3275 = vpow2.f32 %v3059_v46  ;;  %v4429_v61 = vld [vmem:[#allocation8 + $0xe4] ss:$16 sps:$4 sm:$0xff]   ;;  %v4432_v63 = vld [vmem:[#allocation8 + $0xec] ss:$16 sps:$4 sm:$0xff]   ;;  %v4435_v1 = vld [vmem:[#allocation8 + $0xe0] ss:$16 sps:$4 sm:$0xff]  }
 0x481   :  { %3277 = vpow2.f32 %v3060_v48  ;;  %v4438_v2 = vld [vmem:[#allocation8 + $0xe8] ss:$16 sps:$4 sm:$0xff]   ;;  %v5127_v6 = vld [vmem:[#allocation22_spill] sm:$0xff] }
 0x482   :  { %3279 = vpow2.f32 %v3061_v49  ;;  %v5128_v7 = vld [vmem:[#allocation23_spill] sm:$0xff] }
 0x483   :  { %3281 = vtanh.f32 %v1310_v59  ;;  %v4423_v59 = vld [vmem:[#allocation8 + $0xc0] ss:$16 sps:$4 sm:$0xff]  }
 0x48a   :  { %v3276_v50 = vpop.eup %3275 }
 0x48b   :  { %v3278_v51 = vpop.eup %3277  ;;  %v1315_v20 = vadd.f32 1.0, %v3276_v50  ;;  %v5129_v50 = vld [vmem:[#allocation24_spill] sm:$0xff] }
 0x48c   :  { %v1321_v29 = vadd.f32 1.0, %v3278_v51  ;;  %v3280_v28 = vpop.eup %3279 }
 0x48d   :  { %3283 = vrcp.f32 %v1315_v20  ;;  %v3282_v31 = vpop.eup %3281  ;;  %v1328_v27 = vadd.f32 1.0, %v3280_v28  ;;  %v5130_v20 = vld [vmem:[#allocation25_spill] sm:$0xff] }
 0x48e   :  { %3285 = vrcp.f32 %v1321_v29 }
 0x48f   :  { %3287 = vrcp.f32 %v1328_v27 }
 0x497   :  { %v3284_v14 = vpop.eup %3283 }
 0x498   :  { %v3286_v16 = vpop.eup %3285  ;;  %v1332_v19 = vmul.f32 %v3284_v14, %v3282_v31 }
 0x499   :  { %v1331_v21 = vmul.f32 %v3286_v16, %v4292_v33  ;;  %v3288_v10 = vpop.eup %3287 }
 0x49b   :  { %v1333_v32 = vadd.f32 %v1332_v19, %v1331_v21 }
 0x49d   :  { %3289 = vtanh.f32 %v1333_v32  ;;  %v1346_v18 = vsub.f32 %v1333_v32, %v4292_v33 }
 0x49f   :  { %v1347_v62 = vmul.f32 %v1346_v18, %v1342_v30 }
 0x4a1   :  { %v4371_v8 = vadd.f32 %v1347_v62, %v4292_v33  ;;  %v4396_v33 = vld [vmem:[#allocation8 + $0x8c] ss:$16 sps:$4 sm:$0xff]  }
 0x4a7   :  { %v3290_v35 = vpop.eup %3289 }
 0x4a8   :  { %v1335_v11 = vmul.f32 %v3290_v35, %v3288_v10 }
 0x4aa   :  { %v1338_v34 = vsub.f32 %v1335_v11, %v4296_v23 }
 0x4ac   :  { %v1344_v17 = vmul.f32 %v1342_v30, %v1338_v34 }
 0x4ae   :  { %v4375_v22 = vadd.f32 %v1344_v17, %v4296_v23  ;;  %v4402_v23 = vld [vmem:[#allocation8 + $0x88] ss:$16 sps:$4 sm:$0xff]  }
 0x4b0   :  { %v1349_v25 = vpack.c.bf16 %v4375_v22, %v4375_v22 }
 0x4b2   :  { %1351 = vst [vmem:[#allocation10 + $0xc] sm:$0xf] %v1349_v25  ;;  %1390 = vmatmul.mubr.bf16.vlgmr.msra.gmra.mrb[48].mxu0 %v1349_v25  ;;  %1431 = vmatmul.mubr.bf16.vlgmr.msra.gmra.mrb[48].mxu1 %v1349_v25 }
 0x4b3   :  { %1489 = vmatpush1.bf16.msra.mxu0 %v4300_v0  ;;  %1530 = vmatpush1.bf16.msra.mxu1 %v4303_v13 }
 0x4b4   :  { %1490 = vmatprep.subr.bf16.mxu0 %v4306_v58  ;;  %1531 = vmatprep.subr.bf16.mxu1 %v4309_v5 }
 0x4b5   :  { %1520 = vmatprep.mubr.bf16.mxu0 %v5122_v43  ;;  %1561 = vmatprep.mubr.bf16.mxu1 %v5122_v43 }
 0x4b7   :  { %1491 = vmatpush1.bf16.msra.mxu0 %v4314_v12  ;;  %1532 = vmatpush1.bf16.msra.mxu1 %v4317_v15 }
 0x4b8   :  { %1492 = vmatprep.subr.bf16.mxu0 %v4320_v24  ;;  %1533 = vmatprep.subr.bf16.mxu1 %v4323_v26 }
 0x4bb   :  { %1493 = vmatpush1.bf16.msra.mxu0 %v4326_v38  ;;  %1534 = vmatpush1.bf16.msra.mxu1 %v4329_v39 }
 0x4bc   :  { %1494 = vmatprep.subr.bf16.mxu0 %v4332_v40  ;;  %1535 = vmatprep.subr.bf16.mxu1 %v4335_v41 }
 0x4bf   :  { %1495 = vmatpush1.bf16.msra.mxu0 %v4338_v42  ;;  %1536 = vmatpush1.bf16.msra.mxu1 %v4341_v44 }
 0x4c0   :  { %1496 = vmatprep.subr.bf16.mxu0 %v4344_v45  ;;  %1537 = vmatprep.subr.bf16.mxu1 %v4396_v33 }
 0x4c3   :  { %1497 = vmatpush1.bf16.msra.mxu0 %v4399_v52  ;;  %1538 = vmatpush1.bf16.msra.mxu1 %v4402_v23 }
 0x4c4   :  { %1498 = vmatprep.subr.bf16.mxu0 %v4405_v9  ;;  %1539 = vmatprep.subr.bf16.mxu1 %v4408_v53 }
 0x4c7   :  { %1499 = vmatpush1.bf16.msra.mxu0 %v4411_v54  ;;  %1540 = vmatpush1.bf16.msra.mxu1 %v4414_v55 }
 0x4c8   :  { %1500 = vmatprep.subr.bf16.mxu0 %v4417_v56  ;;  %1541 = vmatprep.subr.bf16.mxu1 %v4420_v57 }
 0x4cb   :  { %1501 = vmatpush1.bf16.msra.mxu0 %v4423_v59  ;;  %1542 = vmatpush1.bf16.msra.mxu1 %v4426_v60 }
 0x4cc   :  { %1502 = vmatprep.subr.bf16.mxu0 %v4429_v61  ;;  %1543 = vmatprep.subr.bf16.mxu1 %v4432_v63 }
 0x4cf   :  { %1503 = vmatpush1.bf16.msra.mxu0 %v4435_v1  ;;  %1544 = vmatpush1.bf16.msra.mxu1 %v4438_v2 }
 0x4d0   :  { %1619 = vmatprep.subr.bf16.mxu0 %v4279_v36  ;;  %1660 = vmatprep.subr.bf16.mxu1 %v4282_v37 }
 0x585   :  { %v1391_v3 = vpop.f32.mrb[48].mxu0  ;;  %v1432_v4 = vpop.f32.mrb[48].mxu1 }
 0x586   :  { %v1439_v46 = vadd.f32 %v1391_v3, %v5127_v6  ;;  %v1441_v47 = vadd.f32 %v1432_v4, %v5128_v7  ;;  %v1393_v48 = vpop.f32.mrb[49].mxu0  ;;  %v1434_v49 = vpop.f32.mrb[49].mxu1 }
 0x587   :  { %v1440_v51 = vadd.f32 %v1393_v48, %v5129_v50  ;;  %v1442_v29 = vadd.f32 %v1434_v49, %v5130_v20  ;;  %v1395_v28 = vpop.f32.mrb[50].mxu0  ;;  %v1436_v31 = vpop.f32.mrb[50].mxu1 }
 0x588   :  { %v3063_v14 = vmul.f32 -1.442695, %v1439_v46  ;;  %v1396_v16 = vpop.f32.mrb[51].mxu0  ;;  %v1437_v19 = vpop.f32.mrb[51].mxu1  ;;  %v5131_v31 = vld [vmem:[#allocation26_spill] sm:$0xff] }
 0x589   :  { %v3064_v27 = vmul.f32 -1.442695, %v1440_v51  ;;  %v3065_v21 = vmul.f32 -1.442695, %v1442_v29  ;;  %v1473_v46 = vpop.permute.xlu0 %1472  ;;  %v5132_v16 = vld [vmem:[#allocation27_spill] sm:$0xff] }
 0x58a   :  { %3291 = vpow2.f32 %v3063_v14 }
 0x58b   :  { %3293 = vpow2.f32 %v3064_v27 }
 0x58c   :  { %3295 = vpow2.f32 %v3065_v21 }
 0x58d   :  { %3297 = vtanh.f32 %v1441_v47 }
 0x594   :  { %v3292_v32 = vpop.eup %3291 }
 0x595   :  { %v3294_v18 = vpop.eup %3293  ;;  %v1446_v30 = vadd.f32 1.0, %v3292_v32  ;;  %v5133_v32 = vld [vmem:[#allocation28_spill] sm:$0xff] }
 0x596   :  { %v1452_v62 = vadd.f32 1.0, %v3294_v18  ;;  %v3296_v10 = vpop.eup %3295 }
 0x597   :  { %3299 = vrcp.f32 %v1446_v30  ;;  %v3298_v35 = vpop.eup %3297  ;;  %v1459_v25 = vadd.f32 1.0, %v3296_v10  ;;  %v5134_v30 = vld [vmem:[#allocation29_spill] sm:$0xff] }
 0x598   :  { %3301 = vrcp.f32 %v1452_v62 }
 0x599   :  { %3303 = vrcp.f32 %v1459_v25 }
 0x5a1   :  { %v3300_v11 = vpop.eup %3299 }
 0x5a2   :  { %v3302_v34 = vpop.eup %3301  ;;  %v1463_v17 = vmul.f32 %v3300_v11, %v3298_v35 }
 0x5a3   :  { %v1462_v3 = vmul.f32 %v3302_v34, %v4371_v8  ;;  %v3304_v48 = vpop.eup %3303 }
 0x5a5   :  { %v1464_v4 = vadd.f32 %v1463_v17, %v1462_v3 }
 0x5a7   :  { %3305 = vtanh.f32 %v1464_v4  ;;  %v1477_v6 = vsub.f32 %v1464_v4, %v4371_v8 }
 0x5a9   :  { %v1478_v7 = vmul.f32 %v1477_v6, %v1473_v46 }
 0x5ab   :  { %v4450_v47 = vadd.f32 %v1478_v7, %v4371_v8 }
 0x5b1   :  { %v3306_v49 = vpop.eup %3305 }
 0x5b2   :  { %v1466_v50 = vmul.f32 %v3306_v49, %v3304_v48 }
 0x5b4   :  { %v1469_v51 = vsub.f32 %v1466_v50, %v4375_v22 }
 0x5b6   :  { %v1475_v20 = vmul.f32 %v1473_v46, %v1469_v51 }
 0x5b8   :  { %v4454_v29 = vadd.f32 %v1475_v20, %v4375_v22 }
 0x5ba   :  { %v1480_v28 = vpack.c.bf16 %v4454_v29, %v4454_v29 }
 0x5bc   :  { %1482 = vst [vmem:[#allocation10 + $0x10] sm:$0xf] %v1480_v28  ;;  %1521 = vmatmul.mubr.bf16.vlgmr.msra.gmra.mrb[52].mxu0 %v1480_v28  ;;  %1562 = vmatmul.mubr.bf16.vlgmr.msra.gmra.mrb[52].mxu1 %v1480_v28 }
 0x5bd   :  { %1620 = vmatpush1.bf16.msra.mxu0 %v4300_v0  ;;  %1661 = vmatpush1.bf16.msra.mxu1 %v4303_v13 }
 0x5be   :  { %1621 = vmatprep.subr.bf16.mxu0 %v4306_v58  ;;  %1662 = vmatprep.subr.bf16.mxu1 %v4309_v5 }
 0x5bf   :  { %1651 = vmatprep.mubr.bf16.mxu0 %v5122_v43  ;;  %1692 = vmatprep.mubr.bf16.mxu1 %v5122_v43 }
 0x5c1   :  { %1622 = vmatpush1.bf16.msra.mxu0 %v4314_v12  ;;  %1663 = vmatpush1.bf16.msra.mxu1 %v4317_v15 }
 0x5c2   :  { %1623 = vmatprep.subr.bf16.mxu0 %v4320_v24  ;;  %1664 = vmatprep.subr.bf16.mxu1 %v4323_v26 }
 0x5c5   :  { %1624 = vmatpush1.bf16.msra.mxu0 %v4326_v38  ;;  %1665 = vmatpush1.bf16.msra.mxu1 %v4329_v39 }
 0x5c6   :  { %1625 = vmatprep.subr.bf16.mxu0 %v4332_v40  ;;  %1666 = vmatprep.subr.bf16.mxu1 %v4335_v41 }
 0x5c9   :  { %1626 = vmatpush1.bf16.msra.mxu0 %v4338_v42  ;;  %1667 = vmatpush1.bf16.msra.mxu1 %v4341_v44 }
 0x5ca   :  { %1627 = vmatprep.subr.bf16.mxu0 %v4344_v45  ;;  %1668 = vmatprep.subr.bf16.mxu1 %v4396_v33 }
 0x5cd   :  { %1628 = vmatpush1.bf16.msra.mxu0 %v4399_v52  ;;  %1669 = vmatpush1.bf16.msra.mxu1 %v4402_v23 }
 0x5ce   :  { %1629 = vmatprep.subr.bf16.mxu0 %v4405_v9  ;;  %1670 = vmatprep.subr.bf16.mxu1 %v4408_v53 }
 0x5d1   :  { %1630 = vmatpush1.bf16.msra.mxu0 %v4411_v54  ;;  %1671 = vmatpush1.bf16.msra.mxu1 %v4414_v55 }
 0x5d2   :  { %1631 = vmatprep.subr.bf16.mxu0 %v4417_v56  ;;  %1672 = vmatprep.subr.bf16.mxu1 %v4420_v57 }
 0x5d5   :  { %1632 = vmatpush1.bf16.msra.mxu0 %v4423_v59  ;;  %1673 = vmatpush1.bf16.msra.mxu1 %v4426_v60 }
 0x5d6   :  { %1633 = vmatprep.subr.bf16.mxu0 %v4429_v61  ;;  %1674 = vmatprep.subr.bf16.mxu1 %v4432_v63 }
 0x5d9   :  { %1634 = vmatpush1.bf16.msra.mxu0 %v4435_v1  ;;  %1675 = vmatpush1.bf16.msra.mxu1 %v4438_v2 }
 0x5da   :  { %1750 = vmatprep.subr.bf16.mxu0 %v4279_v36  ;;  %1791 = vmatprep.subr.bf16.mxu1 %v4282_v37 }
 0x68f   :  { %v1522_v8 = vpop.f32.mrb[52].mxu0  ;;  %v1563_v22 = vpop.f32.mrb[52].mxu1 }
 0x690   :  { %v1570_v14 = vadd.f32 %v1522_v8, %v5131_v31  ;;  %v1572_v19 = vadd.f32 %v1563_v22, %v5132_v16  ;;  %v1524_v27 = vpop.f32.mrb[53].mxu0  ;;  %v1565_v21 = vpop.f32.mrb[53].mxu1 }
 0x691   :  { %v1571_v18 = vadd.f32 %v1524_v27, %v5133_v32  ;;  %v1573_v62 = vadd.f32 %v1565_v21, %v5134_v30  ;;  %v1526_v10 = vpop.f32.mrb[54].mxu0  ;;  %v1567_v35 = vpop.f32.mrb[54].mxu1 }
 0x692   :  { %v3067_v11 = vmul.f32 -1.442695, %v1570_v14  ;;  %v1527_v34 = vpop.f32.mrb[55].mxu0  ;;  %v1568_v17 = vpop.f32.mrb[55].mxu1  ;;  %v5135_v35 = vld [vmem:[#allocation30_spill] sm:$0xff] }
 0x693   :  { %v3068_v25 = vmul.f32 -1.442695, %v1571_v18  ;;  %v3069_v3 = vmul.f32 -1.442695, %v1573_v62  ;;  %v1604_v14 = vpop.permute.xlu1 %1603  ;;  %v5136_v34 = vld [vmem:[#allocation31_spill] sm:$0xff] }
 0x694   :  { %3307 = vpow2.f32 %v3067_v11 }
 0x695   :  { %3309 = vpow2.f32 %v3068_v25 }
 0x696   :  { %3311 = vpow2.f32 %v3069_v3 }
 0x697   :  { %3313 = vtanh.f32 %v1572_v19 }
 0x69e   :  { %v3308_v4 = vpop.eup %3307 }
 0x69f   :  { %v3310_v6 = vpop.eup %3309  ;;  %v1577_v46 = vadd.f32 1.0, %v3308_v4  ;;  %v5137_v4 = vld [vmem:[#allocation32_spill] sm:$0xff] }
 0x6a0   :  { %v1583_v7 = vadd.f32 1.0, %v3310_v6  ;;  %v3312_v48 = vpop.eup %3311 }
 0x6a1   :  { %3315 = vrcp.f32 %v1577_v46  ;;  %v3314_v49 = vpop.eup %3313  ;;  %v1590_v28 = vadd.f32 1.0, %v3312_v48  ;;  %v5138_v46 = vld [vmem:[#allocation33_spill] sm:$0xff] }
 0x6a2   :  { %3317 = vrcp.f32 %v1583_v7 }
 0x6a3   :  { %3319 = vrcp.f32 %v1590_v28 }
 0x6ab   :  { %v3316_v50 = vpop.eup %3315 }
 0x6ac   :  { %v3318_v51 = vpop.eup %3317  ;;  %v1594_v20 = vmul.f32 %v3316_v50, %v3314_v49 }
 0x6ad   :  { %v1593_v8 = vmul.f32 %v3318_v51, %v4450_v47  ;;  %v3320_v27 = vpop.eup %3319 }
 0x6af   :  { %v1595_v22 = vadd.f32 %v1594_v20, %v1593_v8 }
 0x6b1   :  { %3321 = vtanh.f32 %v1595_v22  ;;  %v1608_v31 = vsub.f32 %v1595_v22, %v4450_v47 }
 0x6b3   :  { %v1609_v16 = vmul.f32 %v1608_v31, %v1604_v14 }
 0x6b5   :  { %v4499_v19 = vadd.f32 %v1609_v16, %v4450_v47 }
 0x6bb   :  { %v3322_v21 = vpop.eup %3321 }
 0x6bc   :  { %v1597_v32 = vmul.f32 %v3322_v21, %v3320_v27 }
 0x6be   :  { %v1600_v18 = vsub.f32 %v1597_v32, %v4454_v29 }
 0x6c0   :  { %v1606_v30 = vmul.f32 %v1604_v14, %v1600_v18 }
 0x6c2   :  { %v4503_v62 = vadd.f32 %v1606_v30, %v4454_v29 }
 0x6c4   :  { %v1611_v10 = vpack.c.bf16 %v4503_v62, %v4503_v62 }
 0x6c6   :  { %1613 = vst [vmem:[#allocation10 + $0x14] sm:$0xf] %v1611_v10  ;;  %1652 = vmatmul.mubr.bf16.vlgmr.msra.gmra.mrb[56].mxu0 %v1611_v10  ;;  %1693 = vmatmul.mubr.bf16.vlgmr.msra.gmra.mrb[56].mxu1 %v1611_v10 }
 0x6c7   :  { %1751 = vmatpush1.bf16.msra.mxu0 %v4300_v0  ;;  %1792 = vmatpush1.bf16.msra.mxu1 %v4303_v13 }
 0x6c8   :  { %1752 = vmatprep.subr.bf16.mxu0 %v4306_v58  ;;  %1793 = vmatprep.subr.bf16.mxu1 %v4309_v5 }
 0x6c9   :  { %1782 = vmatprep.mubr.bf16.mxu0 %v5122_v43  ;;  %1823 = vmatprep.mubr.bf16.mxu1 %v5122_v43 }
 0x6cb   :  { %1753 = vmatpush1.bf16.msra.mxu0 %v4314_v12  ;;  %1794 = vmatpush1.bf16.msra.mxu1 %v4317_v15 }
 0x6cc   :  { %1754 = vmatprep.subr.bf16.mxu0 %v4320_v24  ;;  %1795 = vmatprep.subr.bf16.mxu1 %v4323_v26 }
 0x6cf   :  { %1755 = vmatpush1.bf16.msra.mxu0 %v4326_v38  ;;  %1796 = vmatpush1.bf16.msra.mxu1 %v4329_v39 }
 0x6d0   :  { %1756 = vmatprep.subr.bf16.mxu0 %v4332_v40  ;;  %1797 = vmatprep.subr.bf16.mxu1 %v4335_v41 }
 0x6d3   :  { %1757 = vmatpush1.bf16.msra.mxu0 %v4338_v42  ;;  %1798 = vmatpush1.bf16.msra.mxu1 %v4341_v44 }
 0x6d4   :  { %1758 = vmatprep.subr.bf16.mxu0 %v4344_v45  ;;  %1799 = vmatprep.subr.bf16.mxu1 %v4396_v33 }
 0x6d7   :  { %1759 = vmatpush1.bf16.msra.mxu0 %v4399_v52  ;;  %1800 = vmatpush1.bf16.msra.mxu1 %v4402_v23 }
 0x6d8   :  { %1760 = vmatprep.subr.bf16.mxu0 %v4405_v9  ;;  %1801 = vmatprep.subr.bf16.mxu1 %v4408_v53 }
 0x6db   :  { %1761 = vmatpush1.bf16.msra.mxu0 %v4411_v54  ;;  %1802 = vmatpush1.bf16.msra.mxu1 %v4414_v55 }
 0x6dc   :  { %1762 = vmatprep.subr.bf16.mxu0 %v4417_v56  ;;  %1803 = vmatprep.subr.bf16.mxu1 %v4420_v57 }
 0x6df   :  { %1763 = vmatpush1.bf16.msra.mxu0 %v4423_v59  ;;  %1804 = vmatpush1.bf16.msra.mxu1 %v4426_v60 }
 0x6e0   :  { %1764 = vmatprep.subr.bf16.mxu0 %v4429_v61  ;;  %1805 = vmatprep.subr.bf16.mxu1 %v4432_v63 }
 0x6e3   :  { %1765 = vmatpush1.bf16.msra.mxu0 %v4435_v1  ;;  %1806 = vmatpush1.bf16.msra.mxu1 %v4438_v2 }
 0x6e4   :  { %1881 = vmatprep.subr.bf16.mxu0 %v4279_v36  ;;  %1922 = vmatprep.subr.bf16.mxu1 %v4282_v37 }
 0x799   :  { %v1653_v47 = vpop.f32.mrb[56].mxu0  ;;  %v1694_v29 = vpop.f32.mrb[56].mxu1 }
 0x79a   :  { %v1701_v11 = vadd.f32 %v1653_v47, %v5135_v35  ;;  %v1703_v17 = vadd.f32 %v1694_v29, %v5136_v34  ;;  %v1655_v25 = vpop.f32.mrb[57].mxu0  ;;  %v1696_v3 = vpop.f32.mrb[57].mxu1 }
 0x79b   :  { %v1702_v6 = vadd.f32 %v1655_v25, %v5137_v4  ;;  %v1704_v7 = vadd.f32 %v1696_v3, %v5138_v46  ;;  %v1657_v48 = vpop.f32.mrb[58].mxu0  ;;  %v1698_v49 = vpop.f32.mrb[58].mxu1 }
 0x79c   :  { %v3071_v50 = vmul.f32 -1.442695, %v1701_v11  ;;  %v1658_v51 = vpop.f32.mrb[59].mxu0  ;;  %v1699_v20 = vpop.f32.mrb[59].mxu1  ;;  %v5139_v49 = vld [vmem:[#allocation34_spill] sm:$0xff] }
 0x79d   :  { %v3072_v28 = vmul.f32 -1.442695, %v1702_v6  ;;  %v3073_v8 = vmul.f32 -1.442695, %v1704_v7  ;;  %v1735_v11 = vpop.permute.xlu0 %1734  ;;  %v5140_v51 = vld [vmem:[#allocation35_spill] sm:$0xff] }
 0x79e   :  { %3323 = vpow2.f32 %v3071_v50 }
 0x79f   :  { %3325 = vpow2.f32 %v3072_v28 }
 0x7a0   :  { %3327 = vpow2.f32 %v3073_v8 }
 0x7a1   :  { %3329 = vtanh.f32 %v1703_v17 }
 0x7a8   :  { %v3324_v22 = vpop.eup %3323 }
 0x7a9   :  { %v3326_v31 = vpop.eup %3325  ;;  %v1708_v14 = vadd.f32 1.0, %v3324_v22  ;;  %v5141_v22 = vld [vmem:[#allocation36_spill] sm:$0xff] }
 0x7aa   :  { %v1714_v16 = vadd.f32 1.0, %v3326_v31  ;;  %v3328_v27 = vpop.eup %3327 }
 0x7ab   :  { %3331 = vrcp.f32 %v1708_v14  ;;  %v3330_v21 = vpop.eup %3329  ;;  %v1721_v10 = vadd.f32 1.0, %v3328_v27  ;;  %v5142_v14 = vld [vmem:[#allocation37_spill] sm:$0xff] }
 0x7ac   :  { %3333 = vrcp.f32 %v1714_v16 }
 0x7ad   :  { %3335 = vrcp.f32 %v1721_v10 }
 0x7b5   :  { %v3332_v32 = vpop.eup %3331 }
 0x7b6   :  { %v3334_v18 = vpop.eup %3333  ;;  %v1725_v30 = vmul.f32 %v3332_v32, %v3330_v21 }
 0x7b7   :  { %v1724_v47 = vmul.f32 %v3334_v18, %v4499_v19  ;;  %v3336_v25 = vpop.eup %3335 }
 0x7b9   :  { %v1726_v29 = vadd.f32 %v1725_v30, %v1724_v47 }
 0x7bb   :  { %3337 = vtanh.f32 %v1726_v29  ;;  %v1739_v35 = vsub.f32 %v1726_v29, %v4499_v19 }
 0x7bd   :  { %v1740_v34 = vmul.f32 %v1739_v35, %v1735_v11 }
 0x7bf   :  { %v4548_v17 = vadd.f32 %v1740_v34, %v4499_v19 }
 0x7c5   :  { %v3338_v3 = vpop.eup %3337 }
 0x7c6   :  { %v1728_v4 = vmul.f32 %v3338_v3, %v3336_v25 }
 0x7c8   :  { %v1731_v6 = vsub.f32 %v1728_v4, %v4503_v62 }
 0x7ca   :  { %v1737_v46 = vmul.f32 %v1735_v11, %v1731_v6 }
 0x7cc   :  { %v4552_v7 = vadd.f32 %v1737_v46, %v4503_v62 }
 0x7ce   :  { %v1742_v48 = vpack.c.bf16 %v4552_v7, %v4552_v7 }
 0x7d0   :  { %1744 = vst [vmem:[#allocation10 + $0x18] sm:$0xf] %v1742_v48  ;;  %1783 = vmatmul.mubr.bf16.vlgmr.msra.gmra.mrb[60].mxu0 %v1742_v48  ;;  %1824 = vmatmul.mubr.bf16.vlgmr.msra.gmra.mrb[60].mxu1 %v1742_v48 }
 0x7d1   :  { %1882 = vmatpush1.bf16.msra.mxu0 %v4300_v0  ;;  %1923 = vmatpush1.bf16.msra.mxu1 %v4303_v13 }
 0x7d2   :  { %1883 = vmatprep.subr.bf16.mxu0 %v4306_v58  ;;  %1924 = vmatprep.subr.bf16.mxu1 %v4309_v5 }
 0x7d3   :  { %1913 = vmatprep.mubr.bf16.mxu0 %v5122_v43  ;;  %1954 = vmatprep.mubr.bf16.mxu1 %v5122_v43 }
 0x7d5   :  { %1884 = vmatpush1.bf16.msra.mxu0 %v4314_v12  ;;  %1925 = vmatpush1.bf16.msra.mxu1 %v4317_v15 }
 0x7d6   :  { %1885 = vmatprep.subr.bf16.mxu0 %v4320_v24  ;;  %1926 = vmatprep.subr.bf16.mxu1 %v4323_v26 }
 0x7d9   :  { %1886 = vmatpush1.bf16.msra.mxu0 %v4326_v38  ;;  %1927 = vmatpush1.bf16.msra.mxu1 %v4329_v39 }
 0x7da   :  { %1887 = vmatprep.subr.bf16.mxu0 %v4332_v40  ;;  %1928 = vmatprep.subr.bf16.mxu1 %v4335_v41 }
 0x7dd   :  { %1888 = vmatpush1.bf16.msra.mxu0 %v4338_v42  ;;  %1929 = vmatpush1.bf16.msra.mxu1 %v4341_v44 }
 0x7de   :  { %1889 = vmatprep.subr.bf16.mxu0 %v4344_v45  ;;  %1930 = vmatprep.subr.bf16.mxu1 %v4396_v33 }
 0x7e1   :  { %1890 = vmatpush1.bf16.msra.mxu0 %v4399_v52  ;;  %1931 = vmatpush1.bf16.msra.mxu1 %v4402_v23 }
 0x7e2   :  { %1891 = vmatprep.subr.bf16.mxu0 %v4405_v9  ;;  %1932 = vmatprep.subr.bf16.mxu1 %v4408_v53 }
 0x7e5   :  { %1892 = vmatpush1.bf16.msra.mxu0 %v4411_v54  ;;  %1933 = vmatpush1.bf16.msra.mxu1 %v4414_v55 }
 0x7e6   :  { %1893 = vmatprep.subr.bf16.mxu0 %v4417_v56  ;;  %1934 = vmatprep.subr.bf16.mxu1 %v4420_v57 }
 0x7e9   :  { %1894 = vmatpush1.bf16.msra.mxu0 %v4423_v59  ;;  %1935 = vmatpush1.bf16.msra.mxu1 %v4426_v60 }
 0x7ea   :  { %1895 = vmatprep.subr.bf16.mxu0 %v4429_v61  ;;  %1936 = vmatprep.subr.bf16.mxu1 %v4432_v63 }
 0x7ed   :  { %1896 = vmatpush1.bf16.msra.mxu0 %v4435_v1  ;;  %1937 = vmatpush1.bf16.msra.mxu1 %v4438_v2 }
 0x7ee   :  { %2012 = vmatprep.subr.bf16.mxu0 %v4279_v36  ;;  %2053 = vmatprep.subr.bf16.mxu1 %v4282_v37 }
 0x8a3   :  { %v1784_v19 = vpop.f32.mrb[60].mxu0  ;;  %v1825_v62 = vpop.f32.mrb[60].mxu1 }
 0x8a4   :  { %v1832_v50 = vadd.f32 %v1784_v19, %v5139_v49  ;;  %v1834_v20 = vadd.f32 %v1825_v62, %v5140_v51  ;;  %v1786_v28 = vpop.f32.mrb[61].mxu0  ;;  %v1827_v8 = vpop.f32.mrb[61].mxu1 }
 0x8a5   :  { %v1833_v31 = vadd.f32 %v1786_v28, %v5141_v22  ;;  %v1835_v16 = vadd.f32 %v1827_v8, %v5142_v14  ;;  %v1788_v27 = vpop.f32.mrb[62].mxu0  ;;  %v1829_v21 = vpop.f32.mrb[62].mxu1 }
 0x8a6   :  { %v3075_v32 = vmul.f32 -1.442695, %v1832_v50  ;;  %v1789_v18 = vpop.f32.mrb[63].mxu0  ;;  %v1830_v30 = vpop.f32.mrb[63].mxu1  ;;  %v5143_v21 = vld [vmem:[#allocation38_spill] sm:$0xff] }
 0x8a7   :  { %v3076_v10 = vmul.f32 -1.442695, %v1833_v31  ;;  %v3077_v47 = vmul.f32 -1.442695, %v1835_v16  ;;  %v1866_v50 = vpop.permute.xlu1 %1865  ;;  %v5144_v18 = vld [vmem:[#allocation39_spill] sm:$0xff] }
 0x8a8   :  { %3339 = vpow2.f32 %v3075_v32 }
 0x8a9   :  { %3341 = vpow2.f32 %v3076_v10 }
 0x8aa   :  { %3343 = vpow2.f32 %v3077_v47 }
 0x8ab   :  { %3345 = vtanh.f32 %v1834_v20 }
 0x8b2   :  { %v3340_v29 = vpop.eup %3339 }
 0x8b3   :  { %v3342_v35 = vpop.eup %3341  ;;  %v1839_v11 = vadd.f32 1.0, %v3340_v29  ;;  %v5145_v29 = vld [vmem:[#allocation40_spill] sm:$0xff] }
 0x8b4   :  { %v1845_v34 = vadd.f32 1.0, %v3342_v35  ;;  %v3344_v25 = vpop.eup %3343 }
 0x8b5   :  { %3347 = vrcp.f32 %v1839_v11  ;;  %v3346_v3 = vpop.eup %3345  ;;  %v1852_v48 = vadd.f32 1.0, %v3344_v25  ;;  %v5146_v11 = vld [vmem:[#allocation41_spill] sm:$0xff] }
 0x8b6   :  { %3349 = vrcp.f32 %v1845_v34 }
 0x8b7   :  { %3351 = vrcp.f32 %v1852_v48 }
 0x8bf   :  { %v3348_v4 = vpop.eup %3347 }
 0x8c0   :  { %v3350_v6 = vpop.eup %3349  ;;  %v1856_v46 = vmul.f32 %v3348_v4, %v3346_v3 }
 0x8c1   :  { %v1855_v19 = vmul.f32 %v3350_v6, %v4548_v17  ;;  %v3352_v28 = vpop.eup %3351 }
 0x8c3   :  { %v1857_v62 = vadd.f32 %v1856_v46, %v1855_v19 }
 0x8c5   :  { %3353 = vtanh.f32 %v1857_v62  ;;  %v1870_v49 = vsub.f32 %v1857_v62, %v4548_v17 }
 0x8c7   :  { %v1871_v51 = vmul.f32 %v1870_v49, %v1866_v50 }
 0x8c9   :  { %v4597_v20 = vadd.f32 %v1871_v51, %v4548_v17 }
 0x8cf   :  { %v3354_v8 = vpop.eup %3353 }
 0x8d0   :  { %v1859_v22 = vmul.f32 %v3354_v8, %v3352_v28 }
 0x8d2   :  { %v1862_v31 = vsub.f32 %v1859_v22, %v4552_v7 }
 0x8d4   :  { %v1868_v14 = vmul.f32 %v1866_v50, %v1862_v31 }
 0x8d6   :  { %v4601_v16 = vadd.f32 %v1868_v14, %v4552_v7 }
 0x8d8   :  { %v1873_v27 = vpack.c.bf16 %v4601_v16, %v4601_v16 }
 0x8da   :  { %1875 = vst [vmem:[#allocation10 + $0x1c] sm:$0xf] %v1873_v27  ;;  %1914 = vmatmul.mubr.bf16.vlgmr.msra.gmra.mrb[64].mxu0 %v1873_v27  ;;  %1955 = vmatmul.mubr.bf16.vlgmr.msra.gmra.mrb[64].mxu1 %v1873_v27 }
 0x8db   :  { %2013 = vmatpush1.bf16.msra.mxu0 %v4300_v0  ;;  %2054 = vmatpush1.bf16.msra.mxu1 %v4303_v13 }
 0x8dc   :  { %2014 = vmatprep.subr.bf16.mxu0 %v4306_v58  ;;  %2055 = vmatprep.subr.bf16.mxu1 %v4309_v5 }
 0x8dd   :  { %2044 = vmatprep.mubr.bf16.mxu0 %v5122_v43  ;;  %2085 = vmatprep.mubr.bf16.mxu1 %v5122_v43 }
 0x8df   :  { %2015 = vmatpush1.bf16.msra.mxu0 %v4314_v12  ;;  %2056 = vmatpush1.bf16.msra.mxu1 %v4317_v15 }
 0x8e0   :  { %2016 = vmatprep.subr.bf16.mxu0 %v4320_v24  ;;  %2057 = vmatprep.subr.bf16.mxu1 %v4323_v26 }
 0x8e3   :  { %2017 = vmatpush1.bf16.msra.mxu0 %v4326_v38  ;;  %2058 = vmatpush1.bf16.msra.mxu1 %v4329_v39 }
 0x8e4   :  { %2018 = vmatprep.subr.bf16.mxu0 %v4332_v40  ;;  %2059 = vmatprep.subr.bf16.mxu1 %v4335_v41 }
 0x8e7   :  { %2019 = vmatpush1.bf16.msra.mxu0 %v4338_v42  ;;  %2060 = vmatpush1.bf16.msra.mxu1 %v4341_v44 }
 0x8e8   :  { %2020 = vmatprep.subr.bf16.mxu0 %v4344_v45  ;;  %2061 = vmatprep.subr.bf16.mxu1 %v4396_v33 }
 0x8eb   :  { %2021 = vmatpush1.bf16.msra.mxu0 %v4399_v52  ;;  %2062 = vmatpush1.bf16.msra.mxu1 %v4402_v23 }
 0x8ec   :  { %2022 = vmatprep.subr.bf16.mxu0 %v4405_v9  ;;  %2063 = vmatprep.subr.bf16.mxu1 %v4408_v53 }
 0x8ef   :  { %2023 = vmatpush1.bf16.msra.mxu0 %v4411_v54  ;;  %2064 = vmatpush1.bf16.msra.mxu1 %v4414_v55 }
 0x8f0   :  { %2024 = vmatprep.subr.bf16.mxu0 %v4417_v56  ;;  %2065 = vmatprep.subr.bf16.mxu1 %v4420_v57 }
 0x8f3   :  { %2025 = vmatpush1.bf16.msra.mxu0 %v4423_v59  ;;  %2066 = vmatpush1.bf16.msra.mxu1 %v4426_v60 }
 0x8f4   :  { %2026 = vmatprep.subr.bf16.mxu0 %v4429_v61  ;;  %2067 = vmatprep.subr.bf16.mxu1 %v4432_v63 }
 0x8f7   :  { %2027 = vmatpush1.bf16.msra.mxu0 %v4435_v1  ;;  %2068 = vmatpush1.bf16.msra.mxu1 %v4438_v2 }
 0x8f8   :  { %2143 = vmatprep.subr.bf16.mxu0 %v4279_v36  ;;  %2184 = vmatprep.subr.bf16.mxu1 %v4282_v37 }
 0x9ad   :  { %v1915_v17 = vpop.f32.mrb[64].mxu0  ;;  %v1956_v7 = vpop.f32.mrb[64].mxu1 }
 0x9ae   :  { %v1963_v32 = vadd.f32 %v1915_v17, %v5143_v21  ;;  %v1965_v30 = vadd.f32 %v1956_v7, %v5144_v18  ;;  %v1917_v10 = vpop.f32.mrb[65].mxu0  ;;  %v1958_v47 = vpop.f32.mrb[65].mxu1 }
 0x9af   :  { %v1964_v35 = vadd.f32 %v1917_v10, %v5145_v29  ;;  %v1966_v34 = vadd.f32 %v1958_v47, %v5146_v11  ;;  %v1919_v25 = vpop.f32.mrb[66].mxu0  ;;  %v1960_v3 = vpop.f32.mrb[66].mxu1 }
 0x9b0   :  { %v3079_v4 = vmul.f32 -1.442695, %v1963_v32  ;;  %v1920_v6 = vpop.f32.mrb[67].mxu0  ;;  %v1961_v46 = vpop.f32.mrb[67].mxu1 }
 0x9b1   :  { %v3080_v36 = vmul.f32 -1.442695, %v1964_v35  ;;  %v3081_v37 = vmul.f32 -1.442695, %v1966_v34  ;;  %v1997_v7 = vpop.permute.xlu0 %1996 }
 0x9b2   :  { %3355 = vpow2.f32 %v3079_v4 }
 0x9b3   :  { %3357 = vpow2.f32 %v3080_v36 }
 0x9b4   :  { %3359 = vpow2.f32 %v3081_v37 }
 0x9b5   :  { %3361 = vtanh.f32 %v1965_v30 }
 0x9bc   :  { %v3356_v48 = vpop.eup %3355 }
 0x9bd   :  { %v3358_v19 = vpop.eup %3357  ;;  %v1970_v62 = vadd.f32 1.0, %v3356_v48 }
 0x9be   :  { %v1976_v49 = vadd.f32 1.0, %v3358_v19  ;;  %v3360_v50 = vpop.eup %3359 }
 0x9bf   :  { %3363 = vrcp.f32 %v1970_v62  ;;  %v3362_v51 = vpop.eup %3361  ;;  %v1983_v31 = vadd.f32 1.0, %v3360_v50 }
 0x9c0   :  { %3365 = vrcp.f32 %v1976_v49 }
 0x9c1   :  { %3367 = vrcp.f32 %v1983_v31  ;;  %v2128_v31 = vpop.permute.xlu1 %2127 }
 0x9c9   :  { %v3364_v28 = vpop.eup %3363 }
 0x9ca   :  { %v3366_v8 = vpop.eup %3365  ;;  %v1987_v22 = vmul.f32 %v3364_v28, %v3362_v51 }
 0x9cb   :  { %v1986_v14 = vmul.f32 %v3366_v8, %v4597_v20  ;;  %v3368_v18 = vpop.eup %3367 }
 0x9cd   :  { %v1988_v27 = vadd.f32 %v1987_v22, %v1986_v14 }
 0x9cf   :  { %3369 = vtanh.f32 %v1988_v27  ;;  %v2001_v17 = vsub.f32 %v1988_v27, %v4597_v20 }
 0x9d1   :  { %v2002_v21 = vmul.f32 %v2001_v17, %v1997_v7 }
 0x9d3   :  { %v4646_v32 = vadd.f32 %v2002_v21, %v4597_v20 }
 0x9d9   :  { %v3370_v30 = vpop.eup %3369 }
 0x9da   :  { %v1990_v10 = vmul.f32 %v3370_v30, %v3368_v18 }
 0x9dc   :  { %v1993_v47 = vsub.f32 %v1990_v10, %v4601_v16 }
 0x9de   :  { %v1999_v29 = vmul.f32 %v1997_v7, %v1993_v47 }
 0x9e0   :  { %v4650_v35 = vadd.f32 %v1999_v29, %v4601_v16  ;;  %v4707_v29 = vld [vmem:[#allocation8] ss:$16 sps:$4 sm:$0xff]  }
 0x9e2   :  { %v2004_v11 = vpack.c.bf16 %v4650_v35, %v4650_v35 }
 0x9e4   :  { %2006 = vst [vmem:[#allocation10 + $0x20] sm:$0xf] %v2004_v11  ;;  %2045 = vmatmul.mubr.bf16.vlgmr.msra.gmra.mrb[68].mxu0 %v2004_v11  ;;  %2086 = vmatmul.mubr.bf16.vlgmr.msra.gmra.mrb[68].mxu1 %v2004_v11  ;;  %v4713_v11 = vld [vmem:[#allocation8 + $0x24] ss:$16 sps:$4 sm:$0xff]  }
 0x9e5   :  { %2144 = vmatpush1.bf16.msra.mxu0 %v4300_v0  ;;  %2185 = vmatpush1.bf16.msra.mxu1 %v4303_v13  ;;  %v4686_v0 = vld [vmem:[#allocation8 + $0x4] ss:$16 sps:$4 sm:$0xff]   ;;  %v4689_v13 = vld [vmem:[#allocation8 + $0xc] ss:$16 sps:$4 sm:$0xff]  }
 0x9e6   :  { %2145 = vmatprep.subr.bf16.mxu0 %v4306_v58  ;;  %2186 = vmatprep.subr.bf16.mxu1 %v4309_v5 }
 0x9e7   :  { %2175 = vmatprep.mubr.bf16.mxu0 %v5122_v43  ;;  %2216 = vmatprep.mubr.bf16.mxu1 %v5122_v43 }
 0x9e9   :  { %2146 = vmatpush1.bf16.msra.mxu0 %v4314_v12  ;;  %2187 = vmatpush1.bf16.msra.mxu1 %v4317_v15  ;;  %v5147_v12 = vld [vmem:[#allocation42_spill] sm:$0xff] }
 0x9ea   :  { %2147 = vmatprep.subr.bf16.mxu0 %v4320_v24  ;;  %2188 = vmatprep.subr.bf16.mxu1 %v4323_v26  ;;  %v5148_v24 = vld [vmem:[#allocation43_spill] sm:$0xff] }
 0x9ed   :  { %2148 = vmatpush1.bf16.msra.mxu0 %v4326_v38  ;;  %2189 = vmatpush1.bf16.msra.mxu1 %v4329_v39 }
 0x9ee   :  { %2149 = vmatprep.subr.bf16.mxu0 %v4332_v40  ;;  %2190 = vmatprep.subr.bf16.mxu1 %v4335_v41  ;;  %v5149_v40 = vld [vmem:[#allocation44_spill] sm:$0xff] }
 0x9f1   :  { %2150 = vmatpush1.bf16.msra.mxu0 %v4338_v42  ;;  %2191 = vmatpush1.bf16.msra.mxu1 %v4341_v44  ;;  %v5150_v42 = vld [vmem:[#allocation45_spill] sm:$0xff] }
 0x9f2   :  { %2151 = vmatprep.subr.bf16.mxu0 %v4344_v45  ;;  %2192 = vmatprep.subr.bf16.mxu1 %v4396_v33 }
 0x9f5   :  { %2152 = vmatpush1.bf16.msra.mxu0 %v4399_v52  ;;  %2193 = vmatpush1.bf16.msra.mxu1 %v4402_v23 }
 0x9f6   :  { %2153 = vmatprep.subr.bf16.mxu0 %v4405_v9  ;;  %2194 = vmatprep.subr.bf16.mxu1 %v4408_v53 }
 0x9f9   :  { %2154 = vmatpush1.bf16.msra.mxu0 %v4411_v54  ;;  %2195 = vmatpush1.bf16.msra.mxu1 %v4414_v55 }
 0x9fa   :  { %2155 = vmatprep.subr.bf16.mxu0 %v4417_v56  ;;  %2196 = vmatprep.subr.bf16.mxu1 %v4420_v57 }
 0x9fd   :  { %2156 = vmatpush1.bf16.msra.mxu0 %v4423_v59  ;;  %2197 = vmatpush1.bf16.msra.mxu1 %v4426_v60 }
 0x9fe   :  { %2157 = vmatprep.subr.bf16.mxu0 %v4429_v61  ;;  %2198 = vmatprep.subr.bf16.mxu1 %v4432_v63 }
 0xa01   :  { %2158 = vmatpush1.bf16.msra.mxu0 %v4435_v1  ;;  %2199 = vmatpush1.bf16.msra.mxu1 %v4438_v2 }
 0xa02   :  { %2274 = vmatprep.subr.bf16.mxu0 %v4686_v0  ;;  %2315 = vmatprep.subr.bf16.mxu1 %v4689_v13 }
 0xab7   :  { %v2046_v58 = vpop.f32.mrb[68].mxu0  ;;  %v2087_v5 = vpop.f32.mrb[68].mxu1 }
 0xab8   :  { %v2094_v15 = vadd.f32 %v2046_v58, %v5147_v12  ;;  %v2096_v26 = vadd.f32 %v2087_v5, %v5148_v24  ;;  %v2048_v38 = vpop.f32.mrb[69].mxu0  ;;  %v2089_v39 = vpop.f32.mrb[69].mxu1  ;;  %v4721_v58 = vld [vmem:[#allocation8 + $0x20] ss:$16 sps:$4 sm:$0xff]   ;;  %v4724_v5 = vld [vmem:[#allocation8 + $0x28] ss:$16 sps:$4 sm:$0xff]  }
 0xab9   :  { %v2095_v41 = vadd.f32 %v2048_v38, %v5149_v40  ;;  %v2097_v44 = vadd.f32 %v2089_v39, %v5150_v42  ;;  %v2050_v45 = vpop.f32.mrb[70].mxu0  ;;  %v2091_v20 = vpop.f32.mrb[70].mxu1  ;;  %v4727_v12 = vld [vmem:[#allocation8 + $0x44] ss:$16 sps:$4 sm:$0xff]   ;;  %v4733_v24 = vld [vmem:[#allocation8 + $0x40] ss:$16 sps:$4 sm:$0xff]  }
 0xaba   :  { %v3083_v16 = vmul.f32 -1.442695, %v2094_v15  ;;  %v2051_v34 = vpop.f32.mrb[71].mxu0  ;;  %v2092_v25 = vpop.f32.mrb[71].mxu1  ;;  %v4730_v15 = vld [vmem:[#allocation8 + $0x4c] ss:$16 sps:$4 sm:$0xff]  }
 0xabb   :  { %v3084_v3 = vmul.f32 -1.442695, %v2095_v41  ;;  %v3085_v4 = vmul.f32 -1.442695, %v2097_v44  ;;  %v4739_v38 = vld [vmem:[#allocation8 + $0x64] ss:$16 sps:$4 sm:$0xff]  }
 0xabc   :  { %3371 = vpow2.f32 %v3083_v16  ;;  %v4742_v39 = vld [vmem:[#allocation8 + $0x6c] ss:$16 sps:$4 sm:$0xff]   ;;  %v4745_v40 = vld [vmem:[#allocation8 + $0x60] ss:$16 sps:$4 sm:$0xff]   ;;  %v4748_v41 = vld [vmem:[#allocation8 + $0x68] ss:$16 sps:$4 sm:$0xff]  }
 0xabd   :  { %3373 = vpow2.f32 %v3084_v3  ;;  %v4751_v42 = vld [vmem:[#allocation8 + $0x84] ss:$16 sps:$4 sm:$0xff]  }
 0xabe   :  { %3375 = vpow2.f32 %v3085_v4 }
 0xabf   :  { %3377 = vtanh.f32 %v2096_v26  ;;  %v4736_v26 = vld [vmem:[#allocation8 + $0x48] ss:$16 sps:$4 sm:$0xff]  }
 0xac6   :  { %v3372_v6 = vpop.eup %3371 }
 0xac7   :  { %v3374_v46 = vpop.eup %3373  ;;  %v2101_v36 = vadd.f32 1.0, %v3372_v6 }
 0xac8   :  { %v2107_v37 = vadd.f32 1.0, %v3374_v46  ;;  %v3376_v48 = vpop.eup %3375 }
 0xac9   :  { %3379 = vrcp.f32 %v2101_v36  ;;  %v3378_v19 = vpop.eup %3377  ;;  %v2114_v51 = vadd.f32 1.0, %v3376_v48 }
 0xaca   :  { %3381 = vrcp.f32 %v2107_v37 }
 0xacb   :  { %3383 = vrcp.f32 %v2114_v51  ;;  %v2259_v51 = vpop.permute.xlu0 %2258 }
 0xad3   :  { %v3380_v62 = vpop.eup %3379 }
 0xad4   :  { %v3382_v49 = vpop.eup %3381  ;;  %v2118_v50 = vmul.f32 %v3380_v62, %v3378_v19 }
 0xad5   :  { %v2117_v28 = vmul.f32 %v3382_v49, %v4646_v32  ;;  %v3384_v17 = vpop.eup %3383 }
 0xad7   :  { %v2119_v8 = vadd.f32 %v2118_v50, %v2117_v28 }
 0xad9   :  { %3385 = vtanh.f32 %v2119_v8  ;;  %v2132_v22 = vsub.f32 %v2119_v8, %v4646_v32 }
 0xadb   :  { %v2133_v14 = vmul.f32 %v2132_v22, %v2128_v31 }
 0xadd   :  { %v4699_v27 = vadd.f32 %v2133_v14, %v4646_v32  ;;  %v4710_v32 = vld [vmem:[#allocation8 + $0x8] ss:$16 sps:$4 sm:$0xff]  }
 0xae3   :  { %v3386_v7 = vpop.eup %3385 }
 0xae4   :  { %v2121_v21 = vmul.f32 %v3386_v7, %v3384_v17 }
 0xae6   :  { %v2124_v18 = vsub.f32 %v2121_v21, %v4650_v35 }
 0xae8   :  { %v2130_v30 = vmul.f32 %v2128_v31, %v2124_v18 }
 0xaea   :  { %v4703_v10 = vadd.f32 %v2130_v30, %v4650_v35  ;;  %v4716_v35 = vld [vmem:[#allocation8 + $0x2c] ss:$16 sps:$4 sm:$0xff]   ;;  %v4806_v30 = vld [vmem:[#allocation8 + $0x80] ss:$16 sps:$4 sm:$0xff]  }
 0xaec   :  { %v2135_v47 = vpack.c.bf16 %v4703_v10, %v4703_v10 }
 0xaee   :  { %2137 = vst [vmem:[#allocation10 + $0x24] sm:$0xf] %v2135_v47  ;;  %2176 = vmatmul.mubr.bf16.vlgmr.msra.gmra.mrb[72].mxu0 %v2135_v47  ;;  %2217 = vmatmul.mubr.bf16.vlgmr.msra.gmra.mrb[72].mxu1 %v2135_v47  ;;  %v4812_v47 = vld [vmem:[#allocation8 + $0xa4] ss:$16 sps:$4 sm:$0xff]  }
 0xaef   :  { %2275 = vmatpush1.bf16.msra.mxu0 %v4707_v29  ;;  %2316 = vmatpush1.bf16.msra.mxu1 %v4710_v32 }
 0xaf0   :  { %2276 = vmatprep.subr.bf16.mxu0 %v4713_v11  ;;  %2317 = vmatprep.subr.bf16.mxu1 %v4716_v35 }
 0xaf1   :  { %2306 = vmatprep.mubr.bf16.mxu0 %v5122_v43  ;;  %2347 = vmatprep.mubr.bf16.mxu1 %v5122_v43 }
 0xaf3   :  { %2277 = vmatpush1.bf16.msra.mxu0 %v4721_v58  ;;  %2318 = vmatpush1.bf16.msra.mxu1 %v4724_v5 }
 0xaf4   :  { %2278 = vmatprep.subr.bf16.mxu0 %v4727_v12  ;;  %2319 = vmatprep.subr.bf16.mxu1 %v4730_v15 }
 0xaf7   :  { %2279 = vmatpush1.bf16.msra.mxu0 %v4733_v24  ;;  %2320 = vmatpush1.bf16.msra.mxu1 %v4736_v26 }
 0xaf8   :  { %2280 = vmatprep.subr.bf16.mxu0 %v4739_v38  ;;  %2321 = vmatprep.subr.bf16.mxu1 %v4742_v39 }
 0xafb   :  { %2281 = vmatpush1.bf16.msra.mxu0 %v4745_v40  ;;  %2322 = vmatpush1.bf16.msra.mxu1 %v4748_v41 }
 0xafc   :  { %2282 = vmatprep.subr.bf16.mxu0 %v4751_v42  ;;  %2323 = vmatprep.subr.bf16.mxu1 %v4396_v33 }
 0xaff   :  { %2283 = vmatpush1.bf16.msra.mxu0 %v4399_v52  ;;  %2324 = vmatpush1.bf16.msra.mxu1 %v4402_v23  ;;  %v5151_v23 = vld [vmem:[#allocation46_spill] sm:$0xff] }
 0xb00   :  { %2284 = vmatprep.subr.bf16.mxu0 %v4405_v9  ;;  %2325 = vmatprep.subr.bf16.mxu1 %v4408_v53  ;;  %v5152_v53 = vld [vmem:[#allocation47_spill] sm:$0xff] }
 0xb03   :  { %2285 = vmatpush1.bf16.msra.mxu0 %v4411_v54  ;;  %2326 = vmatpush1.bf16.msra.mxu1 %v4414_v55 }
 0xb04   :  { %2286 = vmatprep.subr.bf16.mxu0 %v4417_v56  ;;  %2327 = vmatprep.subr.bf16.mxu1 %v4420_v57  ;;  %v5153_v57 = vld [vmem:[#allocation48_spill] sm:$0xff] }
 0xb07   :  { %2287 = vmatpush1.bf16.msra.mxu0 %v4423_v59  ;;  %2328 = vmatpush1.bf16.msra.mxu1 %v4426_v60  ;;  %v5154_v60 = vld [vmem:[#allocation49_spill] sm:$0xff] }
 0xb08   :  { %2288 = vmatprep.subr.bf16.mxu0 %v4429_v61  ;;  %2329 = vmatprep.subr.bf16.mxu1 %v4432_v63 }
 0xb0b   :  { %2289 = vmatpush1.bf16.msra.mxu0 %v4435_v1  ;;  %2330 = vmatpush1.bf16.msra.mxu1 %v4438_v2 }
 0xb0c   :  { %2405 = vmatprep.subr.bf16.mxu0 %v4686_v0  ;;  %2446 = vmatprep.subr.bf16.mxu1 %v4689_v13 }
 0xbc1   :  { %v2177_v33 = vpop.f32.mrb[72].mxu0  ;;  %v2218_v52 = vpop.f32.mrb[72].mxu1 }
 0xbc2   :  { %v2225_v9 = vadd.f32 %v2177_v33, %v5151_v23  ;;  %v2227_v54 = vadd.f32 %v2218_v52, %v5152_v53  ;;  %v2179_v55 = vpop.f32.mrb[73].mxu0  ;;  %v2220_v56 = vpop.f32.mrb[73].mxu1  ;;  %v4815_v33 = vld [vmem:[#allocation8 + $0xac] ss:$16 sps:$4 sm:$0xff]   ;;  %v4818_v52 = vld [vmem:[#allocation8 + $0xa0] ss:$16 sps:$4 sm:$0xff]  }
 0xbc3   :  { %v2226_v59 = vadd.f32 %v2179_v55, %v5153_v57  ;;  %v2228_v61 = vadd.f32 %v2220_v56, %v5154_v60  ;;  %v2181_v63 = vpop.f32.mrb[74].mxu0  ;;  %v2222_v1 = vpop.f32.mrb[74].mxu1  ;;  %v4821_v23 = vld [vmem:[#allocation8 + $0xa8] ss:$16 sps:$4 sm:$0xff]   ;;  %v4827_v53 = vld [vmem:[#allocation8 + $0xcc] ss:$16 sps:$4 sm:$0xff]  }
 0xbc4   :  { %v3087_v44 = vmul.f32 -1.442695, %v2225_v9  ;;  %v2182_v2 = vpop.f32.mrb[75].mxu0  ;;  %v2223_v45 = vpop.f32.mrb[75].mxu1  ;;  %v4824_v9 = vld [vmem:[#allocation8 + $0xc4] ss:$16 sps:$4 sm:$0xff]  }
 0xbc5   :  { %v3088_v20 = vmul.f32 -1.442695, %v2226_v59  ;;  %v3089_v16 = vmul.f32 -1.442695, %v2228_v61  ;;  %v4833_v55 = vld [vmem:[#allocation8 + $0xc8] ss:$16 sps:$4 sm:$0xff]  }
 0xbc6   :  { %3387 = vpow2.f32 %v3087_v44  ;;  %v4836_v56 = vld [vmem:[#allocation8 + $0xe4] ss:$16 sps:$4 sm:$0xff]   ;;  %v4839_v57 = vld [vmem:[#allocation8 + $0xec] ss:$16 sps:$4 sm:$0xff]   ;;  %v4842_v59 = vld [vmem:[#allocation8 + $0xe0] ss:$16 sps:$4 sm:$0xff]  }
 0xbc7   :  { %3389 = vpow2.f32 %v3088_v20  ;;  %v4845_v60 = vld [vmem:[#allocation8 + $0xe8] ss:$16 sps:$4 sm:$0xff]   ;;  %v5155_v1 = vld [vmem:[#allocation50_spill] sm:$0xff] }
 0xbc8   :  { %3391 = vpow2.f32 %v3089_v16  ;;  %v5156_v2 = vld [vmem:[#allocation51_spill] sm:$0xff] }
 0xbc9   :  { %3393 = vtanh.f32 %v2227_v54  ;;  %v4830_v54 = vld [vmem:[#allocation8 + $0xc0] ss:$16 sps:$4 sm:$0xff]  }
 0xbd0   :  { %v3388_v34 = vpop.eup %3387 }
 0xbd1   :  { %v3390_v25 = vpop.eup %3389  ;;  %v2232_v3 = vadd.f32 1.0, %v3388_v34  ;;  %v5157_v34 = vld [vmem:[#allocation52_spill] sm:$0xff] }
 0xbd2   :  { %v2238_v4 = vadd.f32 1.0, %v3390_v25  ;;  %v3392_v6 = vpop.eup %3391 }
 0xbd3   :  { %3395 = vrcp.f32 %v2232_v3  ;;  %v3394_v46 = vpop.eup %3393  ;;  %v2245_v19 = vadd.f32 1.0, %v3392_v6  ;;  %v5158_v3 = vld [vmem:[#allocation53_spill] sm:$0xff] }
 0xbd4   :  { %3397 = vrcp.f32 %v2238_v4 }
 0xbd5   :  { %3399 = vrcp.f32 %v2245_v19 }
 0xbdd   :  { %v3396_v36 = vpop.eup %3395 }
 0xbde   :  { %v3398_v37 = vpop.eup %3397  ;;  %v2249_v48 = vmul.f32 %v3396_v36, %v3394_v46 }
 0xbdf   :  { %v2248_v62 = vmul.f32 %v3398_v37, %v4699_v27  ;;  %v3400_v22 = vpop.eup %3399 }
 0xbe1   :  { %v2250_v49 = vadd.f32 %v2249_v48, %v2248_v62 }
 0xbe3   :  { %3401 = vtanh.f32 %v2250_v49  ;;  %v2263_v50 = vsub.f32 %v2250_v49, %v4699_v27 }
 0xbe5   :  { %v2264_v28 = vmul.f32 %v2263_v50, %v2259_v51 }
 0xbe7   :  { %v4778_v8 = vadd.f32 %v2264_v28, %v4699_v27  ;;  %v4803_v27 = vld [vmem:[#allocation8 + $0x8c] ss:$16 sps:$4 sm:$0xff]  }
 0xbed   :  { %v3402_v31 = vpop.eup %3401 }
 0xbee   :  { %v2252_v14 = vmul.f32 %v3402_v31, %v3400_v22 }
 0xbf0   :  { %v2255_v17 = vsub.f32 %v2252_v14, %v4703_v10 }
 0xbf2   :  { %v2261_v7 = vmul.f32 %v2259_v51, %v2255_v17 }
 0xbf4   :  { %v4782_v21 = vadd.f32 %v2261_v7, %v4703_v10  ;;  %v4809_v10 = vld [vmem:[#allocation8 + $0x88] ss:$16 sps:$4 sm:$0xff]  }
 0xbf6   :  { %v2266_v18 = vpack.c.bf16 %v4782_v21, %v4782_v21 }
 0xbf8   :  { %2268 = vst [vmem:[#allocation10 + $0x28] sm:$0xf] %v2266_v18  ;;  %2307 = vmatmul.mubr.bf16.vlgmr.msra.gmra.mrb[76].mxu0 %v2266_v18  ;;  %2348 = vmatmul.mubr.bf16.vlgmr.msra.gmra.mrb[76].mxu1 %v2266_v18 }
 0xbf9   :  { %2406 = vmatpush1.bf16.msra.mxu0 %v4707_v29  ;;  %2447 = vmatpush1.bf16.msra.mxu1 %v4710_v32 }
 0xbfa   :  { %2407 = vmatprep.subr.bf16.mxu0 %v4713_v11  ;;  %2448 = vmatprep.subr.bf16.mxu1 %v4716_v35 }
 0xbfb   :  { %2437 = vmatprep.mubr.bf16.mxu0 %v5122_v43  ;;  %2478 = vmatprep.mubr.bf16.mxu1 %v5122_v43 }
 0xbfd   :  { %2408 = vmatpush1.bf16.msra.mxu0 %v4721_v58  ;;  %2449 = vmatpush1.bf16.msra.mxu1 %v4724_v5 }
 0xbfe   :  { %2409 = vmatprep.subr.bf16.mxu0 %v4727_v12  ;;  %2450 = vmatprep.subr.bf16.mxu1 %v4730_v15 }
 0xc01   :  { %2410 = vmatpush1.bf16.msra.mxu0 %v4733_v24  ;;  %2451 = vmatpush1.bf16.msra.mxu1 %v4736_v26 }
 0xc02   :  { %2411 = vmatprep.subr.bf16.mxu0 %v4739_v38  ;;  %2452 = vmatprep.subr.bf16.mxu1 %v4742_v39 }
 0xc05   :  { %2412 = vmatpush1.bf16.msra.mxu0 %v4745_v40  ;;  %2453 = vmatpush1.bf16.msra.mxu1 %v4748_v41 }
 0xc06   :  { %2413 = vmatprep.subr.bf16.mxu0 %v4751_v42  ;;  %2454 = vmatprep.subr.bf16.mxu1 %v4803_v27 }
 0xc09   :  { %2414 = vmatpush1.bf16.msra.mxu0 %v4806_v30  ;;  %2455 = vmatpush1.bf16.msra.mxu1 %v4809_v10 }
 0xc0a   :  { %2415 = vmatprep.subr.bf16.mxu0 %v4812_v47  ;;  %2456 = vmatprep.subr.bf16.mxu1 %v4815_v33 }
 0xc0d   :  { %2416 = vmatpush1.bf16.msra.mxu0 %v4818_v52  ;;  %2457 = vmatpush1.bf16.msra.mxu1 %v4821_v23 }
 0xc0e   :  { %2417 = vmatprep.subr.bf16.mxu0 %v4824_v9  ;;  %2458 = vmatprep.subr.bf16.mxu1 %v4827_v53 }
 0xc11   :  { %2418 = vmatpush1.bf16.msra.mxu0 %v4830_v54  ;;  %2459 = vmatpush1.bf16.msra.mxu1 %v4833_v55 }
 0xc12   :  { %2419 = vmatprep.subr.bf16.mxu0 %v4836_v56  ;;  %2460 = vmatprep.subr.bf16.mxu1 %v4839_v57 }
 0xc15   :  { %2420 = vmatpush1.bf16.msra.mxu0 %v4842_v59  ;;  %2461 = vmatpush1.bf16.msra.mxu1 %v4845_v60 }
 0xc16   :  { %2536 = vmatprep.subr.bf16.mxu0 %v4686_v0  ;;  %2577 = vmatprep.subr.bf16.mxu1 %v4689_v13 }
 0xccb   :  { %v2308_v61 = vpop.f32.mrb[76].mxu0  ;;  %v2349_v63 = vpop.f32.mrb[76].mxu1 }
 0xccc   :  { %v2356_v44 = vadd.f32 %v2308_v61, %v5155_v1  ;;  %v2358_v45 = vadd.f32 %v2349_v63, %v5156_v2  ;;  %v2310_v20 = vpop.f32.mrb[77].mxu0  ;;  %v2351_v16 = vpop.f32.mrb[77].mxu1 }
 0xccd   :  { %v2357_v25 = vadd.f32 %v2310_v20, %v5157_v34  ;;  %v2359_v4 = vadd.f32 %v2351_v16, %v5158_v3  ;;  %v2312_v6 = vpop.f32.mrb[78].mxu0  ;;  %v2353_v46 = vpop.f32.mrb[78].mxu1 }
 0xcce   :  { %v3091_v36 = vmul.f32 -1.442695, %v2356_v44  ;;  %v2313_v37 = vpop.f32.mrb[79].mxu0  ;;  %v2354_v48 = vpop.f32.mrb[79].mxu1  ;;  %v5159_v46 = vld [vmem:[#allocation54_spill] sm:$0xff] }
 0xccf   :  { %v3092_v19 = vmul.f32 -1.442695, %v2357_v25  ;;  %v3093_v62 = vmul.f32 -1.442695, %v2359_v4  ;;  %v2390_v44 = vpop.permute.xlu1 %2389  ;;  %v5160_v37 = vld [vmem:[#allocation55_spill] sm:$0xff] }
 0xcd0   :  { %3403 = vpow2.f32 %v3091_v36 }
 0xcd1   :  { %3405 = vpow2.f32 %v3092_v19 }
 0xcd2   :  { %3407 = vpow2.f32 %v3093_v62 }
 0xcd3   :  { %3409 = vtanh.f32 %v2358_v45 }
 0xcda   :  { %v3404_v49 = vpop.eup %3403 }
 0xcdb   :  { %v3406_v50 = vpop.eup %3405  ;;  %v2363_v51 = vadd.f32 1.0, %v3404_v49  ;;  %v5161_v49 = vld [vmem:[#allocation56_spill] sm:$0xff] }
 0xcdc   :  { %v2369_v28 = vadd.f32 1.0, %v3406_v50  ;;  %v3408_v22 = vpop.eup %3407 }
 0xcdd   :  { %3411 = vrcp.f32 %v2363_v51  ;;  %v3410_v31 = vpop.eup %3409  ;;  %v2376_v18 = vadd.f32 1.0, %v3408_v22  ;;  %v5162_v51 = vld [vmem:[#allocation57_spill] sm:$0xff] }
 0xcde   :  { %3413 = vrcp.f32 %v2369_v28 }
 0xcdf   :  { %3415 = vrcp.f32 %v2376_v18 }
 0xce7   :  { %v3412_v14 = vpop.eup %3411 }
 0xce8   :  { %v3414_v17 = vpop.eup %3413  ;;  %v2380_v7 = vmul.f32 %v3412_v14, %v3410_v31 }
 0xce9   :  { %v2379_v61 = vmul.f32 %v3414_v17, %v4778_v8  ;;  %v3416_v20 = vpop.eup %3415 }
 0xceb   :  { %v2381_v63 = vadd.f32 %v2380_v7, %v2379_v61 }
 0xced   :  { %3417 = vtanh.f32 %v2381_v63  ;;  %v2394_v1 = vsub.f32 %v2381_v63, %v4778_v8 }
 0xcef   :  { %v2395_v2 = vmul.f32 %v2394_v1, %v2390_v44 }
 0xcf1   :  { %v4857_v45 = vadd.f32 %v2395_v2, %v4778_v8 }
 0xcf7   :  { %v3418_v16 = vpop.eup %3417 }
 0xcf8   :  { %v2383_v34 = vmul.f32 %v3418_v16, %v3416_v20 }
 0xcfa   :  { %v2386_v25 = vsub.f32 %v2383_v34, %v4782_v21 }
 0xcfc   :  { %v2392_v3 = vmul.f32 %v2390_v44, %v2386_v25 }
 0xcfe   :  { %v4861_v4 = vadd.f32 %v2392_v3, %v4782_v21 }
 0xd00   :  { %v2397_v6 = vpack.c.bf16 %v4861_v4, %v4861_v4 }
 0xd02   :  { %2399 = vst [vmem:[#allocation10 + $0x2c] sm:$0xf] %v2397_v6  ;;  %2438 = vmatmul.mubr.bf16.vlgmr.msra.gmra.mrb[80].mxu0 %v2397_v6  ;;  %2479 = vmatmul.mubr.bf16.vlgmr.msra.gmra.mrb[80].mxu1 %v2397_v6 }
 0xd03   :  { %2537 = vmatpush1.bf16.msra.mxu0 %v4707_v29  ;;  %2578 = vmatpush1.bf16.msra.mxu1 %v4710_v32 }
 0xd04   :  { %2538 = vmatprep.subr.bf16.mxu0 %v4713_v11  ;;  %2579 = vmatprep.subr.bf16.mxu1 %v4716_v35 }
 0xd05   :  { %2568 = vmatprep.mubr.bf16.mxu0 %v5122_v43  ;;  %2609 = vmatprep.mubr.bf16.mxu1 %v5122_v43 }
 0xd07   :  { %2539 = vmatpush1.bf16.msra.mxu0 %v4721_v58  ;;  %2580 = vmatpush1.bf16.msra.mxu1 %v4724_v5 }
 0xd08   :  { %2540 = vmatprep.subr.bf16.mxu0 %v4727_v12  ;;  %2581 = vmatprep.subr.bf16.mxu1 %v4730_v15 }
 0xd0b   :  { %2541 = vmatpush1.bf16.msra.mxu0 %v4733_v24  ;;  %2582 = vmatpush1.bf16.msra.mxu1 %v4736_v26 }
 0xd0c   :  { %2542 = vmatprep.subr.bf16.mxu0 %v4739_v38  ;;  %2583 = vmatprep.subr.bf16.mxu1 %v4742_v39 }
 0xd0f   :  { %2543 = vmatpush1.bf16.msra.mxu0 %v4745_v40  ;;  %2584 = vmatpush1.bf16.msra.mxu1 %v4748_v41 }
 0xd10   :  { %2544 = vmatprep.subr.bf16.mxu0 %v4751_v42  ;;  %2585 = vmatprep.subr.bf16.mxu1 %v4803_v27 }
 0xd13   :  { %2545 = vmatpush1.bf16.msra.mxu0 %v4806_v30  ;;  %2586 = vmatpush1.bf16.msra.mxu1 %v4809_v10 }
 0xd14   :  { %2546 = vmatprep.subr.bf16.mxu0 %v4812_v47  ;;  %2587 = vmatprep.subr.bf16.mxu1 %v4815_v33 }
 0xd17   :  { %2547 = vmatpush1.bf16.msra.mxu0 %v4818_v52  ;;  %2588 = vmatpush1.bf16.msra.mxu1 %v4821_v23 }
 0xd18   :  { %2548 = vmatprep.subr.bf16.mxu0 %v4824_v9  ;;  %2589 = vmatprep.subr.bf16.mxu1 %v4827_v53 }
 0xd1b   :  { %2549 = vmatpush1.bf16.msra.mxu0 %v4830_v54  ;;  %2590 = vmatpush1.bf16.msra.mxu1 %v4833_v55 }
 0xd1c   :  { %2550 = vmatprep.subr.bf16.mxu0 %v4836_v56  ;;  %2591 = vmatprep.subr.bf16.mxu1 %v4839_v57 }
 0xd1f   :  { %2551 = vmatpush1.bf16.msra.mxu0 %v4842_v59  ;;  %2592 = vmatpush1.bf16.msra.mxu1 %v4845_v60 }
 0xd20   :  { %2667 = vmatprep.subr.bf16.mxu0 %v4686_v0  ;;  %2708 = vmatprep.subr.bf16.mxu1 %v4689_v13 }
 0xdd5   :  { %v2439_v8 = vpop.f32.mrb[80].mxu0  ;;  %v2480_v21 = vpop.f32.mrb[80].mxu1 }
 0xdd6   :  { %v2487_v36 = vadd.f32 %v2439_v8, %v5159_v46  ;;  %v2489_v48 = vadd.f32 %v2480_v21, %v5160_v37  ;;  %v2441_v19 = vpop.f32.mrb[81].mxu0  ;;  %v2482_v62 = vpop.f32.mrb[81].mxu1 }
 0xdd7   :  { %v2488_v50 = vadd.f32 %v2441_v19, %v5161_v49  ;;  %v2490_v28 = vadd.f32 %v2482_v62, %v5162_v51  ;;  %v2443_v22 = vpop.f32.mrb[82].mxu0  ;;  %v2484_v31 = vpop.f32.mrb[82].mxu1 }
 0xdd8   :  { %v3095_v14 = vmul.f32 -1.442695, %v2487_v36  ;;  %v2444_v17 = vpop.f32.mrb[83].mxu0  ;;  %v2485_v7 = vpop.f32.mrb[83].mxu1  ;;  %v5163_v31 = vld [vmem:[#allocation58_spill] sm:$0xff] }
 0xdd9   :  { %v3096_v18 = vmul.f32 -1.442695, %v2488_v50  ;;  %v3097_v61 = vmul.f32 -1.442695, %v2490_v28  ;;  %v2521_v36 = vpop.permute.xlu0 %2520  ;;  %v5164_v17 = vld [vmem:[#allocation59_spill] sm:$0xff] }
 0xdda   :  { %3419 = vpow2.f32 %v3095_v14 }
 0xddb   :  { %3421 = vpow2.f32 %v3096_v18 }
 0xddc   :  { %3423 = vpow2.f32 %v3097_v61 }
 0xddd   :  { %3425 = vtanh.f32 %v2489_v48 }
 0xde4   :  { %v3420_v63 = vpop.eup %3419 }
 0xde5   :  { %v3422_v1 = vpop.eup %3421  ;;  %v2494_v44 = vadd.f32 1.0, %v3420_v63  ;;  %v5165_v63 = vld [vmem:[#allocation60_spill] sm:$0xff] }
 0xde6   :  { %v2500_v2 = vadd.f32 1.0, %v3422_v1  ;;  %v3424_v20 = vpop.eup %3423 }
 0xde7   :  { %3427 = vrcp.f32 %v2494_v44  ;;  %v3426_v16 = vpop.eup %3425  ;;  %v2507_v6 = vadd.f32 1.0, %v3424_v20  ;;  %v5166_v44 = vld [vmem:[#allocation61_spill] sm:$0xff] }
 0xde8   :  { %3429 = vrcp.f32 %v2500_v2 }
 0xde9   :  { %3431 = vrcp.f32 %v2507_v6 }
 0xdf1   :  { %v3428_v34 = vpop.eup %3427 }
 0xdf2   :  { %v3430_v25 = vpop.eup %3429  ;;  %v2511_v3 = vmul.f32 %v3428_v34, %v3426_v16 }
 0xdf3   :  { %v2510_v8 = vmul.f32 %v3430_v25, %v4857_v45  ;;  %v3432_v19 = vpop.eup %3431 }
 0xdf5   :  { %v2512_v21 = vadd.f32 %v2511_v3, %v2510_v8 }
 0xdf7   :  { %3433 = vtanh.f32 %v2512_v21  ;;  %v2525_v46 = vsub.f32 %v2512_v21, %v4857_v45 }
 0xdf9   :  { %v2526_v37 = vmul.f32 %v2525_v46, %v2521_v36 }
 0xdfb   :  { %v4906_v48 = vadd.f32 %v2526_v37, %v4857_v45 }
 0xe01   :  { %v3434_v62 = vpop.eup %3433 }
 0xe02   :  { %v2514_v49 = vmul.f32 %v3434_v62, %v3432_v19 }
 0xe04   :  { %v2517_v50 = vsub.f32 %v2514_v49, %v4861_v4 }
 0xe06   :  { %v2523_v51 = vmul.f32 %v2521_v36, %v2517_v50 }
 0xe08   :  { %v4910_v28 = vadd.f32 %v2523_v51, %v4861_v4 }
 0xe0a   :  { %v2528_v22 = vpack.c.bf16 %v4910_v28, %v4910_v28 }
 0xe0c   :  { %2530 = vst [vmem:[#allocation10 + $0x30] sm:$0xf] %v2528_v22  ;;  %2569 = vmatmul.mubr.bf16.vlgmr.msra.gmra.mrb[84].mxu0 %v2528_v22  ;;  %2610 = vmatmul.mubr.bf16.vlgmr.msra.gmra.mrb[84].mxu1 %v2528_v22 }
 0xe0d   :  { %2668 = vmatpush1.bf16.msra.mxu0 %v4707_v29  ;;  %2709 = vmatpush1.bf16.msra.mxu1 %v4710_v32 }
 0xe0e   :  { %2669 = vmatprep.subr.bf16.mxu0 %v4713_v11  ;;  %2710 = vmatprep.subr.bf16.mxu1 %v4716_v35 }
 0xe0f   :  { %2699 = vmatprep.mubr.bf16.mxu0 %v5122_v43  ;;  %2740 = vmatprep.mubr.bf16.mxu1 %v5122_v43 }
 0xe11   :  { %2670 = vmatpush1.bf16.msra.mxu0 %v4721_v58  ;;  %2711 = vmatpush1.bf16.msra.mxu1 %v4724_v5 }
 0xe12   :  { %2671 = vmatprep.subr.bf16.mxu0 %v4727_v12  ;;  %2712 = vmatprep.subr.bf16.mxu1 %v4730_v15 }
 0xe15   :  { %2672 = vmatpush1.bf16.msra.mxu0 %v4733_v24  ;;  %2713 = vmatpush1.bf16.msra.mxu1 %v4736_v26 }
 0xe16   :  { %2673 = vmatprep.subr.bf16.mxu0 %v4739_v38  ;;  %2714 = vmatprep.subr.bf16.mxu1 %v4742_v39 }
 0xe19   :  { %2674 = vmatpush1.bf16.msra.mxu0 %v4745_v40  ;;  %2715 = vmatpush1.bf16.msra.mxu1 %v4748_v41 }
 0xe1a   :  { %2675 = vmatprep.subr.bf16.mxu0 %v4751_v42  ;;  %2716 = vmatprep.subr.bf16.mxu1 %v4803_v27 }
 0xe1d   :  { %2676 = vmatpush1.bf16.msra.mxu0 %v4806_v30  ;;  %2717 = vmatpush1.bf16.msra.mxu1 %v4809_v10 }
 0xe1e   :  { %2677 = vmatprep.subr.bf16.mxu0 %v4812_v47  ;;  %2718 = vmatprep.subr.bf16.mxu1 %v4815_v33 }
 0xe21   :  { %2678 = vmatpush1.bf16.msra.mxu0 %v4818_v52  ;;  %2719 = vmatpush1.bf16.msra.mxu1 %v4821_v23 }
 0xe22   :  { %2679 = vmatprep.subr.bf16.mxu0 %v4824_v9  ;;  %2720 = vmatprep.subr.bf16.mxu1 %v4827_v53 }
 0xe25   :  { %2680 = vmatpush1.bf16.msra.mxu0 %v4830_v54  ;;  %2721 = vmatpush1.bf16.msra.mxu1 %v4833_v55 }
 0xe26   :  { %2681 = vmatprep.subr.bf16.mxu0 %v4836_v56  ;;  %2722 = vmatprep.subr.bf16.mxu1 %v4839_v57 }
 0xe29   :  { %2682 = vmatpush1.bf16.msra.mxu0 %v4842_v59  ;;  %2723 = vmatpush1.bf16.msra.mxu1 %v4845_v60 }
 0xe2a   :  { %2798 = vmatprep.subr.bf16.mxu0 %v4686_v0  ;;  %2839 = vmatprep.subr.bf16.mxu1 %v4689_v13 }
 0xedf   :  { %v2570_v45 = vpop.f32.mrb[84].mxu0  ;;  %v2611_v4 = vpop.f32.mrb[84].mxu1 }
 0xee0   :  { %v2618_v14 = vadd.f32 %v2570_v45, %v5163_v31  ;;  %v2620_v7 = vadd.f32 %v2611_v4, %v5164_v17  ;;  %v2572_v18 = vpop.f32.mrb[85].mxu0  ;;  %v2613_v61 = vpop.f32.mrb[85].mxu1 }
 0xee1   :  { %v2619_v1 = vadd.f32 %v2572_v18, %v5165_v63  ;;  %v2621_v2 = vadd.f32 %v2613_v61, %v5166_v44  ;;  %v2574_v20 = vpop.f32.mrb[86].mxu0  ;;  %v2615_v16 = vpop.f32.mrb[86].mxu1 }
 0xee2   :  { %v3099_v34 = vmul.f32 -1.442695, %v2618_v14  ;;  %v2575_v25 = vpop.f32.mrb[87].mxu0  ;;  %v2616_v3 = vpop.f32.mrb[87].mxu1 }
 0xee3   :  { %v3100_v0 = vmul.f32 -1.442695, %v2619_v1  ;;  %v3101_v13 = vmul.f32 -1.442695, %v2621_v2  ;;  %v2652_v4 = vpop.permute.xlu1 %2651 }
 0xee4   :  { %3435 = vpow2.f32 %v3099_v34 }
 0xee5   :  { %3437 = vpow2.f32 %v3100_v0 }
 0xee6   :  { %3439 = vpow2.f32 %v3101_v13 }
 0xee7   :  { %3441 = vtanh.f32 %v2620_v7 }
 0xeee   :  { %v3436_v6 = vpop.eup %3435 }
 0xeef   :  { %v3438_v8 = vpop.eup %3437  ;;  %v2625_v21 = vadd.f32 1.0, %v3436_v6 }
 0xef0   :  { %v2631_v46 = vadd.f32 1.0, %v3438_v8  ;;  %v3440_v36 = vpop.eup %3439 }
 0xef1   :  { %3443 = vrcp.f32 %v2625_v21  ;;  %v3442_v37 = vpop.eup %3441  ;;  %v2638_v50 = vadd.f32 1.0, %v3440_v36 }
 0xef2   :  { %3445 = vrcp.f32 %v2631_v46  ;;  %v5171_v46 = vld [vmem:[#allocation66_spill] sm:$0xff] }
 0xef3   :  { %3447 = vrcp.f32 %v2638_v50  ;;  %v5173_v50 = vld [vmem:[#allocation68_spill] sm:$0xff] }
 0xefb   :  { %v3444_v19 = vpop.eup %3443 }
 0xefc   :  { %v3446_v62 = vpop.eup %3445  ;;  %v2642_v49 = vmul.f32 %v3444_v19, %v3442_v37  ;;  %v5172_v37 = vld [vmem:[#allocation67_spill] sm:$0xff] }
 0xefd   :  { %v2641_v51 = vmul.f32 %v3446_v62, %v4906_v48  ;;  %v3448_v17 = vpop.eup %3447 }
 0xeff   :  { %v2643_v22 = vadd.f32 %v2642_v49, %v2641_v51 }
 0xf01   :  { %3449 = vtanh.f32 %v2643_v22  ;;  %v2656_v45 = vsub.f32 %v2643_v22, %v4906_v48  ;;  %v5174_v22 = vld [vmem:[#allocation69_spill] sm:$0xff] }
 0xf03   :  { %v2657_v31 = vmul.f32 %v2656_v45, %v2652_v4 }
 0xf05   :  { %v4955_v14 = vadd.f32 %v2657_v31, %v4906_v48 }
 0xf0b   :  { %v3450_v7 = vpop.eup %3449 }
 0xf0c   :  { %v2645_v18 = vmul.f32 %v3450_v7, %v3448_v17 }
 0xf0e   :  { %v2648_v61 = vsub.f32 %v2645_v18, %v4910_v28 }
 0xf10   :  { %v2654_v63 = vmul.f32 %v2652_v4, %v2648_v61 }
 0xf12   :  { %v4959_v1 = vadd.f32 %v2654_v63, %v4910_v28  ;;  %v2783_v28 = vpop.permute.xlu0 %2782 }
 0xf14   :  { %v2659_v44 = vpack.c.bf16 %v4959_v1, %v4959_v1 }
 0xf16   :  { %2661 = vst [vmem:[#allocation10 + $0x34] sm:$0xf] %v2659_v44  ;;  %2700 = vmatmul.mubr.bf16.vlgmr.msra.gmra.mrb[88].mxu0 %v2659_v44  ;;  %2741 = vmatmul.mubr.bf16.vlgmr.msra.gmra.mrb[88].mxu1 %v2659_v44 }
 0xf17   :  { %2799 = vmatpush1.bf16.msra.mxu0 %v4707_v29  ;;  %2840 = vmatpush1.bf16.msra.mxu1 %v4710_v32  ;;  %v5167_v32 = vld [vmem:[#allocation62_spill] sm:$0xff] }
 0xf18   :  { %2800 = vmatprep.subr.bf16.mxu0 %v4713_v11  ;;  %2841 = vmatprep.subr.bf16.mxu1 %v4716_v35  ;;  %v5168_v35 = vld [vmem:[#allocation63_spill] sm:$0xff] }
 0xf19   :  { %2830 = vmatprep.mubr.bf16.mxu0 %v5122_v43  ;;  %2871 = vmatprep.mubr.bf16.mxu1 %v5122_v43 }
 0xf1b   :  { %2801 = vmatpush1.bf16.msra.mxu0 %v4721_v58  ;;  %2842 = vmatpush1.bf16.msra.mxu1 %v4724_v5 }
 0xf1c   :  { %2802 = vmatprep.subr.bf16.mxu0 %v4727_v12  ;;  %2843 = vmatprep.subr.bf16.mxu1 %v4730_v15  ;;  %v5169_v15 = vld [vmem:[#allocation64_spill] sm:$0xff] }
 0xf1f   :  { %2803 = vmatpush1.bf16.msra.mxu0 %v4733_v24  ;;  %2844 = vmatpush1.bf16.msra.mxu1 %v4736_v26  ;;  %v5170_v26 = vld [vmem:[#allocation65_spill] sm:$0xff] }
 0xf20   :  { %2804 = vmatprep.subr.bf16.mxu0 %v4739_v38  ;;  %2845 = vmatprep.subr.bf16.mxu1 %v4742_v39 }
 0xf23   :  { %2805 = vmatpush1.bf16.msra.mxu0 %v4745_v40  ;;  %2846 = vmatpush1.bf16.msra.mxu1 %v4748_v41 }
 0xf24   :  { %2806 = vmatprep.subr.bf16.mxu0 %v4751_v42  ;;  %2847 = vmatprep.subr.bf16.mxu1 %v4803_v27 }
 0xf27   :  { %2807 = vmatpush1.bf16.msra.mxu0 %v4806_v30  ;;  %2848 = vmatpush1.bf16.msra.mxu1 %v4809_v10 }
 0xf28   :  { %2808 = vmatprep.subr.bf16.mxu0 %v4812_v47  ;;  %2849 = vmatprep.subr.bf16.mxu1 %v4815_v33 }
 0xf2b   :  { %2809 = vmatpush1.bf16.msra.mxu0 %v4818_v52  ;;  %2850 = vmatpush1.bf16.msra.mxu1 %v4821_v23 }
 0xf2c   :  { %2810 = vmatprep.subr.bf16.mxu0 %v4824_v9  ;;  %2851 = vmatprep.subr.bf16.mxu1 %v4827_v53 }
 0xf2f   :  { %2811 = vmatpush1.bf16.msra.mxu0 %v4830_v54  ;;  %2852 = vmatpush1.bf16.msra.mxu1 %v4833_v55 }
 0xf30   :  { %2812 = vmatprep.subr.bf16.mxu0 %v4836_v56  ;;  %2853 = vmatprep.subr.bf16.mxu1 %v4839_v57 }
 0xf33   :  { %2813 = vmatpush1.bf16.msra.mxu0 %v4842_v59  ;;  %2854 = vmatpush1.bf16.msra.mxu1 %v4845_v60 }
 0xfe9   :  { %v2701_v43 = vpop.f32.mrb[88].mxu0  ;;  %v2742_v29 = vpop.f32.mrb[88].mxu1 }
 0xfea   :  { %v2749_v11 = vadd.f32 %v2701_v43, %v5167_v32  ;;  %v2751_v58 = vadd.f32 %v2742_v29, %v5168_v35  ;;  %v2703_v5 = vpop.f32.mrb[89].mxu0  ;;  %v2744_v12 = vpop.f32.mrb[89].mxu1 }
 0xfeb   :  { %v2750_v24 = vadd.f32 %v2703_v5, %v5169_v15  ;;  %v2752_v38 = vadd.f32 %v2744_v12, %v5170_v26  ;;  %v2705_v39 = vpop.f32.mrb[90].mxu0  ;;  %v2746_v40 = vpop.f32.mrb[90].mxu1 }
 0xfec   :  { %v3103_v41 = vmul.f32 -1.442695, %v2749_v11  ;;  %v2706_v42 = vpop.f32.mrb[91].mxu0  ;;  %v2747_v27 = vpop.f32.mrb[91].mxu1 }
 0xfed   :  { %v3104_v30 = vmul.f32 -1.442695, %v2750_v24  ;;  %v3105_v10 = vmul.f32 -1.442695, %v2752_v38  ;;  %v2914_v26 = vpop.permute.xlu1 %2913 }
 0xfee   :  { %3451 = vpow2.f32 %v3103_v41 }
 0xfef   :  { %3453 = vpow2.f32 %v3104_v30 }
 0xff0   :  { %3455 = vpow2.f32 %v3105_v10 }
 0xff1   :  { %3457 = vtanh.f32 %v2751_v58 }
 0xff8   :  { %v3452_v47 = vpop.eup %3451 }
 0xff9   :  { %v3454_v33 = vpop.eup %3453  ;;  %v2756_v52 = vadd.f32 1.0, %v3452_v47 }
 0xffa   :  { %v2762_v23 = vadd.f32 1.0, %v3454_v33  ;;  %v3456_v9 = vpop.eup %3455 }
 0xffb   :  { %3459 = vrcp.f32 %v2756_v52  ;;  %v3458_v53 = vpop.eup %3457  ;;  %v2769_v57 = vadd.f32 1.0, %v3456_v9 }
 0xffc   :  { %3461 = vrcp.f32 %v2762_v23 }
 0xffd   :  { %3463 = vrcp.f32 %v2769_v57 }
0x1005   :  { %v3460_v54 = vpop.eup %3459 }
0x1006   :  { %v3462_v55 = vpop.eup %3461  ;;  %v2773_v56 = vmul.f32 %v3460_v54, %v3458_v53 }
0x1007   :  { %v2772_v59 = vmul.f32 %v3462_v55, %v4955_v14  ;;  %v3464_v16 = vpop.eup %3463 }
0x1009   :  { %v2774_v60 = vadd.f32 %v2773_v56, %v2772_v59 }
0x100b   :  { %3465 = vtanh.f32 %v2774_v60  ;;  %v2787_v48 = vsub.f32 %v2774_v60, %v4955_v14 }
0x100d   :  { %v2788_v2 = vmul.f32 %v2787_v48, %v2783_v28 }
0x100f   :  { %v2789_v20 = vadd.f32 %v2788_v2, %v4955_v14 }
0x1015   :  { %v3466_v34 = vpop.eup %3465 }
0x1016   :  { %v2776_v25 = vmul.f32 %v3466_v34, %v3464_v16 }
0x1018   :  { %v2779_v3 = vsub.f32 %v2776_v25, %v4959_v1 }
0x101a   :  { %v2785_v0 = vmul.f32 %v2783_v28, %v2779_v3 }
0x101c   :  { %v2786_v13 = vadd.f32 %v2785_v0, %v4959_v1 }
0x101e   :  { %v2790_v6 = vpack.c.bf16 %v2786_v13, %v2786_v13 }
0x1020   :  { %2792 = vst [vmem:[#allocation10 + $0x38] sm:$0xf] %v2790_v6  ;;  %2831 = vmatmul.mubr.bf16.vlgmr.msra.gmra.mrb[92].mxu0 %v2790_v6  ;;  %2872 = vmatmul.mubr.bf16.vlgmr.msra.gmra.mrb[92].mxu1 %v2790_v6 }
0x10f3   :  { %v2832_v8 = vpop.f32.mrb[92].mxu0  ;;  %v2873_v21 = vpop.f32.mrb[92].mxu1 }
0x10f4   :  { %v2880_v36 = vadd.f32 %v2832_v8, %v5171_v46  ;;  %v2882_v19 = vadd.f32 %v2873_v21, %v5172_v37  ;;  %v2834_v62 = vpop.f32.mrb[93].mxu0  ;;  %v2875_v49 = vpop.f32.mrb[93].mxu1 }
0x10f5   :  { %v2881_v51 = vadd.f32 %v2834_v62, %v5173_v50  ;;  %v2883_v45 = vadd.f32 %v2875_v49, %v5174_v22  ;;  %v2836_v4 = vpop.f32.mrb[94].mxu0  ;;  %v2877_v31 = vpop.f32.mrb[94].mxu1 }
0x10f6   :  { %v3107_v14 = vmul.f32 -1.442695, %v2880_v36  ;;  %v2837_v17 = vpop.f32.mrb[95].mxu0  ;;  %v2878_v7 = vpop.f32.mrb[95].mxu1 }
0x10f7   :  { %v3108_v18 = vmul.f32 -1.442695, %v2881_v51  ;;  %v3109_v61 = vmul.f32 -1.442695, %v2883_v45 }
0x10f8   :  { %3467 = vpow2.f32 %v3107_v14 }
0x10f9   :  { %3469 = vpow2.f32 %v3108_v18 }
0x10fa   :  { %3471 = vpow2.f32 %v3109_v61 }
0x10fb   :  { %3473 = vtanh.f32 %v2882_v19 }
0x1102   :  { %v3468_v63 = vpop.eup %3467 }
0x1103   :  { %v3470_v1 = vpop.eup %3469  ;;  %v2887_v44 = vadd.f32 1.0, %v3468_v63 }
0x1104   :  { %v2893_v43 = vadd.f32 1.0, %v3470_v1  ;;  %v3472_v29 = vpop.eup %3471 }
0x1105   :  { %3475 = vrcp.f32 %v2887_v44  ;;  %v3474_v32 = vpop.eup %3473  ;;  %v2900_v5 = vadd.f32 1.0, %v3472_v29 }
0x1106   :  { %3477 = vrcp.f32 %v2893_v43 }
0x1107   :  { %3479 = vrcp.f32 %v2900_v5 }
0x110f   :  { %v3476_v11 = vpop.eup %3475 }
0x1110   :  { %v3478_v35 = vpop.eup %3477  ;;  %v2904_v58 = vmul.f32 %v3476_v11, %v3474_v32 }
0x1111   :  { %v2903_v12 = vmul.f32 %v3478_v35, %v2789_v20  ;;  %v3480_v40 = vpop.eup %3479 }
0x1113   :  { %v2905_v15 = vadd.f32 %v2904_v58, %v2903_v12 }
0x1115   :  { %3481 = vtanh.f32 %v2905_v15  ;;  %v2918_v24 = vsub.f32 %v2905_v15, %v2789_v20 }
0x1117   :  { %v2919_v38 = vmul.f32 %v2918_v24, %v2914_v26 }
0x1119   :  { %v2920_v39 = vadd.f32 %v2919_v38, %v2789_v20 }
0x111b   :  { %2930 = vst [vmem:[#allocation13] sm:$0xff] %v2920_v39 }
0x111f   :  { %v3482_v41 = vpop.eup %3481 }
0x1120   :  { %v2907_v42 = vmul.f32 %v3482_v41, %v3480_v40 }
0x1122   :  { %v2910_v27 = vsub.f32 %v2907_v42, %v2786_v13 }
0x1124   :  { %v2916_v30 = vmul.f32 %v2914_v26, %v2910_v27 }
0x1126   :  { %v2917_v10 = vadd.f32 %v2916_v30, %v2786_v13 }
0x1128   :  { %v2921_v47 = vpack.c.bf16 %v2917_v10, %v2917_v10  ;;  %2929 = vst [vmem:[#allocation11] sm:$0xff] %v2917_v10 }
0x1129   :  { %3602 = shalt.err (!%p3599_p6)
}
0x112a   :  { %s3603_s5 = scalar_lea.hbm %s5066_s8, 128 }
0x112b   :  { %p3604_p7 = scmp.ne.s32.totalorder %s5066_s8, %s3603_s5  ;;  %p3607_p8 = scmp.lt.u32.totalorder %s3603_s5, %s5066_s8 }
0x112d   :  { %p3609_p9 = pnand %p3607_p8, %p3604_p7 }
0x112f   :  { %3612 = shalt.err (!%p3609_p9)
}
0x1130   :  { %2952 = dma.vmem_to_hbm [thread:$0]  %s2950_s16, 128, %s5066_s8, [#allocation12]   ;;  %2923 = vst [vmem:[#allocation10 + $0x3c] sm:$0xf] %v2921_v47 }
0x1131   :  { %s3613_s27 = scalar_lea.vmem %s5010_s20, 128  ;;  %p3618_p11 = scmp.lt.s32.totalorder %s5010_s20, %s5010_s20 }
0x1132   :  { %p3614_p10 = scmp.ne.s32.totalorder %s5010_s20, %s3613_s27  ;;  %p3619_p12 = scmp.lt.s32.totalorder %s3613_s27, %s3613_s27 }
0x1134   :  { %p3620_p13 = por %p3619_p12, %p3618_p11 }
0x1136   :  { %p3621_p0 = pnand %p3620_p13, %p3614_p10 }
0x1138   :  { %3624 = shalt.err (!%p3621_p0)
}
0x1139   :  { %s3625_s30 = scalar_lea.hbm %s5067_s9, 128 }
0x113a   :  { %p3626_p1 = scmp.ne.s32.totalorder %s5067_s9, %s3625_s30  ;;  %p3629_p2 = scmp.lt.u32.totalorder %s3625_s30, %s5067_s9 }
0x113c   :  { %p3631_p3 = pnand %p3629_p2, %p3626_p1 }
0x113e   :  { %3634 = shalt.err (!%p3631_p3)
}
0x113f   :  { %2962 = dma.vmem_to_hbm [thread:$0]  %s5010_s20, 128, %s5067_s9, [#allocation12]  }
0x1140   :  { %s3635_s13 = scalar_lea.vmem %s5008_s18, 1024  ;;  %p3640_p5 = scmp.lt.s32.totalorder %s5008_s18, %s5008_s18 }
0x1141   :  { %p3636_p4 = scmp.ne.s32.totalorder %s5008_s18, %s3635_s13  ;;  %p3641_p6 = scmp.lt.s32.totalorder %s3635_s13, %s3635_s13 }
0x1143   :  { %p3642_p7 = por %p3641_p6, %p3640_p5 }
0x1145   :  { %p3643_p8 = pnand %p3642_p7, %p3636_p4 }
0x1147   :  { %3646 = shalt.err (!%p3643_p8)
}
0x1148   :  { %s3647_s1 = scalar_lea.hbm %s5065_s7, 1024 }
0x1149   :  { %p3648_p9 = scmp.ne.s32.totalorder %s5065_s7, %s3647_s1  ;;  %p3651_p10 = scmp.lt.u32.totalorder %s3647_s1, %s5065_s7 }
0x114b   :  { %p3653_p11 = pnand %p3651_p10, %p3648_p9 }
0x114d   :  { %3656 = shalt.err (!%p3653_p11)
}
0x114e   :  { %s3673_s9 = smov 64   ;;  %s3674_s20 = smov 4  }
0x114f   :  { %2942 = dma.vmem_to_hbm [thread:$0]  %s5008_s18, 1024, %s5065_s7, [#allocation7], %s3673_s9, %s3673_s9, %s3674_s20  }
0x1150   :  { %3661 = dma.done.wait [#allocation7], 1024  }
0x1151   :  { %3662 = vsyncadd [#allocation7], 4294966272 }
0x1152   :  { %3663 = dma.done.wait [#allocation12], 256  }
0x1153   :  { %3664 = vsyncadd [#allocation12], 4294967040 }
0x1154   :  { %2972 = vsyncpa [#allocation6], 1 }
0x1155   :  { %2973 = vsyncpa [#allocation9], 1 }
0x1156   :  { %2974 = vsyncpa [#allocation7], 1 }
0x1157   :  { %2975 = vsyncpa [#allocation12], 1 }

</bundles_post_ra>
